<compile_context>
chip_gen: v7x
topology: tpu7x:2x2x1
jax: 0.10.0
libtpu: 0.0.40
codegen_flags: <defaults>
</compile_context>

<pallas_src>
import numpy as np

import jax
import jax.numpy as jnp
from jax.experimental import pallas as pl
from jax.experimental.pallas import tpu as pltpu

C_HID = 32  # conv channel width fixed by the module


def _out_size(s):
    # spatial size after Conv2d(k=3, stride=2, padding=1)
    return (s - 1) // 2 + 1


# ----------------------------------------------------------------------------
# Offline parameter preparation (pure re-indexing of the torch weights)
# ----------------------------------------------------------------------------
def _expand_conv_row_weights(w_oihw, s_in):
    """Fold kernel-width taps + stride-2 subsampling into per-kernel-row matmuls.

    Returns m: (3, (s_in+2)*Cin, s_out*Cout) with
      m[di, w*Cin + c, wo*Cout + co] = w[co, c, di, w - 2*wo]  (if 0 <= w-2*wo < 3)
    so that   out_row(ho) = sum_di padded_in_row(2*ho + di) @ m[di]
    reproduces Conv2d(k=3, stride=2, padding=1) exactly.
    """
    w = np.asarray(w_oihw, np.float32)
    c_out, c_in, kh, kw = w.shape
    s_pad, s_out = s_in + 2, _out_size(s_in)
    m = np.zeros((kh, s_pad * c_in, s_out * c_out), np.float32)
    for di in range(kh):
        for wo in range(s_out):
            for dj in range(kw):
                col = 2 * wo + dj
                m[di, col * c_in:(col + 1) * c_in,
                  wo * c_out:(wo + 1) * c_out] += w[:, :, di, dj].T
    return m


def prepare_params(params, img_size, encoding_dim):
    """One-time weight transform: row-matmul conv weights (bf16), width-tiled
    biases (f32), and a projection matrix with the NCHW flatten + transpose
    folded in."""
    s1 = img_size
    s2, s3, s4 = _out_size(s1), _out_size(_out_size(s1)), _out_size(_out_size(_out_size(s1)))
    w1 = _expand_conv_row_weights(params["conv1_w"], s1)
    w2 = _expand_conv_row_weights(params["conv2_w"], s2)
    w3 = _expand_conv_row_weights(params["conv3_w"], s3)
    b1 = np.tile(np.asarray(params["conv1_b"], np.float32), s2)[None, :]
    b2 = np.tile(np.asarray(params["conv2_b"], np.float32), s3)[None, :]
    b3 = np.tile(np.asarray(params["conv3_b"], np.float32), s4)[None, :]
    # kernel feature order is (h, w, c); torch flatten order is (c, h, w).
    pw = np.asarray(params["proj_w"], np.float32)                 # (ENC, C*s4*s4)
    pw = pw.reshape(encoding_dim, C_HID, s4, s4).transpose(2, 3, 1, 0)
    pw = pw.reshape(s4 * s4 * C_HID, encoding_dim)                # (F, ENC)
    pb = np.asarray(params["proj_b"], np.float32)[None, :]
    return {
        "w1": jnp.asarray(w1, jnp.bfloat16), "b1": jnp.asarray(b1),
        "w2": jnp.asarray(w2, jnp.bfloat16), "b2": jnp.asarray(b2),
        "w3": jnp.asarray(w3, jnp.bfloat16), "b3": jnp.asarray(b3),
        "wp": jnp.asarray(pw, jnp.bfloat16), "bp": jnp.asarray(pb),
    }


# ----------------------------------------------------------------------------
# Fused Pallas kernel: conv1 -> conv2 -> conv3 -> projection -> softmax(/T)
# ----------------------------------------------------------------------------
def _make_fused_kernel(s2, s3, s4, inv_temperature):
    c = C_HID

    def kernel(x_ref, w1_ref, b1_ref, w2_ref, b2_ref, w3_ref, b3_ref,
               wp_ref, bp_ref, o_ref, a2_ref, a3_ref):
        # Zero the padded-activation scratch (only the 1-pixel border has to be
        # zero, but the buffers are tiny).
        a2_ref[...] = jnp.zeros_like(a2_ref)
        a3_ref[...] = jnp.zeros_like(a3_ref)

        def conv_row(in_ref, w_ref, b_ref, ho):
            acc = b_ref[...]                                      # (1, Wout*C) f32
            for di in range(3):
                r = 2 * ho + di                                   # static index
                row = in_ref[r:r + 1, :].astype(jnp.bfloat16)     # (1, (Win+2)*Cin)
                acc = acc + jnp.dot(row, w_ref[di],
                                    preferred_element_type=jnp.float32)
            return jnp.maximum(acc, 0.0)                          # bias + ReLU

        # conv1: rows read from the pre-padded input block, written into the
        # interior of conv2's padded-input scratch (contiguous static slice).
        for ho in range(s2):
            a2_ref[1 + ho:2 + ho, c:c + s2 * c] = conv_row(x_ref, w1_ref, b1_ref, ho)

        # conv2 -> interior of conv3's padded-input scratch.
        for ho in range(s3):
            a3_ref[1 + ho:2 + ho, c:c + s3 * c] = conv_row(a2_ref, w2_ref, b2_ref, ho)

        # conv3 rows feed the (flatten-folded) projection directly.
        logits = bp_ref[...]                                      # (1, ENC) f32
        for ho in range(s4):
            frow = conv_row(a3_ref, w3_ref, b3_ref, ho).astype(jnp.bfloat16)
            wp_slice = wp_ref[ho * s4 * c:(ho + 1) * s4 * c, :]   # (s4*C, ENC)
            logits = logits + jnp.dot(frow, wp_slice,
                                      preferred_element_type=jnp.float32)

        # temperature softmax (numerically stable), EUP reciprocal.
        logits = logits * inv_temperature
        m = jnp.max(logits, axis=-1, keepdims=True)
        e = jnp.exp(logits - m)
        denom = jnp.sum(e, axis=-1, keepdims=True)
        o_ref[...] = e * pl.reciprocal(denom, approx=True)

    return kernel


def make_cnn_encoder(params, img_size, in_channels, encoding_dim, temperature=1.0):
    """Returns (prepared_params, jitted forward(prepared_params, x_nchw))."""
    s1 = img_size
    s2, s3, s4 = _out_size(s1), _out_size(_out_size(s1)), _out_size(_out_size(_out_size(s1)))
    c = C_HID
    prep = prepare_params(params, img_size, encoding_dim)
    kernel = _make_fused_kernel(s2, s3, s4, float(1.0 / temperature))

    def full(shape):  # whole-array block, constant across the batch grid
        return pl.BlockSpec(shape, lambda b: (0,) * len(shape))

    def forward(prep, x_nchw):
        B = x_nchw.shape[0]
        # NCHW -> NHWC, zero-pad the spatial border, flatten each padded row.
        x = jnp.transpose(x_nchw, (0, 2, 3, 1))
        xp = jnp.pad(x, ((0, 0), (1, 1), (1, 1), (0, 0)))
        xp = xp.reshape(B, s1 + 2, (s1 + 2) * in_channels)

        weight_args = (prep["w1"], prep["b1"], prep["w2"], prep["b2"],
                       prep["w3"], prep["b3"], prep["wp"], prep["bp"])
        flops = 2 * B * (s2 * 3 * ((s1 + 2) * in_channels) * (s2 * c)
                         + s3 * 3 * ((s2 + 2) * c) * (s3 * c)
                         + s4 * 3 * ((s3 + 2) * c) * (s4 * c)
                         + (s4 * s4 * c) * encoding_dim)
        bytes_accessed = (xp.size * 4 + B * encoding_dim * 4
                          + sum(int(np.prod(a.shape)) * a.dtype.itemsize
                                for a in weight_args))

        grid_spec = pltpu.PrefetchScalarGridSpec(
            num_scalar_prefetch=0,
            grid=(B,),
            in_specs=[
                pl.BlockSpec((None, s1 + 2, (s1 + 2) * in_channels),
                             lambda b: (b, 0, 0)),
                full(prep["w1"].shape), full(prep["b1"].shape),
                full(prep["w2"].shape), full(prep["b2"].shape),
                full(prep["w3"].shape), full(prep["b3"].shape),
                full(prep["wp"].shape), full(prep["bp"].shape),
            ],
            out_specs=pl.BlockSpec((None, 1, encoding_dim), lambda b: (b, 0, 0)),
            scratch_shapes=[
                pltpu.VMEM((s2 + 2, (s2 + 2) * c), jnp.float32),  # conv2 padded input
                pltpu.VMEM((s3 + 2, (s3 + 2) * c), jnp.float32),  # conv3 padded input
            ],
        )
        out = pl.pallas_call(
            kernel,
            out_shape=jax.ShapeDtypeStruct((B, 1, encoding_dim), jnp.float32),
            grid_spec=grid_spec,
            compiler_params=pltpu.CompilerParams(
                dimension_semantics=("parallel",)),   # v7x: 2 TCs split the batch
            cost_estimate=pl.CostEstimate(flops=flops,
                                          transcendentals=B * encoding_dim,
                                          bytes_accessed=bytes_accessed),
        )(xp, *weight_args)
        return out.reshape(B, encoding_dim)

    return prep, jax.jit(forward)


# ----------------------------------------------------------------------------
# Parameter init (matches torch layouts) and a pure-JAX reference
# ----------------------------------------------------------------------------
def init_params(key, img_size, in_channels, encoding_dim):
    ks = jax.random.split(key, 8)
    final_feat = (img_size // 8) ** 2 * 32
    return {
        "conv1_w": jax.random.normal(ks[0], (32, in_channels, 3, 3), jnp.float32) * 0.1,
        "conv1_b": jax.random.normal(ks[1], (32,), jnp.float32) * 0.1,
        "conv2_w": jax.random.normal(ks[2], (32, 32, 3, 3), jnp.float32) * 0.1,
        "conv2_b": jax.random.normal(ks[3], (32,), jnp.float32) * 0.1,
        "conv3_w": jax.random.normal(ks[4], (32, 32, 3, 3), jnp.float32) * 0.1,
        "conv3_b": jax.random.normal(ks[5], (32,), jnp.float32) * 0.1,
        # torch nn.Linear stores (out_features, in_features)
        "proj_w": jax.random.normal(ks[6], (encoding_dim, final_feat), jnp.float32) * 0.1,
        "proj_b": jax.random.normal(ks[7], (encoding_dim,), jnp.float32) * 0.1,
    }


def reference_forward(params, x_nchw, temperature=1.0):
    def conv(x, w, b):
        y = jax.lax.conv_general_dilated(
            x, w, window_strides=(2, 2), padding=((1, 1), (1, 1)),
            dimension_numbers=("NCHW", "OIHW", "NCHW"))
        return jax.nn.relu(y + b[None, :, None, None])

    y = conv(x_nchw, params["conv1_w"], params["conv1_b"])
    y = conv(y, params["conv2_w"], params["conv2_b"])
    y = conv(y, params["conv3_w"], params["conv3_b"])
    feat = y.reshape(y.shape[0], -1)                 # torch's NCHW flatten
    logits = feat @ params["proj_w"].T + params["proj_b"]
    return jax.nn.softmax(logits / temperature, axis=-1)


if __name__ == "__main__":
    img_size, in_channels, encoding_dim, embedding_dim = 16, 4, 32, 32
    batch, temperature = 2, 1.0

    key = jax.random.PRNGKey(0)
    k_param, k_x = jax.random.split(key)
    params = init_params(k_param, img_size, in_channels, encoding_dim)
    x = jax.random.normal(k_x, (batch, in_channels, img_size, img_size), jnp.float32)

    prep, forward = make_cnn_encoder(params, img_size, in_channels,
                                     encoding_dim, temperature)
    out = jax.block_until_ready(forward(prep, x))

    assert out.shape == (batch, encoding_dim)
    # softmax rows sum to 1 (approx EUP reciprocal in-kernel)
    assert bool(jnp.allclose(jnp.sum(out, axis=-1), 1.0, atol=5e-3))
    # matches the pure-JAX / PyTorch reference (bf16 MXU operands in-kernel)
    ref = reference_forward(params, x, temperature)
    assert bool(jnp.allclose(out, ref, atol=5e-3)), float(jnp.max(jnp.abs(out - ref)))
    print("KERNEL_OK")
</pallas_src>

<mosaic_0001>
module attributes {stable_mosaic.version = 11 : i64} {
  func.func @kernel(%arg0: i32, %arg1: memref<1x18x72xf32, #tpu.memory_space<vmem>>, %arg2: memref<3x72x256xbf16, #tpu.memory_space<vmem>>, %arg3: memref<1x256xf32, #tpu.memory_space<vmem>>, %arg4: memref<3x320x128xbf16, #tpu.memory_space<vmem>>, %arg5: memref<1x128xf32, #tpu.memory_space<vmem>>, %arg6: memref<3x192x64xbf16, #tpu.memory_space<vmem>>, %arg7: memref<1x64xf32, #tpu.memory_space<vmem>>, %arg8: memref<128x32xbf16, #tpu.memory_space<vmem>>, %arg9: memref<1x32xf32, #tpu.memory_space<vmem>>, %arg10: memref<1x1x32xf32, #tpu.memory_space<vmem>>, %arg11: memref<10x320xf32, #tpu.memory_space<vmem>>, %arg12: memref<6x192xf32, #tpu.memory_space<vmem>>) attributes {dimension_semantics = [#tpu.dimension_semantics<parallel>], iteration_bounds = array<i64: 2>, scalar_prefetch = 0 : i64, scratch_operands = 2 : i64, tpu.core_type = #tpu.core_type<tc>, window_params = [{transform_indices = @transform_0, window_bounds = array<i64: 1, 18, 72>}, {pipeline_mode = #tpu.pipeline_mode<synchronous>, transform_indices = @transform_1, window_bounds = array<i64: 3, 72, 256>}, {pipeline_mode = #tpu.pipeline_mode<synchronous>, transform_indices = @transform_2, window_bounds = array<i64: 1, 256>}, {pipeline_mode = #tpu.pipeline_mode<synchronous>, transform_indices = @transform_3, window_bounds = array<i64: 3, 320, 128>}, {pipeline_mode = #tpu.pipeline_mode<synchronous>, transform_indices = @transform_4, window_bounds = array<i64: 1, 128>}, {pipeline_mode = #tpu.pipeline_mode<synchronous>, transform_indices = @transform_5, window_bounds = array<i64: 3, 192, 64>}, {pipeline_mode = #tpu.pipeline_mode<synchronous>, transform_indices = @transform_6, window_bounds = array<i64: 1, 64>}, {pipeline_mode = #tpu.pipeline_mode<synchronous>, transform_indices = @transform_7, window_bounds = array<i64: 128, 32>}, {pipeline_mode = #tpu.pipeline_mode<synchronous>, transform_indices = @transform_8, window_bounds = array<i64: 1, 32>}, {transform_indices = @transform_9, window_bounds = array<i64: 1, 1, 32>}]} {
    %cst = arith.constant 0.000000e+00 : f32
    %0 = vector.broadcast %cst : f32 to vector<10x320xf32>
    %c0 = arith.constant 0 : index
    %c0_0 = arith.constant 0 : index
    %1 = vector.load %arg11[%c0, %c0_0] : memref<10x320xf32, #tpu.memory_space<vmem>>, vector<10x320xf32>
    tpu.vector_store %arg11[%c0, %c0_0], %0 {strides = array<i32>} : memref<10x320xf32, #tpu.memory_space<vmem>>, vector<10x320xf32>,
    %cst_1 = arith.constant 0.000000e+00 : f32
    %2 = vector.broadcast %cst_1 : f32 to vector<6x192xf32>
    %c0_2 = arith.constant 0 : index
    %c0_3 = arith.constant 0 : index
    %3 = vector.load %arg12[%c0_2, %c0_3] : memref<6x192xf32, #tpu.memory_space<vmem>>, vector<6x192xf32>
    tpu.vector_store %arg12[%c0_2, %c0_3], %2 {strides = array<i32>} : memref<6x192xf32, #tpu.memory_space<vmem>>, vector<6x192xf32>,
    %c0_4 = arith.constant 0 : index
    %c0_5 = arith.constant 0 : index
    %4 = vector.load %arg3[%c0_4, %c0_5] : memref<1x256xf32, #tpu.memory_space<vmem>>, vector<1x256xf32>
    %c0_6 = arith.constant 0 : index
    %c0_7 = arith.constant 0 : index
    %c0_8 = arith.constant 0 : index
    %5 = vector.load %arg1[%c0_6, %c0_7, %c0_8] : memref<1x18x72xf32, #tpu.memory_space<vmem>>, vector<1x1x72xf32>
    %6 = vector.shape_cast %5 : vector<1x1x72xf32> to vector<1x72xf32>
    %7 = arith.truncf %6 : vector<1x72xf32> to vector<1x72xbf16>
    %c0_9 = arith.constant 0 : index
    %c0_10 = arith.constant 0 : index
    %c0_11 = arith.constant 0 : index
    %8 = vector.load %arg2[%c0_9, %c0_10, %c0_11] : memref<3x72x256xbf16, #tpu.memory_space<vmem>>, vector<1x72x256xbf16>
    %9 = vector.shape_cast %8 : vector<1x72x256xbf16> to vector<72x256xbf16>
    %cst_12 = arith.constant dense<0.000000e+00> : vector<1x256xf32>
    %10 = tpu.matmul %7, %9, %cst_12 {dimension_numbers = #tpu.dot_dimension_numbers<[1], [0], [0], [1], [0, 0, 1, 1], [], []>} : vector<1x72xbf16>, vector<72x256xbf16>, vector<1x256xf32> -> vector<1x256xf32>
    %11 = arith.addf %4, %10 : vector<1x256xf32>
    %c0_13 = arith.constant 0 : index
    %c1 = arith.constant 1 : index
    %c0_14 = arith.constant 0 : index
    %12 = vector.load %arg1[%c0_13, %c1, %c0_14] : memref<1x18x72xf32, #tpu.memory_space<vmem>>, vector<1x1x72xf32>
    %13 = vector.shape_cast %12 : vector<1x1x72xf32> to vector<1x72xf32>
    %14 = arith.truncf %13 : vector<1x72xf32> to vector<1x72xbf16>
    %c1_15 = arith.constant 1 : index
    %c0_16 = arith.constant 0 : index
    %c0_17 = arith.constant 0 : index
    %15 = vector.load %arg2[%c1_15, %c0_16, %c0_17] : memref<3x72x256xbf16, #tpu.memory_space<vmem>>, vector<1x72x256xbf16>
    %16 = vector.shape_cast %15 : vector<1x72x256xbf16> to vector<72x256xbf16>
    %cst_18 = arith.constant dense<0.000000e+00> : vector<1x256xf32>
    %17 = tpu.matmul %14, %16, %cst_18 {dimension_numbers = #tpu.dot_dimension_numbers<[1], [0], [0], [1], [0, 0, 1, 1], [], []>} : vector<1x72xbf16>, vector<72x256xbf16>, vector<1x256xf32> -> vector<1x256xf32>
    %18 = arith.addf %11, %17 : vector<1x256xf32>
    %c0_19 = arith.constant 0 : index
    %c2 = arith.constant 2 : index
    %c0_20 = arith.constant 0 : index
    %19 = vector.load %arg1[%c0_19, %c2, %c0_20] : memref<1x18x72xf32, #tpu.memory_space<vmem>>, vector<1x1x72xf32>
    %20 = vector.shape_cast %19 : vector<1x1x72xf32> to vector<1x72xf32>
    %21 = arith.truncf %20 : vector<1x72xf32> to vector<1x72xbf16>
    %c2_21 = arith.constant 2 : index
    %c0_22 = arith.constant 0 : index
    %c0_23 = arith.constant 0 : index
    %22 = vector.load %arg2[%c2_21, %c0_22, %c0_23] : memref<3x72x256xbf16, #tpu.memory_space<vmem>>, vector<1x72x256xbf16>
    %23 = vector.shape_cast %22 : vector<1x72x256xbf16> to vector<72x256xbf16>
    %cst_24 = arith.constant dense<0.000000e+00> : vector<1x256xf32>
    %24 = tpu.matmul %21, %23, %cst_24 {dimension_numbers = #tpu.dot_dimension_numbers<[1], [0], [0], [1], [0, 0, 1, 1], [], []>} : vector<1x72xbf16>, vector<72x256xbf16>, vector<1x256xf32> -> vector<1x256xf32>
    %25 = arith.addf %18, %24 : vector<1x256xf32>
    %cst_25 = arith.constant 0.000000e+00 : f32
    %26 = vector.broadcast %cst_25 : f32 to vector<1x256xf32>
    %27 = arith.maximumf %25, %26 : vector<1x256xf32>
    %c1_26 = arith.constant 1 : index
    %c32 = arith.constant 32 : index
    %28 = vector.load %arg11[%c1_26, %c32] : memref<10x320xf32, #tpu.memory_space<vmem>>, vector<1x256xf32>
    tpu.vector_store %arg11[%c1_26, %c32], %27 {strides = array<i32>} : memref<10x320xf32, #tpu.memory_space<vmem>>, vector<1x256xf32>,
    %c0_27 = arith.constant 0 : index
    %c0_28 = arith.constant 0 : index
    %29 = vector.load %arg3[%c0_27, %c0_28] : memref<1x256xf32, #tpu.memory_space<vmem>>, vector<1x256xf32>
    %c0_29 = arith.constant 0 : index
    %c2_30 = arith.constant 2 : index
    %c0_31 = arith.constant 0 : index
    %30 = vector.load %arg1[%c0_29, %c2_30, %c0_31] : memref<1x18x72xf32, #tpu.memory_space<vmem>>, vector<1x1x72xf32>
    %31 = vector.shape_cast %30 : vector<1x1x72xf32> to vector<1x72xf32>
    %32 = arith.truncf %31 : vector<1x72xf32> to vector<1x72xbf16>
    %c0_32 = arith.constant 0 : index
    %c0_33 = arith.constant 0 : index
    %c0_34 = arith.constant 0 : index
    %33 = vector.load %arg2[%c0_32, %c0_33, %c0_34] : memref<3x72x256xbf16, #tpu.memory_space<vmem>>, vector<1x72x256xbf16>
    %34 = vector.shape_cast %33 : vector<1x72x256xbf16> to vector<72x256xbf16>
    %cst_35 = arith.constant dense<0.000000e+00> : vector<1x256xf32>
    %35 = tpu.matmul %32, %34, %cst_35 {dimension_numbers = #tpu.dot_dimension_numbers<[1], [0], [0], [1], [0, 0, 1, 1], [], []>} : vector<1x72xbf16>, vector<72x256xbf16>, vector<1x256xf32> -> vector<1x256xf32>
    %36 = arith.addf %29, %35 : vector<1x256xf32>
    %c0_36 = arith.constant 0 : index
    %c3 = arith.constant 3 : index
    %c0_37 = arith.constant 0 : index
    %37 = vector.load %arg1[%c0_36, %c3, %c0_37] : memref<1x18x72xf32, #tpu.memory_space<vmem>>, vector<1x1x72xf32>
    %38 = vector.shape_cast %37 : vector<1x1x72xf32> to vector<1x72xf32>
    %39 = arith.truncf %38 : vector<1x72xf32> to vector<1x72xbf16>
    %c1_38 = arith.constant 1 : index
    %c0_39 = arith.constant 0 : index
    %c0_40 = arith.constant 0 : index
    %40 = vector.load %arg2[%c1_38, %c0_39, %c0_40] : memref<3x72x256xbf16, #tpu.memory_space<vmem>>, vector<1x72x256xbf16>
    %41 = vector.shape_cast %40 : vector<1x72x256xbf16> to vector<72x256xbf16>
    %cst_41 = arith.constant dense<0.000000e+00> : vector<1x256xf32>
    %42 = tpu.matmul %39, %41, %cst_41 {dimension_numbers = #tpu.dot_dimension_numbers<[1], [0], [0], [1], [0, 0, 1, 1], [], []>} : vector<1x72xbf16>, vector<72x256xbf16>, vector<1x256xf32> -> vector<1x256xf32>
    %43 = arith.addf %36, %42 : vector<1x256xf32>
    %c0_42 = arith.constant 0 : index
    %c4 = arith.constant 4 : index
    %c0_43 = arith.constant 0 : index
    %44 = vector.load %arg1[%c0_42, %c4, %c0_43] : memref<1x18x72xf32, #tpu.memory_space<vmem>>, vector<1x1x72xf32>
    %45 = vector.shape_cast %44 : vector<1x1x72xf32> to vector<1x72xf32>
    %46 = arith.truncf %45 : vector<1x72xf32> to vector<1x72xbf16>
    %c2_44 = arith.constant 2 : index
    %c0_45 = arith.constant 0 : index
    %c0_46 = arith.constant 0 : index
    %47 = vector.load %arg2[%c2_44, %c0_45, %c0_46] : memref<3x72x256xbf16, #tpu.memory_space<vmem>>, vector<1x72x256xbf16>
    %48 = vector.shape_cast %47 : vector<1x72x256xbf16> to vector<72x256xbf16>
    %cst_47 = arith.constant dense<0.000000e+00> : vector<1x256xf32>
    %49 = tpu.matmul %46, %48, %cst_47 {dimension_numbers = #tpu.dot_dimension_numbers<[1], [0], [0], [1], [0, 0, 1, 1], [], []>} : vector<1x72xbf16>, vector<72x256xbf16>, vector<1x256xf32> -> vector<1x256xf32>
    %50 = arith.addf %43, %49 : vector<1x256xf32>
    %cst_48 = arith.constant 0.000000e+00 : f32
    %51 = vector.broadcast %cst_48 : f32 to vector<1x256xf32>
    %52 = arith.maximumf %50, %51 : vector<1x256xf32>
    %c2_49 = arith.constant 2 : index
    %c32_50 = arith.constant 32 : index
    %53 = vector.load %arg11[%c2_49, %c32_50] : memref<10x320xf32, #tpu.memory_space<vmem>>, vector<1x256xf32>
    tpu.vector_store %arg11[%c2_49, %c32_50], %52 {strides = array<i32>} : memref<10x320xf32, #tpu.memory_space<vmem>>, vector<1x256xf32>,
    %c0_51 = arith.constant 0 : index
    %c0_52 = arith.constant 0 : index
    %54 = vector.load %arg3[%c0_51, %c0_52] : memref<1x256xf32, #tpu.memory_space<vmem>>, vector<1x256xf32>
    %c0_53 = arith.constant 0 : index
    %c4_54 = arith.constant 4 : index
    %c0_55 = arith.constant 0 : index
    %55 = vector.load %arg1[%c0_53, %c4_54, %c0_55] : memref<1x18x72xf32, #tpu.memory_space<vmem>>, vector<1x1x72xf32>
    %56 = vector.shape_cast %55 : vector<1x1x72xf32> to vector<1x72xf32>
    %57 = arith.truncf %56 : vector<1x72xf32> to vector<1x72xbf16>
    %c0_56 = arith.constant 0 : index
    %c0_57 = arith.constant 0 : index
    %c0_58 = arith.constant 0 : index
    %58 = vector.load %arg2[%c0_56, %c0_57, %c0_58] : memref<3x72x256xbf16, #tpu.memory_space<vmem>>, vector<1x72x256xbf16>
    %59 = vector.shape_cast %58 : vector<1x72x256xbf16> to vector<72x256xbf16>
    %cst_59 = arith.constant dense<0.000000e+00> : vector<1x256xf32>
    %60 = tpu.matmul %57, %59, %cst_59 {dimension_numbers = #tpu.dot_dimension_numbers<[1], [0], [0], [1], [0, 0, 1, 1], [], []>} : vector<1x72xbf16>, vector<72x256xbf16>, vector<1x256xf32> -> vector<1x256xf32>
    %61 = arith.addf %54, %60 : vector<1x256xf32>
    %c0_60 = arith.constant 0 : index
    %c5 = arith.constant 5 : index
    %c0_61 = arith.constant 0 : index
    %62 = vector.load %arg1[%c0_60, %c5, %c0_61] : memref<1x18x72xf32, #tpu.memory_space<vmem>>, vector<1x1x72xf32>
    %63 = vector.shape_cast %62 : vector<1x1x72xf32> to vector<1x72xf32>
    %64 = arith.truncf %63 : vector<1x72xf32> to vector<1x72xbf16>
    %c1_62 = arith.constant 1 : index
    %c0_63 = arith.constant 0 : index
    %c0_64 = arith.constant 0 : index
    %65 = vector.load %arg2[%c1_62, %c0_63, %c0_64] : memref<3x72x256xbf16, #tpu.memory_space<vmem>>, vector<1x72x256xbf16>
    %66 = vector.shape_cast %65 : vector<1x72x256xbf16> to vector<72x256xbf16>
    %cst_65 = arith.constant dense<0.000000e+00> : vector<1x256xf32>
    %67 = tpu.matmul %64, %66, %cst_65 {dimension_numbers = #tpu.dot_dimension_numbers<[1], [0], [0], [1], [0, 0, 1, 1], [], []>} : vector<1x72xbf16>, vector<72x256xbf16>, vector<1x256xf32> -> vector<1x256xf32>
    %68 = arith.addf %61, %67 : vector<1x256xf32>
    %c0_66 = arith.constant 0 : index
    %c6 = arith.constant 6 : index
    %c0_67 = arith.constant 0 : index
    %69 = vector.load %arg1[%c0_66, %c6, %c0_67] : memref<1x18x72xf32, #tpu.memory_space<vmem>>, vector<1x1x72xf32>
    %70 = vector.shape_cast %69 : vector<1x1x72xf32> to vector<1x72xf32>
    %71 = arith.truncf %70 : vector<1x72xf32> to vector<1x72xbf16>
    %c2_68 = arith.constant 2 : index
    %c0_69 = arith.constant 0 : index
    %c0_70 = arith.constant 0 : index
    %72 = vector.load %arg2[%c2_68, %c0_69, %c0_70] : memref<3x72x256xbf16, #tpu.memory_space<vmem>>, vector<1x72x256xbf16>
    %73 = vector.shape_cast %72 : vector<1x72x256xbf16> to vector<72x256xbf16>
    %cst_71 = arith.constant dense<0.000000e+00> : vector<1x256xf32>
    %74 = tpu.matmul %71, %73, %cst_71 {dimension_numbers = #tpu.dot_dimension_numbers<[1], [0], [0], [1], [0, 0, 1, 1], [], []>} : vector<1x72xbf16>, vector<72x256xbf16>, vector<1x256xf32> -> vector<1x256xf32>
    %75 = arith.addf %68, %74 : vector<1x256xf32>
    %cst_72 = arith.constant 0.000000e+00 : f32
    %76 = vector.broadcast %cst_72 : f32 to vector<1x256xf32>
    %77 = arith.maximumf %75, %76 : vector<1x256xf32>
    %c3_73 = arith.constant 3 : index
    %c32_74 = arith.constant 32 : index
    %78 = vector.load %arg11[%c3_73, %c32_74] : memref<10x320xf32, #tpu.memory_space<vmem>>, vector<1x256xf32>
    tpu.vector_store %arg11[%c3_73, %c32_74], %77 {strides = array<i32>} : memref<10x320xf32, #tpu.memory_space<vmem>>, vector<1x256xf32>,
    %c0_75 = arith.constant 0 : index
    %c0_76 = arith.constant 0 : index
    %79 = vector.load %arg3[%c0_75, %c0_76] : memref<1x256xf32, #tpu.memory_space<vmem>>, vector<1x256xf32>
    %c0_77 = arith.constant 0 : index
    %c6_78 = arith.constant 6 : index
    %c0_79 = arith.constant 0 : index
    %80 = vector.load %arg1[%c0_77, %c6_78, %c0_79] : memref<1x18x72xf32, #tpu.memory_space<vmem>>, vector<1x1x72xf32>
    %81 = vector.shape_cast %80 : vector<1x1x72xf32> to vector<1x72xf32>
    %82 = arith.truncf %81 : vector<1x72xf32> to vector<1x72xbf16>
    %c0_80 = arith.constant 0 : index
    %c0_81 = arith.constant 0 : index
    %c0_82 = arith.constant 0 : index
    %83 = vector.load %arg2[%c0_80, %c0_81, %c0_82] : memref<3x72x256xbf16, #tpu.memory_space<vmem>>, vector<1x72x256xbf16>
    %84 = vector.shape_cast %83 : vector<1x72x256xbf16> to vector<72x256xbf16>
    %cst_83 = arith.constant dense<0.000000e+00> : vector<1x256xf32>
    %85 = tpu.matmul %82, %84, %cst_83 {dimension_numbers = #tpu.dot_dimension_numbers<[1], [0], [0], [1], [0, 0, 1, 1], [], []>} : vector<1x72xbf16>, vector<72x256xbf16>, vector<1x256xf32> -> vector<1x256xf32>
    %86 = arith.addf %79, %85 : vector<1x256xf32>
    %c0_84 = arith.constant 0 : index
    %c7 = arith.constant 7 : index
    %c0_85 = arith.constant 0 : index
    %87 = vector.load %arg1[%c0_84, %c7, %c0_85] : memref<1x18x72xf32, #tpu.memory_space<vmem>>, vector<1x1x72xf32>
    %88 = vector.shape_cast %87 : vector<1x1x72xf32> to vector<1x72xf32>
    %89 = arith.truncf %88 : vector<1x72xf32> to vector<1x72xbf16>
    %c1_86 = arith.constant 1 : index
    %c0_87 = arith.constant 0 : index
    %c0_88 = arith.constant 0 : index
    %90 = vector.load %arg2[%c1_86, %c0_87, %c0_88] : memref<3x72x256xbf16, #tpu.memory_space<vmem>>, vector<1x72x256xbf16>
    %91 = vector.shape_cast %90 : vector<1x72x256xbf16> to vector<72x256xbf16>
    %cst_89 = arith.constant dense<0.000000e+00> : vector<1x256xf32>
    %92 = tpu.matmul %89, %91, %cst_89 {dimension_numbers = #tpu.dot_dimension_numbers<[1], [0], [0], [1], [0, 0, 1, 1], [], []>} : vector<1x72xbf16>, vector<72x256xbf16>, vector<1x256xf32> -> vector<1x256xf32>
    %93 = arith.addf %86, %92 : vector<1x256xf32>
    %c0_90 = arith.constant 0 : index
    %c8 = arith.constant 8 : index
    %c0_91 = arith.constant 0 : index
    %94 = vector.load %arg1[%c0_90, %c8, %c0_91] : memref<1x18x72xf32, #tpu.memory_space<vmem>>, vector<1x1x72xf32>
    %95 = vector.shape_cast %94 : vector<1x1x72xf32> to vector<1x72xf32>
    %96 = arith.truncf %95 : vector<1x72xf32> to vector<1x72xbf16>
    %c2_92 = arith.constant 2 : index
    %c0_93 = arith.constant 0 : index
    %c0_94 = arith.constant 0 : index
    %97 = vector.load %arg2[%c2_92, %c0_93, %c0_94] : memref<3x72x256xbf16, #tpu.memory_space<vmem>>, vector<1x72x256xbf16>
    %98 = vector.shape_cast %97 : vector<1x72x256xbf16> to vector<72x256xbf16>
    %cst_95 = arith.constant dense<0.000000e+00> : vector<1x256xf32>
    %99 = tpu.matmul %96, %98, %cst_95 {dimension_numbers = #tpu.dot_dimension_numbers<[1], [0], [0], [1], [0, 0, 1, 1], [], []>} : vector<1x72xbf16>, vector<72x256xbf16>, vector<1x256xf32> -> vector<1x256xf32>
    %100 = arith.addf %93, %99 : vector<1x256xf32>
    %cst_96 = arith.constant 0.000000e+00 : f32
    %101 = vector.broadcast %cst_96 : f32 to vector<1x256xf32>
    %102 = arith.maximumf %100, %101 : vector<1x256xf32>
    %c4_97 = arith.constant 4 : index
    %c32_98 = arith.constant 32 : index
    %103 = vector.load %arg11[%c4_97, %c32_98] : memref<10x320xf32, #tpu.memory_space<vmem>>, vector<1x256xf32>
    tpu.vector_store %arg11[%c4_97, %c32_98], %102 {strides = array<i32>} : memref<10x320xf32, #tpu.memory_space<vmem>>, vector<1x256xf32>,
    %c0_99 = arith.constant 0 : index
    %c0_100 = arith.constant 0 : index
    %104 = vector.load %arg3[%c0_99, %c0_100] : memref<1x256xf32, #tpu.memory_space<vmem>>, vector<1x256xf32>
    %c0_101 = arith.constant 0 : index
    %c8_102 = arith.constant 8 : index
    %c0_103 = arith.constant 0 : index
    %105 = vector.load %arg1[%c0_101, %c8_102, %c0_103] : memref<1x18x72xf32, #tpu.memory_space<vmem>>, vector<1x1x72xf32>
    %106 = vector.shape_cast %105 : vector<1x1x72xf32> to vector<1x72xf32>
    %107 = arith.truncf %106 : vector<1x72xf32> to vector<1x72xbf16>
    %c0_104 = arith.constant 0 : index
    %c0_105 = arith.constant 0 : index
    %c0_106 = arith.constant 0 : index
    %108 = vector.load %arg2[%c0_104, %c0_105, %c0_106] : memref<3x72x256xbf16, #tpu.memory_space<vmem>>, vector<1x72x256xbf16>
    %109 = vector.shape_cast %108 : vector<1x72x256xbf16> to vector<72x256xbf16>
    %cst_107 = arith.constant dense<0.000000e+00> : vector<1x256xf32>
    %110 = tpu.matmul %107, %109, %cst_107 {dimension_numbers = #tpu.dot_dimension_numbers<[1], [0], [0], [1], [0, 0, 1, 1], [], []>} : vector<1x72xbf16>, vector<72x256xbf16>, vector<1x256xf32> -> vector<1x256xf32>
    %111 = arith.addf %104, %110 : vector<1x256xf32>
    %c0_108 = arith.constant 0 : index
    %c9 = arith.constant 9 : index
    %c0_109 = arith.constant 0 : index
    %112 = vector.load %arg1[%c0_108, %c9, %c0_109] : memref<1x18x72xf32, #tpu.memory_space<vmem>>, vector<1x1x72xf32>
    %113 = vector.shape_cast %112 : vector<1x1x72xf32> to vector<1x72xf32>
    %114 = arith.truncf %113 : vector<1x72xf32> to vector<1x72xbf16>
    %c1_110 = arith.constant 1 : index
    %c0_111 = arith.constant 0 : index
    %c0_112 = arith.constant 0 : index
    %115 = vector.load %arg2[%c1_110, %c0_111, %c0_112] : memref<3x72x256xbf16, #tpu.memory_space<vmem>>, vector<1x72x256xbf16>
    %116 = vector.shape_cast %115 : vector<1x72x256xbf16> to vector<72x256xbf16>
    %cst_113 = arith.constant dense<0.000000e+00> : vector<1x256xf32>
    %117 = tpu.matmul %114, %116, %cst_113 {dimension_numbers = #tpu.dot_dimension_numbers<[1], [0], [0], [1], [0, 0, 1, 1], [], []>} : vector<1x72xbf16>, vector<72x256xbf16>, vector<1x256xf32> -> vector<1x256xf32>
    %118 = arith.addf %111, %117 : vector<1x256xf32>
    %c0_114 = arith.constant 0 : index
    %c10 = arith.constant 10 : index
    %c0_115 = arith.constant 0 : index
    %119 = vector.load %arg1[%c0_114, %c10, %c0_115] : memref<1x18x72xf32, #tpu.memory_space<vmem>>, vector<1x1x72xf32>
    %120 = vector.shape_cast %119 : vector<1x1x72xf32> to vector<1x72xf32>
    %121 = arith.truncf %120 : vector<1x72xf32> to vector<1x72xbf16>
    %c2_116 = arith.constant 2 : index
    %c0_117 = arith.constant 0 : index
    %c0_118 = arith.constant 0 : index
    %122 = vector.load %arg2[%c2_116, %c0_117, %c0_118] : memref<3x72x256xbf16, #tpu.memory_space<vmem>>, vector<1x72x256xbf16>
    %123 = vector.shape_cast %122 : vector<1x72x256xbf16> to vector<72x256xbf16>
    %cst_119 = arith.constant dense<0.000000e+00> : vector<1x256xf32>
    %124 = tpu.matmul %121, %123, %cst_119 {dimension_numbers = #tpu.dot_dimension_numbers<[1], [0], [0], [1], [0, 0, 1, 1], [], []>} : vector<1x72xbf16>, vector<72x256xbf16>, vector<1x256xf32> -> vector<1x256xf32>
    %125 = arith.addf %118, %124 : vector<1x256xf32>
    %cst_120 = arith.constant 0.000000e+00 : f32
    %126 = vector.broadcast %cst_120 : f32 to vector<1x256xf32>
    %127 = arith.maximumf %125, %126 : vector<1x256xf32>
    %c5_121 = arith.constant 5 : index
    %c32_122 = arith.constant 32 : index
    %128 = vector.load %arg11[%c5_121, %c32_122] : memref<10x320xf32, #tpu.memory_space<vmem>>, vector<1x256xf32>
    tpu.vector_store %arg11[%c5_121, %c32_122], %127 {strides = array<i32>} : memref<10x320xf32, #tpu.memory_space<vmem>>, vector<1x256xf32>,
    %c0_123 = arith.constant 0 : index
    %c0_124 = arith.constant 0 : index
    %129 = vector.load %arg3[%c0_123, %c0_124] : memref<1x256xf32, #tpu.memory_space<vmem>>, vector<1x256xf32>
    %c0_125 = arith.constant 0 : index
    %c10_126 = arith.constant 10 : index
    %c0_127 = arith.constant 0 : index
    %130 = vector.load %arg1[%c0_125, %c10_126, %c0_127] : memref<1x18x72xf32, #tpu.memory_space<vmem>>, vector<1x1x72xf32>
    %131 = vector.shape_cast %130 : vector<1x1x72xf32> to vector<1x72xf32>
    %132 = arith.truncf %131 : vector<1x72xf32> to vector<1x72xbf16>
    %c0_128 = arith.constant 0 : index
    %c0_129 = arith.constant 0 : index
    %c0_130 = arith.constant 0 : index
    %133 = vector.load %arg2[%c0_128, %c0_129, %c0_130] : memref<3x72x256xbf16, #tpu.memory_space<vmem>>, vector<1x72x256xbf16>
    %134 = vector.shape_cast %133 : vector<1x72x256xbf16> to vector<72x256xbf16>
    %cst_131 = arith.constant dense<0.000000e+00> : vector<1x256xf32>
    %135 = tpu.matmul %132, %134, %cst_131 {dimension_numbers = #tpu.dot_dimension_numbers<[1], [0], [0], [1], [0, 0, 1, 1], [], []>} : vector<1x72xbf16>, vector<72x256xbf16>, vector<1x256xf32> -> vector<1x256xf32>
    %136 = arith.addf %129, %135 : vector<1x256xf32>
    %c0_132 = arith.constant 0 : index
    %c11 = arith.constant 11 : index
    %c0_133 = arith.constant 0 : index
    %137 = vector.load %arg1[%c0_132, %c11, %c0_133] : memref<1x18x72xf32, #tpu.memory_space<vmem>>, vector<1x1x72xf32>
    %138 = vector.shape_cast %137 : vector<1x1x72xf32> to vector<1x72xf32>
    %139 = arith.truncf %138 : vector<1x72xf32> to vector<1x72xbf16>
    %c1_134 = arith.constant 1 : index
    %c0_135 = arith.constant 0 : index
    %c0_136 = arith.constant 0 : index
    %140 = vector.load %arg2[%c1_134, %c0_135, %c0_136] : memref<3x72x256xbf16, #tpu.memory_space<vmem>>, vector<1x72x256xbf16>
    %141 = vector.shape_cast %140 : vector<1x72x256xbf16> to vector<72x256xbf16>
    %cst_137 = arith.constant dense<0.000000e+00> : vector<1x256xf32>
    %142 = tpu.matmul %139, %141, %cst_137 {dimension_numbers = #tpu.dot_dimension_numbers<[1], [0], [0], [1], [0, 0, 1, 1], [], []>} : vector<1x72xbf16>, vector<72x256xbf16>, vector<1x256xf32> -> vector<1x256xf32>
    %143 = arith.addf %136, %142 : vector<1x256xf32>
    %c0_138 = arith.constant 0 : index
    %c12 = arith.constant 12 : index
    %c0_139 = arith.constant 0 : index
    %144 = vector.load %arg1[%c0_138, %c12, %c0_139] : memref<1x18x72xf32, #tpu.memory_space<vmem>>, vector<1x1x72xf32>
    %145 = vector.shape_cast %144 : vector<1x1x72xf32> to vector<1x72xf32>
    %146 = arith.truncf %145 : vector<1x72xf32> to vector<1x72xbf16>
    %c2_140 = arith.constant 2 : index
    %c0_141 = arith.constant 0 : index
    %c0_142 = arith.constant 0 : index
    %147 = vector.load %arg2[%c2_140, %c0_141, %c0_142] : memref<3x72x256xbf16, #tpu.memory_space<vmem>>, vector<1x72x256xbf16>
    %148 = vector.shape_cast %147 : vector<1x72x256xbf16> to vector<72x256xbf16>
    %cst_143 = arith.constant dense<0.000000e+00> : vector<1x256xf32>
    %149 = tpu.matmul %146, %148, %cst_143 {dimension_numbers = #tpu.dot_dimension_numbers<[1], [0], [0], [1], [0, 0, 1, 1], [], []>} : vector<1x72xbf16>, vector<72x256xbf16>, vector<1x256xf32> -> vector<1x256xf32>
    %150 = arith.addf %143, %149 : vector<1x256xf32>
    %cst_144 = arith.constant 0.000000e+00 : f32
    %151 = vector.broadcast %cst_144 : f32 to vector<1x256xf32>
    %152 = arith.maximumf %150, %151 : vector<1x256xf32>
    %c6_145 = arith.constant 6 : index
    %c32_146 = arith.constant 32 : index
    %153 = vector.load %arg11[%c6_145, %c32_146] : memref<10x320xf32, #tpu.memory_space<vmem>>, vector<1x256xf32>
    tpu.vector_store %arg11[%c6_145, %c32_146], %152 {strides = array<i32>} : memref<10x320xf32, #tpu.memory_space<vmem>>, vector<1x256xf32>,
    %c0_147 = arith.constant 0 : index
    %c0_148 = arith.constant 0 : index
    %154 = vector.load %arg3[%c0_147, %c0_148] : memref<1x256xf32, #tpu.memory_space<vmem>>, vector<1x256xf32>
    %c0_149 = arith.constant 0 : index
    %c12_150 = arith.constant 12 : index
    %c0_151 = arith.constant 0 : index
    %155 = vector.load %arg1[%c0_149, %c12_150, %c0_151] : memref<1x18x72xf32, #tpu.memory_space<vmem>>, vector<1x1x72xf32>
    %156 = vector.shape_cast %155 : vector<1x1x72xf32> to vector<1x72xf32>
    %157 = arith.truncf %156 : vector<1x72xf32> to vector<1x72xbf16>
    %c0_152 = arith.constant 0 : index
    %c0_153 = arith.constant 0 : index
    %c0_154 = arith.constant 0 : index
    %158 = vector.load %arg2[%c0_152, %c0_153, %c0_154] : memref<3x72x256xbf16, #tpu.memory_space<vmem>>, vector<1x72x256xbf16>
    %159 = vector.shape_cast %158 : vector<1x72x256xbf16> to vector<72x256xbf16>
    %cst_155 = arith.constant dense<0.000000e+00> : vector<1x256xf32>
    %160 = tpu.matmul %157, %159, %cst_155 {dimension_numbers = #tpu.dot_dimension_numbers<[1], [0], [0], [1], [0, 0, 1, 1], [], []>} : vector<1x72xbf16>, vector<72x256xbf16>, vector<1x256xf32> -> vector<1x256xf32>
    %161 = arith.addf %154, %160 : vector<1x256xf32>
    %c0_156 = arith.constant 0 : index
    %c13 = arith.constant 13 : index
    %c0_157 = arith.constant 0 : index
    %162 = vector.load %arg1[%c0_156, %c13, %c0_157] : memref<1x18x72xf32, #tpu.memory_space<vmem>>, vector<1x1x72xf32>
    %163 = vector.shape_cast %162 : vector<1x1x72xf32> to vector<1x72xf32>
    %164 = arith.truncf %163 : vector<1x72xf32> to vector<1x72xbf16>
    %c1_158 = arith.constant 1 : index
    %c0_159 = arith.constant 0 : index
    %c0_160 = arith.constant 0 : index
    %165 = vector.load %arg2[%c1_158, %c0_159, %c0_160] : memref<3x72x256xbf16, #tpu.memory_space<vmem>>, vector<1x72x256xbf16>
    %166 = vector.shape_cast %165 : vector<1x72x256xbf16> to vector<72x256xbf16>
    %cst_161 = arith.constant dense<0.000000e+00> : vector<1x256xf32>
    %167 = tpu.matmul %164, %166, %cst_161 {dimension_numbers = #tpu.dot_dimension_numbers<[1], [0], [0], [1], [0, 0, 1, 1], [], []>} : vector<1x72xbf16>, vector<72x256xbf16>, vector<1x256xf32> -> vector<1x256xf32>
    %168 = arith.addf %161, %167 : vector<1x256xf32>
    %c0_162 = arith.constant 0 : index
    %c14 = arith.constant 14 : index
    %c0_163 = arith.constant 0 : index
    %169 = vector.load %arg1[%c0_162, %c14, %c0_163] : memref<1x18x72xf32, #tpu.memory_space<vmem>>, vector<1x1x72xf32>
    %170 = vector.shape_cast %169 : vector<1x1x72xf32> to vector<1x72xf32>
    %171 = arith.truncf %170 : vector<1x72xf32> to vector<1x72xbf16>
    %c2_164 = arith.constant 2 : index
    %c0_165 = arith.constant 0 : index
    %c0_166 = arith.constant 0 : index
    %172 = vector.load %arg2[%c2_164, %c0_165, %c0_166] : memref<3x72x256xbf16, #tpu.memory_space<vmem>>, vector<1x72x256xbf16>
    %173 = vector.shape_cast %172 : vector<1x72x256xbf16> to vector<72x256xbf16>
    %cst_167 = arith.constant dense<0.000000e+00> : vector<1x256xf32>
    %174 = tpu.matmul %171, %173, %cst_167 {dimension_numbers = #tpu.dot_dimension_numbers<[1], [0], [0], [1], [0, 0, 1, 1], [], []>} : vector<1x72xbf16>, vector<72x256xbf16>, vector<1x256xf32> -> vector<1x256xf32>
    %175 = arith.addf %168, %174 : vector<1x256xf32>
    %cst_168 = arith.constant 0.000000e+00 : f32
    %176 = vector.broadcast %cst_168 : f32 to vector<1x256xf32>
    %177 = arith.maximumf %175, %176 : vector<1x256xf32>
    %c7_169 = arith.constant 7 : index
    %c32_170 = arith.constant 32 : index
    %178 = vector.load %arg11[%c7_169, %c32_170] : memref<10x320xf32, #tpu.memory_space<vmem>>, vector<1x256xf32>
    tpu.vector_store %arg11[%c7_169, %c32_170], %177 {strides = array<i32>} : memref<10x320xf32, #tpu.memory_space<vmem>>, vector<1x256xf32>,
    %c0_171 = arith.constant 0 : index
    %c0_172 = arith.constant 0 : index
    %179 = vector.load %arg3[%c0_171, %c0_172] : memref<1x256xf32, #tpu.memory_space<vmem>>, vector<1x256xf32>
    %c0_173 = arith.constant 0 : index
    %c14_174 = arith.constant 14 : index
    %c0_175 = arith.constant 0 : index
    %180 = vector.load %arg1[%c0_173, %c14_174, %c0_175] : memref<1x18x72xf32, #tpu.memory_space<vmem>>, vector<1x1x72xf32>
    %181 = vector.shape_cast %180 : vector<1x1x72xf32> to vector<1x72xf32>
    %182 = arith.truncf %181 : vector<1x72xf32> to vector<1x72xbf16>
    %c0_176 = arith.constant 0 : index
    %c0_177 = arith.constant 0 : index
    %c0_178 = arith.constant 0 : index
    %183 = vector.load %arg2[%c0_176, %c0_177, %c0_178] : memref<3x72x256xbf16, #tpu.memory_space<vmem>>, vector<1x72x256xbf16>
    %184 = vector.shape_cast %183 : vector<1x72x256xbf16> to vector<72x256xbf16>
    %cst_179 = arith.constant dense<0.000000e+00> : vector<1x256xf32>
    %185 = tpu.matmul %182, %184, %cst_179 {dimension_numbers = #tpu.dot_dimension_numbers<[1], [0], [0], [1], [0, 0, 1, 1], [], []>} : vector<1x72xbf16>, vector<72x256xbf16>, vector<1x256xf32> -> vector<1x256xf32>
    %186 = arith.addf %179, %185 : vector<1x256xf32>
    %c0_180 = arith.constant 0 : index
    %c15 = arith.constant 15 : index
    %c0_181 = arith.constant 0 : index
    %187 = vector.load %arg1[%c0_180, %c15, %c0_181] : memref<1x18x72xf32, #tpu.memory_space<vmem>>, vector<1x1x72xf32>
    %188 = vector.shape_cast %187 : vector<1x1x72xf32> to vector<1x72xf32>
    %189 = arith.truncf %188 : vector<1x72xf32> to vector<1x72xbf16>
    %c1_182 = arith.constant 1 : index
    %c0_183 = arith.constant 0 : index
    %c0_184 = arith.constant 0 : index
    %190 = vector.load %arg2[%c1_182, %c0_183, %c0_184] : memref<3x72x256xbf16, #tpu.memory_space<vmem>>, vector<1x72x256xbf16>
    %191 = vector.shape_cast %190 : vector<1x72x256xbf16> to vector<72x256xbf16>
    %cst_185 = arith.constant dense<0.000000e+00> : vector<1x256xf32>
    %192 = tpu.matmul %189, %191, %cst_185 {dimension_numbers = #tpu.dot_dimension_numbers<[1], [0], [0], [1], [0, 0, 1, 1], [], []>} : vector<1x72xbf16>, vector<72x256xbf16>, vector<1x256xf32> -> vector<1x256xf32>
    %193 = arith.addf %186, %192 : vector<1x256xf32>
    %c0_186 = arith.constant 0 : index
    %c16 = arith.constant 16 : index
    %c0_187 = arith.constant 0 : index
    %194 = vector.load %arg1[%c0_186, %c16, %c0_187] : memref<1x18x72xf32, #tpu.memory_space<vmem>>, vector<1x1x72xf32>
    %195 = vector.shape_cast %194 : vector<1x1x72xf32> to vector<1x72xf32>
    %196 = arith.truncf %195 : vector<1x72xf32> to vector<1x72xbf16>
    %c2_188 = arith.constant 2 : index
    %c0_189 = arith.constant 0 : index
    %c0_190 = arith.constant 0 : index
    %197 = vector.load %arg2[%c2_188, %c0_189, %c0_190] : memref<3x72x256xbf16, #tpu.memory_space<vmem>>, vector<1x72x256xbf16>
    %198 = vector.shape_cast %197 : vector<1x72x256xbf16> to vector<72x256xbf16>
    %cst_191 = arith.constant dense<0.000000e+00> : vector<1x256xf32>
    %199 = tpu.matmul %196, %198, %cst_191 {dimension_numbers = #tpu.dot_dimension_numbers<[1], [0], [0], [1], [0, 0, 1, 1], [], []>} : vector<1x72xbf16>, vector<72x256xbf16>, vector<1x256xf32> -> vector<1x256xf32>
    %200 = arith.addf %193, %199 : vector<1x256xf32>
    %cst_192 = arith.constant 0.000000e+00 : f32
    %201 = vector.broadcast %cst_192 : f32 to vector<1x256xf32>
    %202 = arith.maximumf %200, %201 : vector<1x256xf32>
    %c8_193 = arith.constant 8 : index
    %c32_194 = arith.constant 32 : index
    %203 = vector.load %arg11[%c8_193, %c32_194] : memref<10x320xf32, #tpu.memory_space<vmem>>, vector<1x256xf32>
    tpu.vector_store %arg11[%c8_193, %c32_194], %202 {strides = array<i32>} : memref<10x320xf32, #tpu.memory_space<vmem>>, vector<1x256xf32>,
    %c0_195 = arith.constant 0 : index
    %c0_196 = arith.constant 0 : index
    %204 = vector.load %arg5[%c0_195, %c0_196] : memref<1x128xf32, #tpu.memory_space<vmem>>, vector<1x128xf32>
    %c0_197 = arith.constant 0 : index
    %c0_198 = arith.constant 0 : index
    %205 = vector.load %arg11[%c0_197, %c0_198] : memref<10x320xf32, #tpu.memory_space<vmem>>, vector<1x320xf32>
    %206 = arith.truncf %205 : vector<1x320xf32> to vector<1x320xbf16>
    %c0_199 = arith.constant 0 : index
    %c0_200 = arith.constant 0 : index
    %c0_201 = arith.constant 0 : index
    %207 = vector.load %arg4[%c0_199, %c0_200, %c0_201] : memref<3x320x128xbf16, #tpu.memory_space<vmem>>, vector<1x320x128xbf16>
    %208 = vector.shape_cast %207 : vector<1x320x128xbf16> to vector<320x128xbf16>
    %cst_202 = arith.constant dense<0.000000e+00> : vector<1x128xf32>
    %209 = tpu.matmul %206, %208, %cst_202 {dimension_numbers = #tpu.dot_dimension_numbers<[1], [0], [0], [1], [0, 0, 1, 1], [], []>} : vector<1x320xbf16>, vector<320x128xbf16>, vector<1x128xf32> -> vector<1x128xf32>
    %210 = arith.addf %204, %209 : vector<1x128xf32>
    %c1_203 = arith.constant 1 : index
    %c0_204 = arith.constant 0 : index
    %211 = vector.load %arg11[%c1_203, %c0_204] : memref<10x320xf32, #tpu.memory_space<vmem>>, vector<1x320xf32>
    %212 = arith.truncf %211 : vector<1x320xf32> to vector<1x320xbf16>
    %c1_205 = arith.constant 1 : index
    %c0_206 = arith.constant 0 : index
    %c0_207 = arith.constant 0 : index
    %213 = vector.load %arg4[%c1_205, %c0_206, %c0_207] : memref<3x320x128xbf16, #tpu.memory_space<vmem>>, vector<1x320x128xbf16>
    %214 = vector.shape_cast %213 : vector<1x320x128xbf16> to vector<320x128xbf16>
    %cst_208 = arith.constant dense<0.000000e+00> : vector<1x128xf32>
    %215 = tpu.matmul %212, %214, %cst_208 {dimension_numbers = #tpu.dot_dimension_numbers<[1], [0], [0], [1], [0, 0, 1, 1], [], []>} : vector<1x320xbf16>, vector<320x128xbf16>, vector<1x128xf32> -> vector<1x128xf32>
    %216 = arith.addf %210, %215 : vector<1x128xf32>
    %c2_209 = arith.constant 2 : index
    %c0_210 = arith.constant 0 : index
    %217 = vector.load %arg11[%c2_209, %c0_210] : memref<10x320xf32, #tpu.memory_space<vmem>>, vector<1x320xf32>
    %218 = arith.truncf %217 : vector<1x320xf32> to vector<1x320xbf16>
    %c2_211 = arith.constant 2 : index
    %c0_212 = arith.constant 0 : index
    %c0_213 = arith.constant 0 : index
    %219 = vector.load %arg4[%c2_211, %c0_212, %c0_213] : memref<3x320x128xbf16, #tpu.memory_space<vmem>>, vector<1x320x128xbf16>
    %220 = vector.shape_cast %219 : vector<1x320x128xbf16> to vector<320x128xbf16>
    %cst_214 = arith.constant dense<0.000000e+00> : vector<1x128xf32>
    %221 = tpu.matmul %218, %220, %cst_214 {dimension_numbers = #tpu.dot_dimension_numbers<[1], [0], [0], [1], [0, 0, 1, 1], [], []>} : vector<1x320xbf16>, vector<320x128xbf16>, vector<1x128xf32> -> vector<1x128xf32>
    %222 = arith.addf %216, %221 : vector<1x128xf32>
    %cst_215 = arith.constant 0.000000e+00 : f32
    %223 = vector.broadcast %cst_215 : f32 to vector<1x128xf32>
    %224 = arith.maximumf %222, %223 : vector<1x128xf32>
    %c1_216 = arith.constant 1 : index
    %c32_217 = arith.constant 32 : index
    %225 = vector.load %arg12[%c1_216, %c32_217] : memref<6x192xf32, #tpu.memory_space<vmem>>, vector<1x128xf32>
    tpu.vector_store %arg12[%c1_216, %c32_217], %224 {strides = array<i32>} : memref<6x192xf32, #tpu.memory_space<vmem>>, vector<1x128xf32>,
    %c0_218 = arith.constant 0 : index
    %c0_219 = arith.constant 0 : index
    %226 = vector.load %arg5[%c0_218, %c0_219] : memref<1x128xf32, #tpu.memory_space<vmem>>, vector<1x128xf32>
    %c2_220 = arith.constant 2 : index
    %c0_221 = arith.constant 0 : index
    %227 = vector.load %arg11[%c2_220, %c0_221] : memref<10x320xf32, #tpu.memory_space<vmem>>, vector<1x320xf32>
    %228 = arith.truncf %227 : vector<1x320xf32> to vector<1x320xbf16>
    %c0_222 = arith.constant 0 : index
    %c0_223 = arith.constant 0 : index
    %c0_224 = arith.constant 0 : index
    %229 = vector.load %arg4[%c0_222, %c0_223, %c0_224] : memref<3x320x128xbf16, #tpu.memory_space<vmem>>, vector<1x320x128xbf16>
    %230 = vector.shape_cast %229 : vector<1x320x128xbf16> to vector<320x128xbf16>
    %cst_225 = arith.constant dense<0.000000e+00> : vector<1x128xf32>
    %231 = tpu.matmul %228, %230, %cst_225 {dimension_numbers = #tpu.dot_dimension_numbers<[1], [0], [0], [1], [0, 0, 1, 1], [], []>} : vector<1x320xbf16>, vector<320x128xbf16>, vector<1x128xf32> -> vector<1x128xf32>
    %232 = arith.addf %226, %231 : vector<1x128xf32>
    %c3_226 = arith.constant 3 : index
    %c0_227 = arith.constant 0 : index
    %233 = vector.load %arg11[%c3_226, %c0_227] : memref<10x320xf32, #tpu.memory_space<vmem>>, vector<1x320xf32>
    %234 = arith.truncf %233 : vector<1x320xf32> to vector<1x320xbf16>
    %c1_228 = arith.constant 1 : index
    %c0_229 = arith.constant 0 : index
    %c0_230 = arith.constant 0 : index
    %235 = vector.load %arg4[%c1_228, %c0_229, %c0_230] : memref<3x320x128xbf16, #tpu.memory_space<vmem>>, vector<1x320x128xbf16>
    %236 = vector.shape_cast %235 : vector<1x320x128xbf16> to vector<320x128xbf16>
    %cst_231 = arith.constant dense<0.000000e+00> : vector<1x128xf32>
    %237 = tpu.matmul %234, %236, %cst_231 {dimension_numbers = #tpu.dot_dimension_numbers<[1], [0], [0], [1], [0, 0, 1, 1], [], []>} : vector<1x320xbf16>, vector<320x128xbf16>, vector<1x128xf32> -> vector<1x128xf32>
    %238 = arith.addf %232, %237 : vector<1x128xf32>
    %c4_232 = arith.constant 4 : index
    %c0_233 = arith.constant 0 : index
    %239 = vector.load %arg11[%c4_232, %c0_233] : memref<10x320xf32, #tpu.memory_space<vmem>>, vector<1x320xf32>
    %240 = arith.truncf %239 : vector<1x320xf32> to vector<1x320xbf16>
    %c2_234 = arith.constant 2 : index
    %c0_235 = arith.constant 0 : index
    %c0_236 = arith.constant 0 : index
    %241 = vector.load %arg4[%c2_234, %c0_235, %c0_236] : memref<3x320x128xbf16, #tpu.memory_space<vmem>>, vector<1x320x128xbf16>
    %242 = vector.shape_cast %241 : vector<1x320x128xbf16> to vector<320x128xbf16>
    %cst_237 = arith.constant dense<0.000000e+00> : vector<1x128xf32>
    %243 = tpu.matmul %240, %242, %cst_237 {dimension_numbers = #tpu.dot_dimension_numbers<[1], [0], [0], [1], [0, 0, 1, 1], [], []>} : vector<1x320xbf16>, vector<320x128xbf16>, vector<1x128xf32> -> vector<1x128xf32>
    %244 = arith.addf %238, %243 : vector<1x128xf32>
    %cst_238 = arith.constant 0.000000e+00 : f32
    %245 = vector.broadcast %cst_238 : f32 to vector<1x128xf32>
    %246 = arith.maximumf %244, %245 : vector<1x128xf32>
    %c2_239 = arith.constant 2 : index
    %c32_240 = arith.constant 32 : index
    %247 = vector.load %arg12[%c2_239, %c32_240] : memref<6x192xf32, #tpu.memory_space<vmem>>, vector<1x128xf32>
    tpu.vector_store %arg12[%c2_239, %c32_240], %246 {strides = array<i32>} : memref<6x192xf32, #tpu.memory_space<vmem>>, vector<1x128xf32>,
    %c0_241 = arith.constant 0 : index
    %c0_242 = arith.constant 0 : index
    %248 = vector.load %arg5[%c0_241, %c0_242] : memref<1x128xf32, #tpu.memory_space<vmem>>, vector<1x128xf32>
    %c4_243 = arith.constant 4 : index
    %c0_244 = arith.constant 0 : index
    %249 = vector.load %arg11[%c4_243, %c0_244] : memref<10x320xf32, #tpu.memory_space<vmem>>, vector<1x320xf32>
    %250 = arith.truncf %249 : vector<1x320xf32> to vector<1x320xbf16>
    %c0_245 = arith.constant 0 : index
    %c0_246 = arith.constant 0 : index
    %c0_247 = arith.constant 0 : index
    %251 = vector.load %arg4[%c0_245, %c0_246, %c0_247] : memref<3x320x128xbf16, #tpu.memory_space<vmem>>, vector<1x320x128xbf16>
    %252 = vector.shape_cast %251 : vector<1x320x128xbf16> to vector<320x128xbf16>
    %cst_248 = arith.constant dense<0.000000e+00> : vector<1x128xf32>
    %253 = tpu.matmul %250, %252, %cst_248 {dimension_numbers = #tpu.dot_dimension_numbers<[1], [0], [0], [1], [0, 0, 1, 1], [], []>} : vector<1x320xbf16>, vector<320x128xbf16>, vector<1x128xf32> -> vector<1x128xf32>
    %254 = arith.addf %248, %253 : vector<1x128xf32>
    %c5_249 = arith.constant 5 : index
    %c0_250 = arith.constant 0 : index
    %255 = vector.load %arg11[%c5_249, %c0_250] : memref<10x320xf32, #tpu.memory_space<vmem>>, vector<1x320xf32>
    %256 = arith.truncf %255 : vector<1x320xf32> to vector<1x320xbf16>
    %c1_251 = arith.constant 1 : index
    %c0_252 = arith.constant 0 : index
    %c0_253 = arith.constant 0 : index
    %257 = vector.load %arg4[%c1_251, %c0_252, %c0_253] : memref<3x320x128xbf16, #tpu.memory_space<vmem>>, vector<1x320x128xbf16>
    %258 = vector.shape_cast %257 : vector<1x320x128xbf16> to vector<320x128xbf16>
    %cst_254 = arith.constant dense<0.000000e+00> : vector<1x128xf32>
    %259 = tpu.matmul %256, %258, %cst_254 {dimension_numbers = #tpu.dot_dimension_numbers<[1], [0], [0], [1], [0, 0, 1, 1], [], []>} : vector<1x320xbf16>, vector<320x128xbf16>, vector<1x128xf32> -> vector<1x128xf32>
    %260 = arith.addf %254, %259 : vector<1x128xf32>
    %c6_255 = arith.constant 6 : index
    %c0_256 = arith.constant 0 : index
    %261 = vector.load %arg11[%c6_255, %c0_256] : memref<10x320xf32, #tpu.memory_space<vmem>>, vector<1x320xf32>
    %262 = arith.truncf %261 : vector<1x320xf32> to vector<1x320xbf16>
    %c2_257 = arith.constant 2 : index
    %c0_258 = arith.constant 0 : index
    %c0_259 = arith.constant 0 : index
    %263 = vector.load %arg4[%c2_257, %c0_258, %c0_259] : memref<3x320x128xbf16, #tpu.memory_space<vmem>>, vector<1x320x128xbf16>
    %264 = vector.shape_cast %263 : vector<1x320x128xbf16> to vector<320x128xbf16>
    %cst_260 = arith.constant dense<0.000000e+00> : vector<1x128xf32>
    %265 = tpu.matmul %262, %264, %cst_260 {dimension_numbers = #tpu.dot_dimension_numbers<[1], [0], [0], [1], [0, 0, 1, 1], [], []>} : vector<1x320xbf16>, vector<320x128xbf16>, vector<1x128xf32> -> vector<1x128xf32>
    %266 = arith.addf %260, %265 : vector<1x128xf32>
    %cst_261 = arith.constant 0.000000e+00 : f32
    %267 = vector.broadcast %cst_261 : f32 to vector<1x128xf32>
    %268 = arith.maximumf %266, %267 : vector<1x128xf32>
    %c3_262 = arith.constant 3 : index
    %c32_263 = arith.constant 32 : index
    %269 = vector.load %arg12[%c3_262, %c32_263] : memref<6x192xf32, #tpu.memory_space<vmem>>, vector<1x128xf32>
    tpu.vector_store %arg12[%c3_262, %c32_263], %268 {strides = array<i32>} : memref<6x192xf32, #tpu.memory_space<vmem>>, vector<1x128xf32>,
    %c0_264 = arith.constant 0 : index
    %c0_265 = arith.constant 0 : index
    %270 = vector.load %arg5[%c0_264, %c0_265] : memref<1x128xf32, #tpu.memory_space<vmem>>, vector<1x128xf32>
    %c6_266 = arith.constant 6 : index
    %c0_267 = arith.constant 0 : index
    %271 = vector.load %arg11[%c6_266, %c0_267] : memref<10x320xf32, #tpu.memory_space<vmem>>, vector<1x320xf32>
    %272 = arith.truncf %271 : vector<1x320xf32> to vector<1x320xbf16>
    %c0_268 = arith.constant 0 : index
    %c0_269 = arith.constant 0 : index
    %c0_270 = arith.constant 0 : index
    %273 = vector.load %arg4[%c0_268, %c0_269, %c0_270] : memref<3x320x128xbf16, #tpu.memory_space<vmem>>, vector<1x320x128xbf16>
    %274 = vector.shape_cast %273 : vector<1x320x128xbf16> to vector<320x128xbf16>
    %cst_271 = arith.constant dense<0.000000e+00> : vector<1x128xf32>
    %275 = tpu.matmul %272, %274, %cst_271 {dimension_numbers = #tpu.dot_dimension_numbers<[1], [0], [0], [1], [0, 0, 1, 1], [], []>} : vector<1x320xbf16>, vector<320x128xbf16>, vector<1x128xf32> -> vector<1x128xf32>
    %276 = arith.addf %270, %275 : vector<1x128xf32>
    %c7_272 = arith.constant 7 : index
    %c0_273 = arith.constant 0 : index
    %277 = vector.load %arg11[%c7_272, %c0_273] : memref<10x320xf32, #tpu.memory_space<vmem>>, vector<1x320xf32>
    %278 = arith.truncf %277 : vector<1x320xf32> to vector<1x320xbf16>
    %c1_274 = arith.constant 1 : index
    %c0_275 = arith.constant 0 : index
    %c0_276 = arith.constant 0 : index
    %279 = vector.load %arg4[%c1_274, %c0_275, %c0_276] : memref<3x320x128xbf16, #tpu.memory_space<vmem>>, vector<1x320x128xbf16>
    %280 = vector.shape_cast %279 : vector<1x320x128xbf16> to vector<320x128xbf16>
    %cst_277 = arith.constant dense<0.000000e+00> : vector<1x128xf32>
    %281 = tpu.matmul %278, %280, %cst_277 {dimension_numbers = #tpu.dot_dimension_numbers<[1], [0], [0], [1], [0, 0, 1, 1], [], []>} : vector<1x320xbf16>, vector<320x128xbf16>, vector<1x128xf32> -> vector<1x128xf32>
    %282 = arith.addf %276, %281 : vector<1x128xf32>
    %c8_278 = arith.constant 8 : index
    %c0_279 = arith.constant 0 : index
    %283 = vector.load %arg11[%c8_278, %c0_279] : memref<10x320xf32, #tpu.memory_space<vmem>>, vector<1x320xf32>
    %284 = arith.truncf %283 : vector<1x320xf32> to vector<1x320xbf16>
    %c2_280 = arith.constant 2 : index
    %c0_281 = arith.constant 0 : index
    %c0_282 = arith.constant 0 : index
    %285 = vector.load %arg4[%c2_280, %c0_281, %c0_282] : memref<3x320x128xbf16, #tpu.memory_space<vmem>>, vector<1x320x128xbf16>
    %286 = vector.shape_cast %285 : vector<1x320x128xbf16> to vector<320x128xbf16>
    %cst_283 = arith.constant dense<0.000000e+00> : vector<1x128xf32>
    %287 = tpu.matmul %284, %286, %cst_283 {dimension_numbers = #tpu.dot_dimension_numbers<[1], [0], [0], [1], [0, 0, 1, 1], [], []>} : vector<1x320xbf16>, vector<320x128xbf16>, vector<1x128xf32> -> vector<1x128xf32>
    %288 = arith.addf %282, %287 : vector<1x128xf32>
    %cst_284 = arith.constant 0.000000e+00 : f32
    %289 = vector.broadcast %cst_284 : f32 to vector<1x128xf32>
    %290 = arith.maximumf %288, %289 : vector<1x128xf32>
    %c4_285 = arith.constant 4 : index
    %c32_286 = arith.constant 32 : index
    %291 = vector.load %arg12[%c4_285, %c32_286] : memref<6x192xf32, #tpu.memory_space<vmem>>, vector<1x128xf32>
    tpu.vector_store %arg12[%c4_285, %c32_286], %290 {strides = array<i32>} : memref<6x192xf32, #tpu.memory_space<vmem>>, vector<1x128xf32>,
    %c0_287 = arith.constant 0 : index
    %c0_288 = arith.constant 0 : index
    %292 = vector.load %arg9[%c0_287, %c0_288] : memref<1x32xf32, #tpu.memory_space<vmem>>, vector<1x32xf32>
    %c0_289 = arith.constant 0 : index
    %c0_290 = arith.constant 0 : index
    %293 = vector.load %arg7[%c0_289, %c0_290] : memref<1x64xf32, #tpu.memory_space<vmem>>, vector<1x64xf32>
    %c0_291 = arith.constant 0 : index
    %c0_292 = arith.constant 0 : index
    %294 = vector.load %arg12[%c0_291, %c0_292] : memref<6x192xf32, #tpu.memory_space<vmem>>, vector<1x192xf32>
    %295 = arith.truncf %294 : vector<1x192xf32> to vector<1x192xbf16>
    %c0_293 = arith.constant 0 : index
    %c0_294 = arith.constant 0 : index
    %c0_295 = arith.constant 0 : index
    %296 = vector.load %arg6[%c0_293, %c0_294, %c0_295] : memref<3x192x64xbf16, #tpu.memory_space<vmem>>, vector<1x192x64xbf16>
    %297 = vector.shape_cast %296 : vector<1x192x64xbf16> to vector<192x64xbf16>
    %cst_296 = arith.constant dense<0.000000e+00> : vector<1x64xf32>
    %298 = tpu.matmul %295, %297, %cst_296 {dimension_numbers = #tpu.dot_dimension_numbers<[1], [0], [0], [1], [0, 0, 1, 1], [], []>} : vector<1x192xbf16>, vector<192x64xbf16>, vector<1x64xf32> -> vector<1x64xf32>
    %299 = arith.addf %293, %298 : vector<1x64xf32>
    %c1_297 = arith.constant 1 : index
    %c0_298 = arith.constant 0 : index
    %300 = vector.load %arg12[%c1_297, %c0_298] : memref<6x192xf32, #tpu.memory_space<vmem>>, vector<1x192xf32>
    %301 = arith.truncf %300 : vector<1x192xf32> to vector<1x192xbf16>
    %c1_299 = arith.constant 1 : index
    %c0_300 = arith.constant 0 : index
    %c0_301 = arith.constant 0 : index
    %302 = vector.load %arg6[%c1_299, %c0_300, %c0_301] : memref<3x192x64xbf16, #tpu.memory_space<vmem>>, vector<1x192x64xbf16>
    %303 = vector.shape_cast %302 : vector<1x192x64xbf16> to vector<192x64xbf16>
    %cst_302 = arith.constant dense<0.000000e+00> : vector<1x64xf32>
    %304 = tpu.matmul %301, %303, %cst_302 {dimension_numbers = #tpu.dot_dimension_numbers<[1], [0], [0], [1], [0, 0, 1, 1], [], []>} : vector<1x192xbf16>, vector<192x64xbf16>, vector<1x64xf32> -> vector<1x64xf32>
    %305 = arith.addf %299, %304 : vector<1x64xf32>
    %c2_303 = arith.constant 2 : index
    %c0_304 = arith.constant 0 : index
    %306 = vector.load %arg12[%c2_303, %c0_304] : memref<6x192xf32, #tpu.memory_space<vmem>>, vector<1x192xf32>
    %307 = arith.truncf %306 : vector<1x192xf32> to vector<1x192xbf16>
    %c2_305 = arith.constant 2 : index
    %c0_306 = arith.constant 0 : index
    %c0_307 = arith.constant 0 : index
    %308 = vector.load %arg6[%c2_305, %c0_306, %c0_307] : memref<3x192x64xbf16, #tpu.memory_space<vmem>>, vector<1x192x64xbf16>
    %309 = vector.shape_cast %308 : vector<1x192x64xbf16> to vector<192x64xbf16>
    %cst_308 = arith.constant dense<0.000000e+00> : vector<1x64xf32>
    %310 = tpu.matmul %307, %309, %cst_308 {dimension_numbers = #tpu.dot_dimension_numbers<[1], [0], [0], [1], [0, 0, 1, 1], [], []>} : vector<1x192xbf16>, vector<192x64xbf16>, vector<1x64xf32> -> vector<1x64xf32>
    %311 = arith.addf %305, %310 : vector<1x64xf32>
    %cst_309 = arith.constant 0.000000e+00 : f32
    %312 = vector.broadcast %cst_309 : f32 to vector<1x64xf32>
    %313 = arith.maximumf %311, %312 : vector<1x64xf32>
    %314 = arith.truncf %313 : vector<1x64xf32> to vector<1x64xbf16>
    %c0_310 = arith.constant 0 : index
    %c0_311 = arith.constant 0 : index
    %315 = vector.load %arg8[%c0_310, %c0_311] : memref<128x32xbf16, #tpu.memory_space<vmem>>, vector<64x32xbf16>
    %cst_312 = arith.constant dense<0.000000e+00> : vector<1x32xf32>
    %316 = tpu.matmul %314, %315, %cst_312 {dimension_numbers = #tpu.dot_dimension_numbers<[1], [0], [0], [1], [0, 0, 1, 1], [], []>} : vector<1x64xbf16>, vector<64x32xbf16>, vector<1x32xf32> -> vector<1x32xf32>
    %317 = arith.addf %292, %316 : vector<1x32xf32>
    %c0_313 = arith.constant 0 : index
    %c0_314 = arith.constant 0 : index
    %318 = vector.load %arg7[%c0_313, %c0_314] : memref<1x64xf32, #tpu.memory_space<vmem>>, vector<1x64xf32>
    %c2_315 = arith.constant 2 : index
    %c0_316 = arith.constant 0 : index
    %319 = vector.load %arg12[%c2_315, %c0_316] : memref<6x192xf32, #tpu.memory_space<vmem>>, vector<1x192xf32>
    %320 = arith.truncf %319 : vector<1x192xf32> to vector<1x192xbf16>
    %c0_317 = arith.constant 0 : index
    %c0_318 = arith.constant 0 : index
    %c0_319 = arith.constant 0 : index
    %321 = vector.load %arg6[%c0_317, %c0_318, %c0_319] : memref<3x192x64xbf16, #tpu.memory_space<vmem>>, vector<1x192x64xbf16>
    %322 = vector.shape_cast %321 : vector<1x192x64xbf16> to vector<192x64xbf16>
    %cst_320 = arith.constant dense<0.000000e+00> : vector<1x64xf32>
    %323 = tpu.matmul %320, %322, %cst_320 {dimension_numbers = #tpu.dot_dimension_numbers<[1], [0], [0], [1], [0, 0, 1, 1], [], []>} : vector<1x192xbf16>, vector<192x64xbf16>, vector<1x64xf32> -> vector<1x64xf32>
    %324 = arith.addf %318, %323 : vector<1x64xf32>
    %c3_321 = arith.constant 3 : index
    %c0_322 = arith.constant 0 : index
    %325 = vector.load %arg12[%c3_321, %c0_322] : memref<6x192xf32, #tpu.memory_space<vmem>>, vector<1x192xf32>
    %326 = arith.truncf %325 : vector<1x192xf32> to vector<1x192xbf16>
    %c1_323 = arith.constant 1 : index
    %c0_324 = arith.constant 0 : index
    %c0_325 = arith.constant 0 : index
    %327 = vector.load %arg6[%c1_323, %c0_324, %c0_325] : memref<3x192x64xbf16, #tpu.memory_space<vmem>>, vector<1x192x64xbf16>
    %328 = vector.shape_cast %327 : vector<1x192x64xbf16> to vector<192x64xbf16>
    %cst_326 = arith.constant dense<0.000000e+00> : vector<1x64xf32>
    %329 = tpu.matmul %326, %328, %cst_326 {dimension_numbers = #tpu.dot_dimension_numbers<[1], [0], [0], [1], [0, 0, 1, 1], [], []>} : vector<1x192xbf16>, vector<192x64xbf16>, vector<1x64xf32> -> vector<1x64xf32>
    %330 = arith.addf %324, %329 : vector<1x64xf32>
    %c4_327 = arith.constant 4 : index
    %c0_328 = arith.constant 0 : index
    %331 = vector.load %arg12[%c4_327, %c0_328] : memref<6x192xf32, #tpu.memory_space<vmem>>, vector<1x192xf32>
    %332 = arith.truncf %331 : vector<1x192xf32> to vector<1x192xbf16>
    %c2_329 = arith.constant 2 : index
    %c0_330 = arith.constant 0 : index
    %c0_331 = arith.constant 0 : index
    %333 = vector.load %arg6[%c2_329, %c0_330, %c0_331] : memref<3x192x64xbf16, #tpu.memory_space<vmem>>, vector<1x192x64xbf16>
    %334 = vector.shape_cast %333 : vector<1x192x64xbf16> to vector<192x64xbf16>
    %cst_332 = arith.constant dense<0.000000e+00> : vector<1x64xf32>
    %335 = tpu.matmul %332, %334, %cst_332 {dimension_numbers = #tpu.dot_dimension_numbers<[1], [0], [0], [1], [0, 0, 1, 1], [], []>} : vector<1x192xbf16>, vector<192x64xbf16>, vector<1x64xf32> -> vector<1x64xf32>
    %336 = arith.addf %330, %335 : vector<1x64xf32>
    %cst_333 = arith.constant 0.000000e+00 : f32
    %337 = vector.broadcast %cst_333 : f32 to vector<1x64xf32>
    %338 = arith.maximumf %336, %337 : vector<1x64xf32>
    %339 = arith.truncf %338 : vector<1x64xf32> to vector<1x64xbf16>
    %c64 = arith.constant 64 : index
    %c0_334 = arith.constant 0 : index
    %340 = vector.load %arg8[%c64, %c0_334] : memref<128x32xbf16, #tpu.memory_space<vmem>>, vector<64x32xbf16>
    %cst_335 = arith.constant dense<0.000000e+00> : vector<1x32xf32>
    %341 = tpu.matmul %339, %340, %cst_335 {dimension_numbers = #tpu.dot_dimension_numbers<[1], [0], [0], [1], [0, 0, 1, 1], [], []>} : vector<1x64xbf16>, vector<64x32xbf16>, vector<1x32xf32> -> vector<1x32xf32>
    %342 = arith.addf %317, %341 : vector<1x32xf32>
    %cst_336 = arith.constant 1.000000e+00 : f32
    %343 = vector.broadcast %cst_336 : f32 to vector<1x32xf32>
    %344 = arith.mulf %342, %343 : vector<1x32xf32>
    %cst_337 = arith.constant dense<0xFF800000> : vector<1xf32>
    %345 = vector.multi_reduction <maximumf>, %344, %cst_337 [1] : vector<1x32xf32> to vector<1xf32>
    %346 = vector.shape_cast %345 : vector<1xf32> to vector<1x1xf32>
    %347 = vector.broadcast %346 : vector<1x1xf32> to vector<1x32xf32>
    %348 = arith.subf %344, %347 : vector<1x32xf32>
    %349 = math.exp %348 : vector<1x32xf32>
    %cst_338 = arith.constant dense<0.000000e+00> : vector<1xf32>
    %350 = vector.multi_reduction <add>, %349, %cst_338 [1] : vector<1x32xf32> to vector<1xf32>
    %351 = vector.shape_cast %350 : vector<1xf32> to vector<1x1xf32>
    %352 = tpu.reciprocal %351 {approx = true} : vector<1x1xf32> -> vector<1x1xf32>
    %353 = vector.broadcast %352 : vector<1x1xf32> to vector<1x32xf32>
    %354 = arith.mulf %349, %353 : vector<1x32xf32>
    %c0_339 = arith.constant 0 : index
    %c0_340 = arith.constant 0 : index
    %c0_341 = arith.constant 0 : index
    %355 = vector.load %arg10[%c0_339, %c0_340, %c0_341] : memref<1x1x32xf32, #tpu.memory_space<vmem>>, vector<1x1x32xf32>
    %356 = vector.shape_cast %355 : vector<1x1x32xf32> to vector<1x32xf32>
    %357 = vector.shape_cast %354 : vector<1x32xf32> to vector<1x1x32xf32>
    tpu.vector_store %arg10[%c0_339, %c0_340, %c0_341], %357 {strides = array<i32>} : memref<1x1x32xf32, #tpu.memory_space<vmem>>, vector<1x1x32xf32>,
    return
  }
  func.func @transform_0(%arg0: i32) -> (i32, i32, i32) {
    %c0_i32 = arith.constant 0 : i32
    %c0_i32_0 = arith.constant 0 : i32
    %c0_i32_1 = arith.constant 0 : i32
    return %arg0, %c0_i32, %c0_i32_0 : i32, i32, i32
  }
  func.func @transform_1(%arg0: i32) -> (i32, i32, i32) {
    %c0_i32 = arith.constant 0 : i32
    %c0_i32_0 = arith.constant 0 : i32
    %c0_i32_1 = arith.constant 0 : i32
    %c0_i32_2 = arith.constant 0 : i32
    return %c0_i32, %c0_i32_0, %c0_i32_1 : i32, i32, i32
  }
  func.func @transform_2(%arg0: i32) -> (i32, i32) {
    %c0_i32 = arith.constant 0 : i32
    %c0_i32_0 = arith.constant 0 : i32
    %c0_i32_1 = arith.constant 0 : i32
    return %c0_i32, %c0_i32_0 : i32, i32
  }
  func.func @transform_3(%arg0: i32) -> (i32, i32, i32) {
    %c0_i32 = arith.constant 0 : i32
    %c0_i32_0 = arith.constant 0 : i32
    %c0_i32_1 = arith.constant 0 : i32
    %c0_i32_2 = arith.constant 0 : i32
    return %c0_i32, %c0_i32_0, %c0_i32_1 : i32, i32, i32
  }
  func.func @transform_4(%arg0: i32) -> (i32, i32) {
    %c0_i32 = arith.constant 0 : i32
    %c0_i32_0 = arith.constant 0 : i32
    %c0_i32_1 = arith.constant 0 : i32
    return %c0_i32, %c0_i32_0 : i32, i32
  }
  func.func @transform_5(%arg0: i32) -> (i32, i32, i32) {
    %c0_i32 = arith.constant 0 : i32
    %c0_i32_0 = arith.constant 0 : i32
    %c0_i32_1 = arith.constant 0 : i32
    %c0_i32_2 = arith.constant 0 : i32
    return %c0_i32, %c0_i32_0, %c0_i32_1 : i32, i32, i32
  }
  func.func @transform_6(%arg0: i32) -> (i32, i32) {
    %c0_i32 = arith.constant 0 : i32
    %c0_i32_0 = arith.constant 0 : i32
    %c0_i32_1 = arith.constant 0 : i32
    return %c0_i32, %c0_i32_0 : i32, i32
  }
  func.func @transform_7(%arg0: i32) -> (i32, i32) {
    %c0_i32 = arith.constant 0 : i32
    %c0_i32_0 = arith.constant 0 : i32
    %c0_i32_1 = arith.constant 0 : i32
    return %c0_i32, %c0_i32_0 : i32, i32
  }
  func.func @transform_8(%arg0: i32) -> (i32, i32) {
    %c0_i32 = arith.constant 0 : i32
    %c0_i32_0 = arith.constant 0 : i32
    %c0_i32_1 = arith.constant 0 : i32
    return %c0_i32, %c0_i32_0 : i32, i32
  }
  func.func @transform_9(%arg0: i32) -> (i32, i32, i32) {
    %c0_i32 = arith.constant 0 : i32
    %c0_i32_0 = arith.constant 0 : i32
    %c0_i32_1 = arith.constant 0 : i32
    return %arg0, %c0_i32, %c0_i32_0 : i32, i32, i32
  }
}

</mosaic_0001>

<bundles_post_ra>
// kernel: forward.1
= control target key start
LH: loop header
LB: loop body
LE: loop exit
PB: predicated region body
PF: predicated region fallthrough
CT: control target
= control target key end

     0   :  { %14 = vsyncpa [#allocation5], 0  ;;  %s11921_s0 = inlined_call_operand.vmem [shape: f32[2,18,72], index: 0, kind: input, shape index: {}]   ;;  %s11922_s1 = inlined_call_operand.vmem [shape: bf16[3,72,256], index: 1, kind: input, shape index: {}]   ;;  %s11923_s2 = inlined_call_operand.vmem [shape: f32[1,256], index: 2, kind: input, shape index: {}]   ;;  %s11924_s3 = inlined_call_operand.vmem [shape: bf16[3,320,128], index: 3, kind: input, shape index: {}]   ;;  %s11925_s4 = inlined_call_operand.vmem [shape: f32[1,128], index: 4, kind: input, shape index: {}]   ;;  %s11926_s5 = inlined_call_operand.vmem [shape: bf16[3,192,64], index: 5, kind: input, shape index: {}]   ;;  %s11927_s6 = inlined_call_operand.vmem [shape: f32[1,64], index: 6, kind: input, shape index: {}]   ;;  %s11928_s7 = inlined_call_operand.vmem [shape: bf16[128,32], index: 7, kind: input, shape index: {}]   ;;  %s11929_s8 = inlined_call_operand.vmem [shape: f32[1,32], index: 8, kind: input, shape index: {}]   ;;  %s11930_s9 = inlined_call_operand.hbm [shape: f32[2,1,32], index: 9, kind: output, shape index: {}]  }
   0x1   :  { %16 = vsyncpa [#allocation5 + $0x1], 0  ;;  %s9761_s30 = smov 0   ;;  %s9763_s10 = smov 0  }
   0x2   :  { %s9765_s11 = smov 0   ;;  %s9767_s12 = smov 0  }
   0x3 LB: > { %s9782_s13 = sadd.s32 4294967295, %s9703_s12   ;;  %s7522_s14 = sadd.s32 4294967294, %s9703_s12   ;;  %s9703_s12 = sphi %s9767_s12, %s11938_s12   ;;  %s9699_s11 = sphi %s9765_s11, %s11937_s11   ;;  %s9695_s10 = sphi %s9763_s10, %s11936_s10   ;;  %s9691_s30 = sphi %s9761_s30, %s11935_s30  }
   0x4   : > { %s9786_s15 = sadd.s32 1, %s9703_s12   ;;  %s223_s16 = sadd.s32 1, %s9699_s11 }
   0x5   : > { %s220_s17 = ssub.s32 %s9703_s12, %s9786_s15  ;;  %p233_p0 = scmp.ne.s32.totalorder %s9699_s11, %s9695_s10 }
   0x6   : > { %p221_p1 = scmp.eq.s32.totalorder %s220_s17, 0  ;;  %p234_p2 = scmp.eq.s32.totalorder %s9782_s13, 1 }
   0x7   : > { %p239_p3 = scmp.ne.s32.totalorder %s9695_s10, %s9691_s30  ;;  %p240_p4 = scmp.eq.s32.totalorder %s7522_s14, 1 }
   0x8   : > { %s9797_s18 = scalar_select %p221_p1, %s9699_s11, %s223_s16  }
   0x9   : > { %p9799_p5 = por %p234_p2, %p233_p0  ;;  %p9803_p6 = por %p240_p4, %p239_p3 }
   0xa   : > { %p7525_p7 = scmp.ge.s32.totalorder %s9703_s12, 1  ;;  %p290_p8 = scmp.lt.s32.totalorder %s9703_s12, 3 }
   0xc   : > { %p291_p9 = pnand %p7525_p7, %p290_p8 }
   0xd   : > { %v9812_v0 = vld [vmem:[%s11922_s1 + $0x4] ss:$8 sps:$4 sm:$0xff] (!%p291_p9)   ;;  %v9817_v1 = vld [vmem:[%s11922_s1] ss:$8 sps:$4 sm:$0xff] (!%p291_p9)   ;;  %v9705_v2 = vmov (!%p291_p9), 0   ;;  %p325_p10 = scmp.lt.s32.totalorder (!%p291_p9), %s9782_s13, 1 }
   0xe   : > { %294 = sbr.rel (%p291_p9) target bundleno = 1985 (0x7c1), region = 56  ;;  %442 = vmatprep.mubr.bf16.mxu0 (!%p291_p9), %v9705_v2  ;;  %568 = vmatprep.mubr.bf16.mxu1 (!%p291_p9), %v9705_v2  ;;  %v9826_v3 = vld [vmem:[%s11922_s1 + $0x4c] ss:$8 sps:$4 sm:$0xff] (!%p291_p9)   ;;  %v9831_v4 = vld [vmem:[%s11922_s1 + $0x48] ss:$8 sps:$4 sm:$0xff] (!%p291_p9)   ;;  %v353_v15 = vld [vmem:[%s11922_s1 + $0x40] sm:$0xff] (!%p291_p9) }
   0xf   : > { %410 = vmatprep.subr.bf16.mxu0 (!%p291_p9), %v9812_v0  ;;  %v9837_v5 = vld [vmem:[%s11922_s1 + $0x14] ss:$8 sps:$4 sm:$0xff] (!%p291_p9)   ;;  %v9842_v6 = vld [vmem:[%s11922_s1 + $0x10] ss:$8 sps:$4 sm:$0xff] (!%p291_p9)   ;;  %536 = vmatprep.subr.bf16.mxu1 (!%p291_p9), %v9826_v3  ;;  %v9862_v9 = vld [vmem:[%s11922_s1 + $0x24] ss:$8 sps:$4 sm:$0xff] (!%p291_p9)   ;;  %v9906_v18 = vcombine.high (!%p291_p9), %v353_v15, %v353_v15  ;;  %v7535_v19 = vcombine.low (!%p291_p9), %v353_v15, %v353_v15 }
  0x10   : > { %411 = vmatpush1.bf16.msra.mxu0 (!%p291_p9), %v9817_v1  ;;  %v9848_v7 = vld [vmem:[%s11922_s1 + $0x5c] ss:$8 sps:$4 sm:$0xff] (!%p291_p9)   ;;  %537 = vmatpush1.bf16.msra.mxu1 (!%p291_p9), %v9831_v4  ;;  %v9856_v8 = vld [vmem:[%s11922_s1 + $0x58] ss:$8 sps:$4 sm:$0xff] (!%p291_p9)   ;;  %v9873_v11 = vld [vmem:[%s11922_s1 + $0x6c] ss:$8 sps:$4 sm:$0xff] (!%p291_p9)  }
  0x11   : > { %412 = vmatprep.subr.bf16.mxu0 (!%p291_p9), %v9837_v5  ;;  %538 = vmatprep.subr.bf16.mxu1 (!%p291_p9), %v9848_v7  ;;  %v9868_v10 = vld [vmem:[%s11922_s1 + $0x20] ss:$8 sps:$4 sm:$0xff] (!%p291_p9)   ;;  %v9879_v12 = vld [vmem:[%s11922_s1 + $0x34] ss:$8 sps:$4 sm:$0xff] (!%p291_p9)   ;;  %v9900_v16 = vld [vmem:[%s11922_s1 + $0x30] ss:$8 sps:$4 sm:$0xff] (!%p291_p9)  }
  0x12   : > { %v9885_v13 = vld [vmem:[%s11922_s1 + $0x68] ss:$8 sps:$4 sm:$0xff] (!%p291_p9)   ;;  %v9891_v14 = vld [vmem:[%s11922_s1 + $0x7c] ss:$8 sps:$4 sm:$0xff] (!%p291_p9)   ;;  %v9917_v20 = vld [vmem:[%s11922_s1 + $0x78] ss:$8 sps:$4 sm:$0xff] (!%p291_p9)  }
  0x13   : > { %v7547_v17 = vld [vmem:[%s11922_s1 + $0x88] sm:$0xff] (!%p291_p9)  ;;  %vm403_vm0 = vcmask (!%p291_p9), 1043456   ;;  %v9932_v25 = vld [vmem:[%s11922_s1 + $0x94] ss:$8 sps:$4 sm:$0xff] (!%p291_p9)   ;;  %vm399_vm1 = vcmask (!%p291_p9), 588800   ;;  %vm333_vm2 = vcmask (!%p291_p9), 523264  }
  0x14   : > { %413 = vmatpush1.bf16.msra.mxu0 (!%p291_p9), %v9842_v6  ;;  %539 = vmatpush1.bf16.msra.mxu1 (!%p291_p9), %v9856_v8  ;;  %v9920_v21 = vcombine.high (!%p291_p9), %v7547_v17, %v7547_v17  ;;  %v7556_v22 = vcombine.low (!%p291_p9), %v7547_v17, %v7547_v17  ;;  %v9927_v24 = vsel (!%p291_p9), %vm403_vm0, %v7535_v19, 0  ;;  %v9945_v29 = vld [vmem:[%s11922_s1 + $0x90] ss:$8 sps:$4 sm:$0xff] (!%p291_p9)   ;;  %v9951_v31 = vld [vmem:[%s11922_s1 + $0xa4] ss:$8 sps:$4 sm:$0xff] (!%p291_p9)   ;;  %vm9708_vm3 = vmmov (!%p291_p9), 0  }
  0x15   : > { %s326_s23 = scalar_select %p325_p10, %s9782_s13, 1  ;;  %414 = vmatprep.subr.bf16.mxu0 %v9862_v9  ;;  %540 = vmatprep.subr.bf16.mxu1 %v9873_v11  ;;  %v9957_v32 = vld [vmem:[%s11922_s1 + $0xa0] ss:$8 sps:$4 sm:$0xff]   ;;  %v9964_v33 = vld [vmem:[%s11922_s1 + $0xb4] ss:$8 sps:$4 sm:$0xff]   ;;  %vm727_vm6 = vcmask 261120  }
  0x16   : > { %v9939_v27 = vsel %vm403_vm0, %v7556_v22, 0  ;;  %v9974_v34 = vld [vmem:[%s11922_s1 + $0xb0] ss:$8 sps:$4 sm:$0xff]   ;;  %v9981_v35 = vld [vmem:[%s11922_s1 + $0xc4] ss:$8 sps:$4 sm:$0xff]   ;;  %vm340_vm8 = vcmask 521216  }
  0x17   : > { %s9207_s22 = smul.u32 24, %s326_s23  ;;  %v7568_v36 = vld [vmem:[%s11922_s1 + $0xd0] sm:$0xff]  ;;  %v9994_v37 = vld [vmem:[%s11922_s1 + $0xc0] ss:$8 sps:$4 sm:$0xff]   ;;  %v9635_v15 = vld [vmem:[%s11922_s1 + $0x24] ss:$8 sps:$4 sm:$0xff]  }
  0x18   : > { %415 = vmatpush1.bf16.msra.mxu0 %v9868_v10  ;;  %541 = vmatpush1.bf16.msra.mxu1 %v9885_v13  ;;  %v7577_v38 = vcombine.low %v7568_v36, %v7568_v36  ;;  %v9997_v39 = vcombine.high %v7568_v36, %v7568_v36  ;;  %v9624_v61 = vld [vmem:[%s11922_s1] ss:$8 sps:$4 sm:$0xff]   ;;  %v9626_v63 = vld [vmem:[%s11922_s1 + $0x10] ss:$8 sps:$4 sm:$0xff]   ;;  %v9637_v17 = vld [vmem:[%s11922_s1 + $0xc4] ss:$8 sps:$4 sm:$0xff]  }
  0x19   : > { %416 = vmatprep.subr.bf16.mxu0 %v9879_v12  ;;  %s9911_s25 = scalar_lea.vmem %s11921_s0, %s9207_s22  ;;  %542 = vmatprep.subr.bf16.mxu1 %v9891_v14  ;;  %v9625_v62 = vld [vmem:[%s11922_s1 + $0x48] ss:$8 sps:$4 sm:$0xff]   ;;  %s9709_s23 = smov 32   ;;  %vm337_vm9 = vcmask 517120   ;;  %vm4243_vm10 = vcmask 1040640   ;;  %vm4245_vm11 = vcmask 253952  }
  0x1a   : > { %v343_v23 = vld [vmem:[%s9911_s25] sm:$0x1]  ;;  %v470_v26 = vld [vmem:[%s9911_s25 + $0x1] sm:$0x1]  ;;  %v10003_v40 = vsel %vm403_vm0, %v7577_v38, 0  ;;  %s323_s16 = sand.u32 1, %s9695_s10  }
  0x1b   : > { %v344_v28 = vpack.c.bf16 %v343_v23, %v343_v23  ;;  %v471_v30 = vpack.c.bf16 %v470_v26, %v470_v26  ;;  %v596_v41 = vld [vmem:[%s9911_s25 + $0x2] sm:$0x1]  ;;  %v863_v45 = vld [vmem:[%s9911_s25 + $0x3] sm:$0x1]  ;;  %v988_v46 = vld [vmem:[%s9911_s25 + $0x4] sm:$0x1] }
  0x1c   : > { %417 = vmatpush1.bf16.msra.mxu0 %v9900_v16  ;;  %543 = vmatpush1.bf16.msra.mxu1 %v9917_v20  ;;  %v738_v42 = vld [vmem:[%s9911_s25 + $0x2] sm:$0x1]  ;;  %v597_v43 = vpack.c.bf16 %v596_v41, %v596_v41  ;;  %v864_v47 = vpack.c.bf16 %v863_v45, %v863_v45  ;;  %v989_v48 = vpack.c.bf16 %v988_v46, %v988_v46  ;;  %v1124_v49 = vld [vmem:[%s9911_s25 + $0x4] sm:$0x1]  ;;  %v1249_v50 = vld [vmem:[%s9911_s25 + $0x5] sm:$0x1] }
  0x1d   : > { %7537 = vmatprep.subr.msk.bf16.mxu0 %vm403_vm0, %v9906_v18  ;;  %7558 = vmatprep.subr.msk.bf16.mxu1 %vm403_vm0, %v9920_v21  ;;  %v739_v44 = vpack.c.bf16 %v738_v42, %v738_v42  ;;  %v1125_v51 = vpack.c.bf16 %v1124_v49, %v1124_v49  ;;  %v1250_v52 = vpack.c.bf16 %v1249_v50, %v1249_v50  ;;  %v1374_v53 = vld [vmem:[%s9911_s25 + $0x6] sm:$0x1]  ;;  %v1635_v57 = vld [vmem:[%s9911_s25 + $0x7] sm:$0x1]  ;;  %v1760_v58 = vld [vmem:[%s9911_s25 + $0x8] sm:$0x1] }
  0x1e   : > { %v1510_v54 = vld [vmem:[%s9911_s25 + $0x6] sm:$0x1]  ;;  %v1375_v55 = vpack.c.bf16 %v1374_v53, %v1374_v53  ;;  %v1636_v59 = vpack.c.bf16 %v1635_v57, %v1635_v57  ;;  %v1761_v60 = vpack.c.bf16 %v1760_v58, %v1760_v58  ;;  %v2146_v19 = vld [vmem:[%s9911_s25 + $0xa] sm:$0x1]  ;;  %v2407_v36 = vld [vmem:[%s9911_s25 + $0xb] sm:$0x1] }
  0x1f   : > { %v1511_v56 = vpack.c.bf16 %v1510_v54, %v1510_v54  ;;  %v2282_v22 = vld [vmem:[%s9911_s25 + $0xa] sm:$0x1]  ;;  %v10230_v26 = vld [vmem:[%s11922_s1 + $0x5c] ss:$8 sps:$4 sm:$0xff]   ;;  %v2408_v41 = vpack.c.bf16 %v2407_v36, %v2407_v36  ;;  %v10338_v53 = vld [vmem:[%s11922_s1 + $0x90] ss:$8 sps:$4 sm:$0xff]  }
  0x20   : > { %419 = vmatpush1.bf16.msra.mxu0 %v9927_v24  ;;  %545 = vmatpush1.bf16.msra.mxu1 %v9939_v27  ;;  %v10223_v23 = vld [vmem:[%s11922_s1 + $0x48] ss:$8 sps:$4 sm:$0xff]   ;;  %v9313_v42 = vld [vmem:[%s11922_s1 + $0x14] ss:$8 sps:$4 sm:$0xff]   ;;  %v9316_v45 = vld [vmem:[%s11922_s1 + $0x24] ss:$8 sps:$4 sm:$0xff]  }
  0x21   : > { %662 = vmatprep.subr.bf16.mxu0 %v9932_v25  ;;  %803 = vmatprep.subr.bf16.mxu1 %v9812_v0  ;;  %v9640_v38 = vld [vmem:[%s11922_s1 + $0xc0] ss:$8 sps:$4 sm:$0xff]   ;;  %v2793_v54 = vld [vmem:[%s9911_s25 + $0xd] sm:$0x1]  ;;  %s8631_s17 = sshll.u32 %s9782_s13, 4  ;;  %s7455_s22 = scalar_lea.sflag [#allocation5], %s323_s16 }
  0x22   : > { %v2794_v57 = vpack.c.bf16 %v2793_v54, %v2793_v54  ;;  %v9325_v58 = vld [vmem:[%s11922_s1 + $0xa0] ss:$8 sps:$4 sm:$0xff]   ;;  %s11878_s27 = scalar_lea.hbm %s11930_s9, %s8631_s17  ;;  %s9710_s13 = smov [#allocation4]  }
  0x23   : > { %7538 = vmatmul.mubr.msk.bf16.vlgmr.msra.gmra.mrb[0].mxu0 %vm399_vm1, %v344_v28  ;;  %7559 = vmatmul.mubr.msk.bf16.vlgmr.msra.gmra.mrb[0].mxu1 %vm399_vm1, %v471_v30  ;;  %v10238_v28 = vld [vmem:[%s11922_s1 + $0x58] ss:$8 sps:$4 sm:$0xff]   ;;  %v10259_v30 = vld [vmem:[%s11922_s1 + $0x68] ss:$8 sps:$4 sm:$0xff]   ;;  %s9645_s28 = sshll.u32 %s9710_s13, 4  ;;  %s9646_s28 = int_to_ptr.vmem [resolvable:$false] %s9645_s28 }
  0x24   : > { %663 = vmatpush1.bf16.msra.mxu0 %v9945_v29  ;;  %694 = vmatprep.mubr.bf16.mxu0 %v9705_v2  ;;  %s9647_s29 = scalar_lea.vmem %s9646_s28, 32 }
  0x25   : > { %664 = vmatprep.subr.bf16.mxu0 %v9951_v31  ;;  %804 = vmatpush1.bf16.msra.mxu1 %v9817_v1 }
  0x26   : > { %835 = vmatprep.mubr.bf16.mxu1 %v9705_v2  ;;  %805 = vmatprep.subr.bf16.mxu1 %v9837_v5 }
  0x28   : > { %665 = vmatpush1.bf16.msra.mxu0 %v9957_v32 }
  0x29   : > { %666 = vmatprep.subr.bf16.mxu0 %v9964_v33  ;;  %806 = vmatpush1.bf16.msra.mxu1 %v9842_v6 }
  0x2a   : > { %807 = vmatprep.subr.bf16.mxu1 %v9862_v9 }
  0x2c   : > { %667 = vmatpush1.bf16.msra.mxu0 %v9974_v34 }
  0x2d   : > { %668 = vmatprep.subr.bf16.mxu0 %v9981_v35  ;;  %808 = vmatpush1.bf16.msra.mxu1 %v9868_v10 }
  0x2e   : > { %809 = vmatprep.subr.bf16.mxu1 %v9879_v12 }
  0x30   : > { %669 = vmatpush1.bf16.msra.mxu0 %v9994_v37 }
  0x31   : > { %7579 = vmatprep.subr.msk.bf16.mxu0 %vm403_vm0, %v9997_v39  ;;  %810 = vmatpush1.bf16.msra.mxu1 %v9900_v16 }
  0x32   : > { %7591 = vmatprep.subr.msk.bf16.mxu1 %vm403_vm0, %v9906_v18 }
  0x34   : > { %671 = vmatpush1.bf16.msra.mxu0 %v10003_v40 }
  0x35   : > { %928 = vmatprep.subr.bf16.mxu0 %v9826_v3  ;;  %812 = vmatpush1.bf16.msra.mxu1 %v9927_v24 }
  0x36   : > { %1053 = vmatprep.subr.bf16.mxu1 %v9932_v25 }
  0x37   : > { %7580 = vmatmul.mubr.msk.bf16.vlgmr.msra.gmra.mrb[4].mxu0 %vm399_vm1, %v597_v43 }
  0x38   : > { %929 = vmatpush1.bf16.msra.mxu0 %v9831_v4  ;;  %960 = vmatprep.mubr.bf16.mxu0 %v9705_v2 }
  0x39   : > { %7592 = vmatmul.mubr.msk.bf16.vlgmr.msra.gmra.mrb[4].mxu1 %vm399_vm1, %v739_v44  ;;  %930 = vmatprep.subr.bf16.mxu0 %v9848_v7  ;;  %v2678_v44 = vld [vmem:[%s11922_s1 + $0x40] sm:$0xff] }
  0x3a   : > { %1054 = vmatpush1.bf16.msra.mxu1 %v9945_v29  ;;  %1085 = vmatprep.mubr.bf16.mxu1 %v9705_v2  ;;  %v7859_v46 = vcombine.low %v2678_v44, %v2678_v44  ;;  %v7860_v50 = vcombine.high %v2678_v44, %v2678_v44 }
  0x3b   : > { %1055 = vmatprep.subr.bf16.mxu1 %v9951_v31 }
  0x3c   : > { %931 = vmatpush1.bf16.msra.mxu0 %v9856_v8  ;;  %v10324_v49 = vsel %vm403_vm0, %v7859_v46, 0  ;;  %v9356_v46 = vld [vmem:[%s11924_s3 + $0x88] sm:$0xff]  }
  0x3d   : > { %932 = vmatprep.subr.bf16.mxu0 %v9873_v11 }
  0x3e   : > { %1056 = vmatpush1.bf16.msra.mxu1 %v9957_v32 }
  0x3f   : > { %1057 = vmatprep.subr.bf16.mxu1 %v9964_v33 }
  0x40   : > { %933 = vmatpush1.bf16.msra.mxu0 %v9885_v13 }
  0x41   : > { %934 = vmatprep.subr.bf16.mxu0 %v9891_v14 }
  0x42   : > { %1058 = vmatpush1.bf16.msra.mxu1 %v9974_v34 }
  0x43   : > { %1059 = vmatprep.subr.bf16.mxu1 %v9981_v35 }
  0x44   : > { %935 = vmatpush1.bf16.msra.mxu0 %v9917_v20 }
  0x45   : > { %7612 = vmatprep.subr.msk.bf16.mxu0 %vm403_vm0, %v9920_v21 }
  0x46   : > { %1060 = vmatpush1.bf16.msra.mxu1 %v9994_v37 }
  0x47   : > { %7633 = vmatprep.subr.msk.bf16.mxu1 %vm403_vm0, %v9997_v39 }
  0x48   : > { %937 = vmatpush1.bf16.msra.mxu0 %v9939_v27 }
  0x49   : > { %1189 = vmatprep.subr.bf16.mxu0 %v9812_v0 }
  0x4a   : > { %1062 = vmatpush1.bf16.msra.mxu1 %v10003_v40 }
  0x4b   : > { %7613 = vmatmul.mubr.msk.bf16.vlgmr.msra.gmra.mrb[8].mxu0 %vm399_vm1, %v864_v47  ;;  %1314 = vmatprep.subr.bf16.mxu1 %v9826_v3  ;;  %v9319_v47 = vld [vmem:[%s11922_s1 + $0x34] ss:$8 sps:$4 sm:$0xff]  }
  0x4c   : > { %1190 = vmatpush1.bf16.msra.mxu0 %v9817_v1  ;;  %1221 = vmatprep.mubr.bf16.mxu0 %v9705_v2 }
  0x4d   : > { %7634 = vmatmul.mubr.msk.bf16.vlgmr.msra.gmra.mrb[8].mxu1 %vm399_vm1, %v989_v48  ;;  %1191 = vmatprep.subr.bf16.mxu0 %v9837_v5  ;;  %v9317_v48 = vld [vmem:[%s11922_s1 + $0x30] ss:$8 sps:$4 sm:$0xff]  }
  0x4e   : > { %1315 = vmatpush1.bf16.msra.mxu1 %v9831_v4  ;;  %1346 = vmatprep.mubr.bf16.mxu1 %v9705_v2 }
  0x4f   : > { %1316 = vmatprep.subr.bf16.mxu1 %v9848_v7 }
  0x50   : > { %1192 = vmatpush1.bf16.msra.mxu0 %v9842_v6 }
  0x51   : > { %1193 = vmatprep.subr.bf16.mxu0 %v9862_v9 }
  0x52   : > { %1317 = vmatpush1.bf16.msra.mxu1 %v9856_v8 }
  0x53   : > { %1318 = vmatprep.subr.bf16.mxu1 %v9873_v11 }
  0x54   : > { %1194 = vmatpush1.bf16.msra.mxu0 %v9868_v10 }
  0x55   : > { %1195 = vmatprep.subr.bf16.mxu0 %v9879_v12 }
  0x56   : > { %1319 = vmatpush1.bf16.msra.mxu1 %v9885_v13 }
  0x57   : > { %1320 = vmatprep.subr.bf16.mxu1 %v9891_v14 }
  0x58   : > { %1196 = vmatpush1.bf16.msra.mxu0 %v9900_v16 }
  0x59   : > { %7645 = vmatprep.subr.msk.bf16.mxu0 %vm403_vm0, %v9906_v18 }
  0x5a   : > { %1321 = vmatpush1.bf16.msra.mxu1 %v9917_v20 }
  0x5b   : > { %7666 = vmatprep.subr.msk.bf16.mxu1 %vm403_vm0, %v9920_v21 }
  0x5c   : > { %1198 = vmatpush1.bf16.msra.mxu0 %v9927_v24 }
  0x5d   : > { %1439 = vmatprep.subr.bf16.mxu0 %v9932_v25 }
  0x5e   : > { %1323 = vmatpush1.bf16.msra.mxu1 %v9939_v27 }
  0x5f   : > { %7646 = vmatmul.mubr.msk.bf16.vlgmr.msra.gmra.mrb[12].mxu0 %vm399_vm1, %v1125_v51  ;;  %1575 = vmatprep.subr.bf16.mxu1 %v9812_v0  ;;  %v2668_v51 = vld [vmem:[%s9911_s25 + $0xc] sm:$0x1] }
  0x60   : > { %1440 = vmatpush1.bf16.msra.mxu0 %v9945_v29  ;;  %1471 = vmatprep.mubr.bf16.mxu0 %v9705_v2 }
  0x61   : > { %7667 = vmatmul.mubr.msk.bf16.vlgmr.msra.gmra.mrb[12].mxu1 %vm399_vm1, %v1250_v52  ;;  %1441 = vmatprep.subr.bf16.mxu0 %v9951_v31  ;;  %v9324_v52 = vld [vmem:[%s11922_s1 + $0x94] ss:$8 sps:$4 sm:$0xff]  }
  0x62   : > { %1576 = vmatpush1.bf16.msra.mxu1 %v9817_v1  ;;  %1607 = vmatprep.mubr.bf16.mxu1 %v9705_v2  ;;  %v9628_v1 = vld [vmem:[%s11922_s1 + $0x20] ss:$8 sps:$4 sm:$0xff]  }
  0x63   : > { %1577 = vmatprep.subr.bf16.mxu1 %v9837_v5 }
  0x64   : > { %1442 = vmatpush1.bf16.msra.mxu0 %v9957_v32 }
  0x65   : > { %1443 = vmatprep.subr.bf16.mxu0 %v9964_v33 }
  0x66   : > { %1578 = vmatpush1.bf16.msra.mxu1 %v9842_v6  ;;  %v10165_v6 = vld [vmem:[%s11922_s1 + $0x4] ss:$8 sps:$4 sm:$0xff]  }
  0x67   : > { %1579 = vmatprep.subr.bf16.mxu1 %v9862_v9 }
  0x68   : > { %1444 = vmatpush1.bf16.msra.mxu0 %v9974_v34 }
  0x69   : > { %1445 = vmatprep.subr.bf16.mxu0 %v9981_v35 }
  0x6a   : > { %1580 = vmatpush1.bf16.msra.mxu1 %v9868_v10  ;;  %v9630_v10 = vld [vmem:[%s11922_s1 + $0x90] ss:$8 sps:$4 sm:$0xff]  }
  0x6b   : > { %1581 = vmatprep.subr.bf16.mxu1 %v9879_v12 }
  0x6c   : > { %1446 = vmatpush1.bf16.msra.mxu0 %v9994_v37 }
  0x6d   : > { %7687 = vmatprep.subr.msk.bf16.mxu0 %vm403_vm0, %v9997_v39 }
  0x6e   : > { %1582 = vmatpush1.bf16.msra.mxu1 %v9900_v16  ;;  %v9636_v16 = vld [vmem:[%s11922_s1 + $0xb0] ss:$8 sps:$4 sm:$0xff]  }
  0x6f   : > { %7699 = vmatprep.subr.msk.bf16.mxu1 %vm403_vm0, %v9906_v18 }
  0x70   : > { %1448 = vmatpush1.bf16.msra.mxu0 %v10003_v40 }
  0x71   : > { %1700 = vmatprep.subr.bf16.mxu0 %v9826_v3 }
  0x72   : > { %1584 = vmatpush1.bf16.msra.mxu1 %v9927_v24 }
  0x73   : > { %7688 = vmatmul.mubr.msk.bf16.vlgmr.msra.gmra.mrb[16].mxu0 %vm399_vm1, %v1375_v55  ;;  %1825 = vmatprep.subr.bf16.mxu1 %v9932_v25  ;;  %v2669_v55 = vpack.c.bf16 %v2668_v51, %v2668_v51  ;;  %v9343_v51 = vld [vmem:[%s11924_s3 + $0x18] sm:$0xff]  }
  0x74   : > { %1701 = vmatpush1.bf16.msra.mxu0 %v9831_v4  ;;  %1732 = vmatprep.mubr.bf16.mxu0 %v9705_v2  ;;  %v1896_v4 = vld [vmem:[%s9911_s25 + $0x8] sm:$0x1] }
  0x75   : > { %7700 = vmatmul.mubr.msk.bf16.vlgmr.msra.gmra.mrb[16].mxu1 %vm399_vm1, %v1511_v56  ;;  %1702 = vmatprep.subr.bf16.mxu0 %v9848_v7  ;;  %v9327_v56 = vld [vmem:[%s11922_s1 + $0xa4] ss:$8 sps:$4 sm:$0xff]  }
  0x76   : > { %1826 = vmatpush1.bf16.msra.mxu1 %v9945_v29  ;;  %1857 = vmatprep.mubr.bf16.mxu1 %v9705_v2  ;;  %v10247_v29 = vld [vmem:[%s11922_s1 + $0x6c] ss:$8 sps:$4 sm:$0xff]  }
  0x77   : > { %1827 = vmatprep.subr.bf16.mxu1 %v9951_v31  ;;  %v10265_v31 = vld [vmem:[%s11922_s1 + $0x7c] ss:$8 sps:$4 sm:$0xff]  }
  0x78   : > { %1703 = vmatpush1.bf16.msra.mxu0 %v9856_v8  ;;  %v10173_v8 = vld [vmem:[%s11922_s1] ss:$8 sps:$4 sm:$0xff]  }
  0x79   : > { %1704 = vmatprep.subr.bf16.mxu0 %v9873_v11 }
  0x7a   : > { %1828 = vmatpush1.bf16.msra.mxu1 %v9957_v32 }
  0x7b   : > { %1829 = vmatprep.subr.bf16.mxu1 %v9964_v33  ;;  %v10272_v33 = vld [vmem:[%s11922_s1 + $0x78] ss:$8 sps:$4 sm:$0xff]  }
  0x7c   : > { %1705 = vmatpush1.bf16.msra.mxu0 %v9885_v13 }
  0x7d   : > { %1706 = vmatprep.subr.bf16.mxu0 %v9891_v14 }
  0x7e   : > { %1830 = vmatpush1.bf16.msra.mxu1 %v9974_v34 }
  0x7f   : > { %1831 = vmatprep.subr.bf16.mxu1 %v9981_v35 }
  0x80   : > { %1707 = vmatpush1.bf16.msra.mxu0 %v9917_v20 }
  0x81   : > { %7720 = vmatprep.subr.msk.bf16.mxu0 %vm403_vm0, %v9920_v21 }
  0x82   : > { %1832 = vmatpush1.bf16.msra.mxu1 %v9994_v37 }
  0x83   : > { %7741 = vmatprep.subr.msk.bf16.mxu1 %vm403_vm0, %v9997_v39 }
  0x84   : > { %1709 = vmatpush1.bf16.msra.mxu0 %v9939_v27 }
  0x85   : > { %1961 = vmatprep.subr.bf16.mxu0 %v9812_v0  ;;  %v9627_v0 = vld [vmem:[%s11922_s1 + $0x58] ss:$8 sps:$4 sm:$0xff]  }
  0x86   : > { %1834 = vmatpush1.bf16.msra.mxu1 %v10003_v40 }
  0x87   : > { %7721 = vmatmul.mubr.msk.bf16.vlgmr.msra.gmra.mrb[20].mxu0 %vm399_vm1, %v1636_v59  ;;  %2086 = vmatprep.subr.bf16.mxu1 %v9826_v3  ;;  %v9629_v3 = vld [vmem:[%s11922_s1 + $0x30] ss:$8 sps:$4 sm:$0xff]   ;;  %v9330_v59 = vld [vmem:[%s11922_s1 + $0xb4] ss:$8 sps:$4 sm:$0xff]  }
  0x88   : > { %1962 = vmatpush1.bf16.msra.mxu0 %v9624_v61  ;;  %1993 = vmatprep.mubr.bf16.mxu0 %v9705_v2  ;;  %v9333_v61 = vld [vmem:[%s11922_s1 + $0xc4] ss:$8 sps:$4 sm:$0xff]  }
  0x89   : > { %7742 = vmatmul.mubr.msk.bf16.vlgmr.msra.gmra.mrb[20].mxu1 %vm399_vm1, %v1761_v60  ;;  %1963 = vmatprep.subr.bf16.mxu0 %v9837_v5  ;;  %v2021_v5 = vld [vmem:[%s9911_s25 + $0x9] sm:$0x1]  ;;  %v9328_v60 = vld [vmem:[%s11922_s1 + $0xb0] ss:$8 sps:$4 sm:$0xff]  }
  0x8a   : > { %2087 = vmatpush1.bf16.msra.mxu1 %v9625_v62  ;;  %2118 = vmatprep.mubr.bf16.mxu1 %v9705_v2  ;;  %v7892_v62 = vld [vmem:[%s11922_s1 + $0xd0] sm:$0xff] }
  0x8b   : > { %2088 = vmatprep.subr.bf16.mxu1 %v9848_v7  ;;  %v1897_v7 = vpack.c.bf16 %v1896_v4, %v1896_v4  ;;  %v2918_v4 = vld [vmem:[%s9911_s25 + $0xe] sm:$0x1] }
  0x8c   : > { %1964 = vmatpush1.bf16.msra.mxu0 %v9626_v63 }
  0x8d   : > { %1965 = vmatprep.subr.bf16.mxu0 %v9862_v9  ;;  %v2022_v9 = vpack.c.bf16 %v2021_v5, %v2021_v5  ;;  %v3054_v5 = vld [vmem:[%s9911_s25 + $0xe] sm:$0x1] }
  0x8e   : > { %2089 = vmatpush1.bf16.msra.mxu1 %v9627_v0  ;;  %v10374_v0 = vld [vmem:[%s11922_s1 + $0xc0] ss:$8 sps:$4 sm:$0xff]  }
  0x8f   : > { %2090 = vmatprep.subr.bf16.mxu1 %v9873_v11  ;;  %v9631_v11 = vld [vmem:[%s11922_s1 + $0xa4] ss:$8 sps:$4 sm:$0xff]  }
  0x90   : > { %1966 = vmatpush1.bf16.msra.mxu0 %v9628_v1 }
  0x91   : > { %1967 = vmatprep.subr.bf16.mxu0 %v9879_v12  ;;  %v9632_v12 = vld [vmem:[%s11922_s1 + $0x14] ss:$8 sps:$4 sm:$0xff]  }
  0x92   : > { %2091 = vmatpush1.bf16.msra.mxu1 %v9885_v13  ;;  %v9633_v13 = vld [vmem:[%s11922_s1 + $0xa0] ss:$8 sps:$4 sm:$0xff]  }
  0x93   : > { %2092 = vmatprep.subr.bf16.mxu1 %v9891_v14  ;;  %v9634_v14 = vld [vmem:[%s11922_s1 + $0xb4] ss:$8 sps:$4 sm:$0xff]  }
  0x94   : > { %1968 = vmatpush1.bf16.msra.mxu0 %v9629_v3 }
  0x95   : > { %7753 = vmatprep.subr.msk.bf16.mxu0 %vm403_vm0, %v9906_v18 }
  0x96   : > { %2093 = vmatpush1.bf16.msra.mxu1 %v9917_v20  ;;  %v9638_v20 = vld [vmem:[%s11922_s1 + $0x34] ss:$8 sps:$4 sm:$0xff]  }
  0x97   : > { %7774 = vmatprep.subr.msk.bf16.mxu1 %vm403_vm0, %v9920_v21  ;;  %v10214_v21 = vld [vmem:[%s11922_s1 + $0x4c] ss:$8 sps:$4 sm:$0xff]  }
  0x98   : > { %1970 = vmatpush1.bf16.msra.mxu0 %v9927_v24 }
  0x99   : > { %2211 = vmatprep.subr.bf16.mxu0 %v9932_v25  ;;  %v2147_v25 = vpack.c.bf16 %v2146_v19, %v2146_v19  ;;  %v3179_v19 = vld [vmem:[%s9911_s25 + $0xf] sm:$0x1] }
  0x9a   : > { %2095 = vmatpush1.bf16.msra.mxu1 %v9939_v27  ;;  %v2283_v27 = vpack.c.bf16 %v2282_v22, %v2282_v22  ;;  %v3180_v36 = vpack.c.bf16 %v3179_v19, %v3179_v19 }
  0x9b   : > { %7754 = vmatmul.mubr.msk.bf16.vlgmr.msra.gmra.mrb[24].mxu0 %vm399_vm1, %v1897_v7  ;;  %2347 = vmatprep.subr.bf16.mxu1 %v10165_v6  ;;  %v3055_v7 = vpack.c.bf16 %v3054_v5, %v3054_v5  ;;  %v9366_v5 = vld [vmem:[%s11924_s3 + $0x120] sm:$0xff]  }
  0x9c   : > { %2212 = vmatpush1.bf16.msra.mxu0 %v9630_v10  ;;  %2243 = vmatprep.mubr.bf16.mxu0 %v9705_v2 }
  0x9d   : > { %2213 = vmatprep.subr.bf16.mxu0 %v9631_v11  ;;  %7775 = vmatmul.mubr.msk.bf16.vlgmr.msra.gmra.mrb[24].mxu1 %vm399_vm1, %v2022_v9  ;;  %v457_v9 = vlaneseq }
  0x9e   : > { %2348 = vmatpush1.bf16.msra.mxu1 %v10173_v8  ;;  %2379 = vmatprep.mubr.bf16.mxu1 %v9705_v2 }
  0x9f   : > { %2349 = vmatprep.subr.bf16.mxu1 %v9632_v12  ;;  %v10403_v12 = vshrl.u32 %v457_v9, 7  ;;  %vm731_vm4 = vcmp.ge.s32.totalorder %v457_v9, 32  ;;  %vm732_vm5 = vcmp.lt.s32.totalorder %v457_v9, 288 }
  0xa0   : > { %2214 = vmatpush1.bf16.msra.mxu0 %v9633_v13  ;;  %vm10631_vm7 = vmand %vm731_vm4, %vm732_vm5 }
  0xa1   : > { %2215 = vmatprep.subr.bf16.mxu0 %v9634_v14  ;;  %v10515_v19 = vsub.s32 0, %v10403_v12 }
  0xa2   : > { %2350 = vmatpush1.bf16.msra.mxu1 %v9626_v63  ;;  %v7901_v63 = vcombine.low %v7892_v62, %v7892_v62 }
  0xa3   : > { %2351 = vmatprep.subr.bf16.mxu1 %v9635_v15 }
  0xa4   : > { %2216 = vmatpush1.bf16.msra.mxu0 %v9636_v16 }
  0xa5   : > { %2217 = vmatprep.subr.bf16.mxu0 %v9637_v17 }
  0xa6   : > { %2352 = vmatpush1.bf16.msra.mxu1 %v9628_v1  ;;  %v10376_v1 = vcombine.high %v7892_v62, %v7892_v62 }
  0xa7   : > { %2353 = vmatprep.subr.bf16.mxu1 %v9638_v20 }
  0xa8   : > { %2218 = vmatpush1.bf16.msra.mxu0 %v9994_v37  ;;  %v2532_v37 = vld [vmem:[%s9911_s25 + $0xc] sm:$0x1] }
  0xa9   : > { %7795 = vmatprep.subr.msk.bf16.mxu0 %vm403_vm0, %v9997_v39  ;;  %v2533_v43 = vpack.c.bf16 %v2532_v37, %v2532_v37  ;;  %v9338_v37 = vld [vmem:[%s11924_s3 + $0x48] sm:$0xff]  }
  0xaa   : > { %2354 = vmatpush1.bf16.msra.mxu1 %v9629_v3  ;;  %v10379_v3 = vsel %vm403_vm0, %v7901_v63, 0  ;;  %v9346_v63 = vld [vmem:[%s11924_s3 + $0x68] sm:$0xff]  }
  0xab   : > { %7807 = vmatprep.subr.msk.bf16.mxu1 %vm403_vm0, %v9906_v18  ;;  %v9639_v18 = vld [vmem:[%s11922_s1 + $0x94] ss:$8 sps:$4 sm:$0xff]  }
  0xac   : > { %2220 = vmatpush1.bf16.msra.mxu0 %v10003_v40 }
  0xad   : > { %2472 = vmatprep.subr.bf16.mxu0 %v10214_v21 }
  0xae   : > { %2356 = vmatpush1.bf16.msra.mxu1 %v9927_v24  ;;  %v7817_v24 = vld [vmem:[%s11922_s1 + $0x88] sm:$0xff] }
  0xaf   : > { %7796 = vmatmul.mubr.msk.bf16.vlgmr.msra.gmra.mrb[28].mxu0 %vm399_vm1, %v2147_v25  ;;  %2597 = vmatprep.subr.bf16.mxu1 %v9639_v18  ;;  %v7826_v32 = vcombine.low %v7817_v24, %v7817_v24  ;;  %v10276_v34 = vcombine.high %v7817_v24, %v7817_v24 }
  0xb0   : > { %2473 = vmatpush1.bf16.msra.mxu0 %v10223_v23  ;;  %2504 = vmatprep.mubr.bf16.mxu0 %v9705_v2 }
  0xb1   : > { %7808 = vmatmul.mubr.msk.bf16.vlgmr.msra.gmra.mrb[28].mxu1 %vm399_vm1, %v2283_v27  ;;  %2474 = vmatprep.subr.bf16.mxu0 %v10230_v26  ;;  %v10279_v35 = vsel %vm403_vm0, %v7826_v32, 0  ;;  %v9337_v32 = vld [vmem:[%s11924_s3] sm:$0xff]  }
  0xb2   : > { %2598 = vmatpush1.bf16.msra.mxu1 %v9630_v10  ;;  %2629 = vmatprep.mubr.bf16.mxu1 %v9705_v2  ;;  %v9707_v10 = vmov 1966171168  }
  0xb3   : > { %2599 = vmatprep.subr.bf16.mxu1 %v9631_v11  ;;  %v455_v11 = vunpack.c.l.s4 %v9707_v10  ;;  %v9347_v10 = vld [vmem:[%s11924_s3 + $0x28] sm:$0xff]  }
  0xb4   : > { %2475 = vmatpush1.bf16.msra.mxu0 %v10238_v28 }
  0xb5   : > { %2476 = vmatprep.subr.bf16.mxu0 %v10247_v29 }
  0xb6   : > { %2600 = vmatpush1.bf16.msra.mxu1 %v9633_v13  ;;  %v10409_v13 = vsub.s32 1, %v10403_v12 }
  0xb7   : > { %2601 = vmatprep.subr.bf16.mxu1 %v9634_v14  ;;  %v456_v14 = vunpack.c.0.s8 %v455_v11  ;;  %v9348_v11 = vld [vmem:[%s11924_s3 + $0x70] sm:$0xff]  }
  0xb8   : > { %2477 = vmatpush1.bf16.msra.mxu0 %v10259_v30 }
  0xb9   : > { %2478 = vmatprep.subr.bf16.mxu0 %v10265_v31 }
  0xba   : > { %2602 = vmatpush1.bf16.msra.mxu1 %v9636_v16 }
  0xbb   : > { %2603 = vmatprep.subr.bf16.mxu1 %v9637_v17  ;;  %v10417_v17 = vsub.s32 %v456_v14, %v10403_v12 }
  0xbc   : > { %2479 = vmatpush1.bf16.msra.mxu0 %v10272_v33 }
  0xbd   : > { %7828 = vmatprep.subr.msk.bf16.mxu0 %vm403_vm0, %v10276_v34 }
  0xbe   : > { %2604 = vmatpush1.bf16.msra.mxu1 %v9640_v38 }
  0xbf   : > { %7849 = vmatprep.subr.msk.bf16.mxu1 %vm403_vm0, %v9997_v39  ;;  %v9311_v39 = vld [vmem:[%s11922_s1 + $0x10] ss:$8 sps:$4 sm:$0xff]  }
  0xc0   : > { %2481 = vmatpush1.bf16.msra.mxu0 %v10279_v35 }
  0xc1   : > { %2733 = vmatprep.subr.bf16.mxu0 %v10165_v6 }
  0xc2   : > { %2606 = vmatpush1.bf16.msra.mxu1 %v10003_v40  ;;  %v9314_v40 = vld [vmem:[%s11922_s1 + $0x20] ss:$8 sps:$4 sm:$0xff]  }
  0xc3   : > { %7829 = vmatmul.mubr.msk.bf16.vlgmr.msra.gmra.mrb[32].mxu0 %vm399_vm1, %v2408_v41  ;;  %2858 = vmatprep.subr.bf16.mxu1 %v10214_v21 }
  0xc4   : > { %2734 = vmatpush1.bf16.msra.mxu0 %v10173_v8  ;;  %2765 = vmatprep.mubr.bf16.mxu0 %v9705_v2 }
  0xc5   : > { %7850 = vmatmul.mubr.msk.bf16.vlgmr.msra.gmra.mrb[32].mxu1 %vm399_vm1, %v2533_v43  ;;  %2735 = vmatprep.subr.bf16.mxu0 %v9313_v42 }
  0xc6   : > { %2859 = vmatpush1.bf16.msra.mxu1 %v10223_v23  ;;  %2890 = vmatprep.mubr.bf16.mxu1 %v9705_v2 }
  0xc7   : > { %2860 = vmatprep.subr.bf16.mxu1 %v10230_v26 }
  0xc8   : > { %2736 = vmatpush1.bf16.msra.mxu0 %v9311_v39 }
  0xc9   : > { %2737 = vmatprep.subr.bf16.mxu0 %v9316_v45 }
  0xca   : > { %2861 = vmatpush1.bf16.msra.mxu1 %v10238_v28 }
  0xcb   : > { %2862 = vmatprep.subr.bf16.mxu1 %v10247_v29 }
  0xcc   : > { %2738 = vmatpush1.bf16.msra.mxu0 %v9314_v40 }
  0xcd   : > { %2739 = vmatprep.subr.bf16.mxu0 %v9319_v47 }
  0xce   : > { %2863 = vmatpush1.bf16.msra.mxu1 %v10259_v30 }
  0xcf   : > { %2864 = vmatprep.subr.bf16.mxu1 %v10265_v31 }
  0xd0   : > { %2740 = vmatpush1.bf16.msra.mxu0 %v9317_v48 }
  0xd1   : > { %7861 = vmatprep.subr.msk.bf16.mxu0 %vm403_vm0, %v7860_v50 }
  0xd2   : > { %2865 = vmatpush1.bf16.msra.mxu1 %v10272_v33 }
  0xd3   : > { %7882 = vmatprep.subr.msk.bf16.mxu1 %vm403_vm0, %v10276_v34 }
  0xd4   : > { %2742 = vmatpush1.bf16.msra.mxu0 %v10324_v49 }
  0xd5   : > { %2983 = vmatprep.subr.bf16.mxu0 %v9324_v52 }
  0xd6   : > { %2867 = vmatpush1.bf16.msra.mxu1 %v10279_v35 }
  0xd7   : > { %7862 = vmatmul.mubr.msk.bf16.vlgmr.msra.gmra.mrb[36].mxu0 %vm399_vm1, %v2669_v55  ;;  %3119 = vmatprep.subr.bf16.mxu1 %v10165_v6  ;;  %v2919_v6 = vpack.c.bf16 %v2918_v4, %v2918_v4  ;;  %v9362_v55 = vld [vmem:[%s11924_s3 + $0x98] sm:$0xff]  }
  0xd8   : > { %2984 = vmatpush1.bf16.msra.mxu0 %v10338_v53  ;;  %3015 = vmatprep.mubr.bf16.mxu0 %v9705_v2 }
  0xd9   : > { %2985 = vmatprep.subr.bf16.mxu0 %v9327_v56  ;;  %7883 = vmatmul.mubr.msk.bf16.vlgmr.msra.gmra.mrb[36].mxu1 %vm399_vm1, %v2794_v57 }
  0xda   : > { %3120 = vmatpush1.bf16.msra.mxu1 %v10173_v8  ;;  %3151 = vmatprep.mubr.bf16.mxu1 %v9705_v2  ;;  %v9706_v8 = vmov 0.0  }
  0xdb   : > { %3121 = vmatprep.subr.bf16.mxu1 %v9313_v42  ;;  %331 = vst [vmem:[#allocation2] sm:$0xff] %v9706_v8  ;;  %332 = vst [vmem:[#allocation2 + $0x8] sm:$0xff] %v9706_v8  ;;  %v9353_v42 = vld [vmem:[%s11924_s3 + $0x80] sm:$0xff]  }
  0xdc   : > { %2986 = vmatpush1.bf16.msra.mxu0 %v9325_v58  ;;  %334 = vst.msk [vmem:[#allocation2 + $0x10] sm:$0xff] %vm333_vm2, %v9706_v8  ;;  %335 = vst [vmem:[#allocation2 + $0x18] sm:$0x3] %v9706_v8 }
  0xdd   : > { %2987 = vmatprep.subr.bf16.mxu0 %v9330_v59  ;;  %336 = vst [vmem:[#allocation2 + $0x20] sm:$0x3] %v9706_v8  ;;  %339 = vst [vmem:[#allocation3] sm:$0x3f] %v9706_v8 }
  0xde   : > { %3122 = vmatpush1.bf16.msra.mxu1 %v9311_v39  ;;  %341 = vst.msk [vmem:[#allocation3 + $0x8] sm:$0x3f] %vm340_vm8, %v9706_v8 }
  0xdf   : > { %3123 = vmatprep.subr.bf16.mxu1 %v9316_v45  ;;  %v9339_v45 = vld [vmem:[%s11924_s3 + $0x8] sm:$0xff]   ;;  %338 = vst.msk [vmem:[#allocation2 + $0x28] sm:$0x3] %vm337_vm9, %v9706_v8 }
  0xe0   : > { %2988 = vmatpush1.bf16.msra.mxu0 %v9328_v60 }
  0xe1   : > { %2989 = vmatprep.subr.bf16.mxu0 %v9333_v61 }
  0xe2   : > { %3124 = vmatpush1.bf16.msra.mxu1 %v9314_v40 }
  0xe3   : > { %3125 = vmatprep.subr.bf16.mxu1 %v9319_v47  ;;  %v10412_v15 = vld [vmem:[#allocation2] ss:$8 sm:$0x7] }
  0xe4   : > { %2990 = vmatpush1.bf16.msra.mxu0 %v10374_v0  ;;  %v3449_v27 = vrot.slane %v10412_v15, %v10409_v13  ;;  %v9341_v47 = vld [vmem:[%s11924_s3 + $0x10] sm:$0xff]  }
  0xe5   : > { %7903 = vmatprep.subr.msk.bf16.mxu0 %vm403_vm0, %v10376_v1 }
  0xe6   : > { %3126 = vmatpush1.bf16.msra.mxu1 %v9317_v48  ;;  %v3458_v41 = vpack.c.bf16 %v3449_v27, %v3449_v27  ;;  %v9342_v48 = vld [vmem:[%s11924_s3 + $0x58] sm:$0xff]  }
  0xe7   : > { %7915 = vmatprep.subr.msk.bf16.mxu1 %vm403_vm0, %v7860_v50  ;;  %v9359_v50 = vld [vmem:[%s11924_s3 + $0x90] sm:$0xff]   ;;  %v9375_v27 = vld [vmem:[%s11924_s3 + $0x138] sm:$0xff]  }
  0xe8   : > { %2992 = vmatpush1.bf16.msra.mxu0 %v10379_v3 }
  0xe9   : > { %3244 = vmatprep.subr.bf16.mxu0 %v10214_v21  ;;  %v9336_v21 = vld [vmem:[%s11924_s3 + $0x40] sm:$0xff]  }
  0xea   : > { %3128 = vmatpush1.bf16.msra.mxu1 %v10324_v49  ;;  %v10472_v49 = vsub.s32 2, %v10403_v12  ;;  %v9372_v12 = vld [vmem:[%s11924_s3 + $0x130] sm:$0xff]  }
  0xeb   : > { %7904 = vmatmul.mubr.msk.bf16.vlgmr.msra.gmra.mrb[40].mxu0 %vm399_vm1, %v2919_v6  ;;  %3369 = vmatprep.subr.bf16.mxu1 %v9324_v52  ;;  %v9344_v52 = vld [vmem:[%s11924_s3 + $0x60] sm:$0xff]  }
  0xec   : > { %3245 = vmatpush1.bf16.msra.mxu0 %v10223_v23  ;;  %3276 = vmatprep.mubr.bf16.mxu0 %v9705_v2 }
  0xed   : > { %3246 = vmatprep.subr.bf16.mxu0 %v10230_v26  ;;  %7916 = vmatmul.mubr.msk.bf16.vlgmr.msra.gmra.mrb[40].mxu1 %vm399_vm1, %v3055_v7  ;;  %v3304_v26 = vld [vmem:[%s9911_s25 + $0x10] sm:$0x1] }
  0xee   : > { %3370 = vmatpush1.bf16.msra.mxu1 %v10338_v53  ;;  %3401 = vmatprep.mubr.bf16.mxu1 %v9705_v2  ;;  %v3305_v43 = vpack.c.bf16 %v3304_v26, %v3304_v26  ;;  %v3453_v53 = vrot.slane %v10412_v15, %v10472_v49  ;;  %v9352_v26 = vld [vmem:[%s11924_s3 + $0xe0] sm:$0xff]  }
  0xef   : > { %3371 = vmatprep.subr.bf16.mxu1 %v9327_v56 }
  0xf0   : > { %3247 = vmatpush1.bf16.msra.mxu0 %v10238_v28 }
  0xf1   : > { %3248 = vmatprep.subr.bf16.mxu0 %v10247_v29  ;;  %v342_v29 = vld [vmem:[%s11923_s2] sm:$0x3] }
  0xf2   : > { %3372 = vmatpush1.bf16.msra.mxu1 %v9325_v58 }
  0xf3   : > { %3373 = vmatprep.subr.bf16.mxu1 %v9330_v59 }
  0xf4   : > { %3249 = vmatpush1.bf16.msra.mxu0 %v10259_v30 }
  0xf5   : > { %3250 = vmatprep.subr.bf16.mxu0 %v10265_v31 }
  0xf6   : > { %v444_v16 = vpop.f32.mrb[0].mxu0  ;;  %3374 = vmatpush1.bf16.msra.mxu1 %v9328_v60  ;;  %v570_v25 = vpop.f32.mrb[0].mxu1  ;;  %v9345_v60 = vld [vmem:[%s11924_s3 + $0x20] sm:$0xff]  }
  0xf7   : > { %v446_v20 = vpop.f32.mrb[1].mxu0  ;;  %3375 = vmatprep.subr.bf16.mxu1 %v9333_v61  ;;  %v572_v18 = vpop.f32.mrb[1].mxu1 }
  0xf8   : > { %v453_v22 = vcombine.low %v444_v16, %v446_v20  ;;  %v448_v23 = vpop.f32.mrb[2].mxu0  ;;  %3251 = vmatpush1.bf16.msra.mxu0 %v10272_v33  ;;  %v579_v30 = vcombine.low %v570_v25, %v572_v18  ;;  %v574_v31 = vpop.f32.mrb[2].mxu1  ;;  %v9369_v16 = vld [vmem:[%s11924_s3 + $0x128] sm:$0xff]   ;;  %v9351_v25 = vld [vmem:[%s11924_s3 + $0x38] sm:$0xff]   ;;  %v9354_v18 = vld [vmem:[%s11924_s3 + $0xa0] sm:$0xff]  }
  0xf9   : > { %v449_v28 = vpop.f32.mrb[3].mxu0  ;;  %7936 = vmatprep.subr.msk.bf16.mxu0 %vm403_vm0, %v10276_v34  ;;  %v575_v33 = vpop.f32.mrb[3].mxu1  ;;  %v3445_v23 = vrot.slane %v10412_v15, %v10515_v19 }
  0xfa   : > { %v460_v24 = vrot.slane %v453_v22, %v10417_v17  ;;  %3376 = vmatpush1.bf16.msra.mxu1 %v10374_v0  ;;  %v586_v38 = vrot.slane %v579_v30, %v10417_v17  ;;  %v3459_v0 = vpack.c.bf16 %v3453_v53, %v3453_v53  ;;  %v9350_v22 = vld [vmem:[%s11924_s3 + $0x78] sm:$0xff]  }
  0xfb   : > { %7957 = vmatprep.subr.msk.bf16.mxu1 %vm403_vm0, %v10376_v1  ;;  %v3457_v28 = vpack.c.bf16 %v3445_v23, %v3445_v23  ;;  %v9363_v53 = vld [vmem:[%s11924_s3 + $0xb8] sm:$0xff]  }
  0xfc   : > { %v467_v34 = vrot.slane %v460_v24, %v10417_v17  ;;  %3253 = vmatpush1.bf16.msra.mxu0 %v10279_v35  ;;  %v593_v44 = vrot.slane %v586_v38, %v10417_v17  ;;  %v9340_v35 = vld [vmem:[%s11924_s3 + $0x50] sm:$0xff]  }
  0xfd   : > { %8634 = vmatprep.subr.bf16.mxu0 %v9336_v21  ;;  %v9349_v21 = vld [vmem:[%s11924_s3 + $0x30] sm:$0xff]  }
  0xfe   : > { %v469_v39 = vadd.f32 %v467_v34, %v342_v29  ;;  %3378 = vmatpush1.bf16.msra.mxu1 %v10379_v3  ;;  %v9355_v29 = vld [vmem:[%s11924_s3 + $0xe8] sm:$0xff]   ;;  %v737_v34 = vld [vmem:[%s11923_s2] sm:$0x3] }
  0xff   : > { %7937 = vmatmul.mubr.msk.bf16.vlgmr.msra.gmra.mrb[44].mxu0 %vm399_vm1, %v3180_v36  ;;  %8968 = vmatprep.subr.bf16.mxu1 %v9706_v8 }
 0x100   : > { %v595_v40 = vadd.f32 %v593_v44, %v469_v39  ;;  %8635 = vmatpush3.bf16.msra.mxu0 %v9337_v32  ;;  %3655 = vmatprep.mubr.bf16.mxu0 %v3458_v41 }
 0x101   : > { %8636 = vmatprep.subr.bf16.mxu0 %v9338_v37  ;;  %7958 = vmatmul.mubr.msk.bf16.vlgmr.msra.gmra.mrb[44].mxu1 %vm399_vm1, %v3305_v43  ;;  %v9357_v37 = vld [vmem:[%s11924_s3 + $0xa8] sm:$0xff]  }
 0x102   : > { %8969 = vmatpush3.bf16.msra.mxu1 %v9353_v42  ;;  %8976 = vmatprep.mubr.msk.bf16.mxu1 %vm9708_vm3, %v9706_v8  ;;  %v9358_v42 = vld [vmem:[%s11924_s3 + $0xf0] sm:$0xff]  }
 0x103   : > { %8970 = vmatprep.subr.bf16.mxu1 %v9706_v8 }
 0x104   : > { %8637 = vmatpush3.bf16.msra.mxu0 %v9339_v45 }
 0x105   : > { %8638 = vmatprep.subr.bf16.mxu0 %v9340_v35 }
 0x106   : > { %8971 = vmatpush3.bf16.msra.mxu1 %v9356_v46 }
 0x107   : > { %8972 = vmatprep.subr.bf16.mxu1 %v9706_v8 }
 0x108   : > { %8639 = vmatpush3.bf16.msra.mxu0 %v9341_v47  ;;  %v9360_v47 = vld [vmem:[%s11924_s3 + $0xb0] sm:$0xff]  }
 0x109   : > { %8640 = vmatprep.subr.bf16.mxu0 %v9342_v48  ;;  %v9361_v48 = vld [vmem:[%s11924_s3 + $0xf8] sm:$0xff]  }
 0x10a   : > { %v696_v54 = vpop.f32.mrb[4].mxu0  ;;  %8973 = vmatpush3.bf16.msra.mxu1 %v9359_v50 }
 0x10b   : > { %v698_v56 = vpop.f32.mrb[5].mxu0  ;;  %8974 = vmatprep.subr.bf16.mxu1 %v9706_v8 }
 0x10c   : > { %v705_v57 = vcombine.low %v696_v54, %v698_v56  ;;  %v700_v58 = vpop.f32.mrb[6].mxu0  ;;  %v837_v59 = vpop.f32.mrb[4].mxu1  ;;  %8641 = vmatpush3.bf16.msra.mxu0 %v9343_v51  ;;  %v9364_v54 = vld [vmem:[%s11924_s3 + $0x100] sm:$0xff]  }
 0x10d   : > { %v701_v61 = vpop.f32.mrb[7].mxu0  ;;  %v839_v62 = vpop.f32.mrb[5].mxu1  ;;  %8642 = vmatprep.subr.bf16.mxu0 %v9344_v52  ;;  %v9365_v56 = vld [vmem:[%s11924_s3 + $0xc0] sm:$0xff]   ;;  %v9368_v58 = vld [vmem:[%s11924_s3 + $0xc8] sm:$0xff]  }
 0x10e   : > { %v712_v1 = vrot.slane %v705_v57, %v10417_v17  ;;  %v846_v3 = vcombine.low %v837_v59, %v839_v62  ;;  %v841_v4 = vpop.f32.mrb[6].mxu1  ;;  %8975 = vmatpush3.bf16.msra.mxu1 %v9362_v55  ;;  %v9367_v57 = vld [vmem:[%s11924_s3 + $0x108] sm:$0xff]   ;;  %v9370_v59 = vld [vmem:[%s11924_s3 + $0x110] sm:$0xff]  }
 0x10f   : > { %v842_v6 = vpop.f32.mrb[7].mxu1  ;;  %8980 = vmatprep.subr.bf16.mxu1 %v9706_v8 }
 0x110   : > { %v719_v7 = vrot.slane %v712_v1, %v10417_v17  ;;  %8643 = vmatpush3.bf16.msra.mxu0 %v9345_v60  ;;  %v853_v15 = vrot.slane %v846_v3, %v10417_v17  ;;  %v9371_v1 = vld [vmem:[%s11924_s3 + $0xd0] sm:$0xff]  }
 0x111   : > { %8644 = vmatprep.subr.bf16.mxu0 %v9346_v63  ;;  %8977 = vmatmul.mubr.msk.bf16.vlgmr.msra.gmra.mrb[48].mxu1 %vm333_vm2, %v3459_v0 }
 0x112   : > { %v721_v14 = vadd.f32 %v719_v7, %v595_v40  ;;  %8981 = vmatpush3.bf16.msra.mxu1 %v9366_v5  ;;  %8988 = vmatprep.mubr.msk.bf16.mxu1 %vm9708_vm3, %v9706_v8  ;;  %v860_v31 = vrot.slane %v853_v15, %v10417_v17  ;;  %v9373_v5 = vld [vmem:[%s11924_s3 + $0x118] sm:$0xff]  }
 0x113   : > { %8982 = vmatprep.subr.bf16.mxu1 %v9706_v8 }
 0x114   : > { %v722_v20 = vmax.f32 %v721_v14, 0.0  ;;  %8645 = vmatpush3.bf16.msra.mxu0 %v9347_v10  ;;  %v862_v35 = vadd.f32 %v860_v31, %v737_v34  ;;  %v1123_v14 = vld [vmem:[%s11923_s2] sm:$0x3] }
 0x115   : > { %8646 = vmatprep.subr.bf16.mxu0 %v9348_v11 }
 0x116   : > { %724 = vrot.lane.b32.xlu0 %v722_v20, %s9709_s23  ;;  %8983 = vmatpush3.bf16.msra.mxu1 %v9369_v16 }
 0x117   : > { %8984 = vmatprep.subr.bf16.mxu1 %v9706_v8 }
 0x118   : > { %8647 = vmatpush3.bf16.msra.mxu0 %v9349_v21  ;;  %v9374_v21 = vld [vmem:[%s11924_s3 + $0xd8] sm:$0xff]  }
 0x119   : > { %8648 = vmatprep.subr.bf16.mxu0 %v9350_v22  ;;  %v9376_v22 = vld [vmem:[%s11924_s3 + $0x180] sm:$0xff]  }
 0x11a   : > { %8985 = vmatpush3.bf16.msra.mxu1 %v9372_v12 }
 0x11b   : > { %8986 = vmatprep.subr.bf16.mxu1 %v9706_v8 }
 0x11c   : > { %8649 = vmatpush3.bf16.msra.mxu0 %v9351_v25 }
 0x11d   : > { %8661 = vmatprep.subr.bf16.mxu0 %v9352_v26 }
 0x11e   : > { %v962_v24 = vpop.f32.mrb[8].mxu0  ;;  %8987 = vmatpush3.bf16.msra.mxu1 %v9375_v27 }
 0x11f   : > { %v964_v30 = vpop.f32.mrb[9].mxu0  ;;  %3656 = vmatmul.mubr.bf16.vlgmr.msra.gmra.mrb[48].mxu0 %v3457_v28  ;;  %8992 = vmatprep.subr.bf16.mxu1 %v9706_v8 }
 0x120   : > { %v971_v32 = vcombine.low %v962_v24, %v964_v30  ;;  %v966_v33 = vpop.f32.mrb[10].mxu0  ;;  %v1087_v36 = vpop.f32.mrb[8].mxu1  ;;  %8662 = vmatpush3.bf16.msra.mxu0 %v9354_v18 }
 0x121   : > { %v967_v38 = vpop.f32.mrb[11].mxu0  ;;  %v1089_v41 = vpop.f32.mrb[9].mxu1  ;;  %8663 = vmatprep.subr.bf16.mxu0 %v9355_v29 }
 0x122   : > { %v978_v43 = vrot.slane %v971_v32, %v10417_v17  ;;  %v1096_v44 = vcombine.low %v1087_v36, %v1089_v41  ;;  %v1091_v39 = vpop.f32.mrb[10].mxu1 }
 0x123   : > { %v1092_v45 = vpop.f32.mrb[11].mxu1 }
 0x124   : > { %v985_v40 = vrot.slane %v978_v43, %v10417_v17  ;;  %v1103_v46 = vrot.slane %v1096_v44, %v10417_v17  ;;  %8664 = vmatpush3.bf16.msra.mxu0 %v9357_v37 }
 0x125   : > { %8665 = vmatprep.subr.bf16.mxu0 %v9358_v42 }
 0x126   : > { %v1110_v50 = vrot.slane %v1103_v46, %v10417_v17  ;;  %v987_v51 = vadd.f32 %v985_v40, %v862_v35  ;;  %v1509_v35 = vld [vmem:[%s11923_s2] sm:$0x3] }
 0x128   : > { %v1112_v52 = vadd.f32 %v1110_v50, %v987_v51  ;;  %8666 = vmatpush3.bf16.msra.mxu0 %v9360_v47 }
 0x129   : > { %8667 = vmatprep.subr.bf16.mxu0 %v9361_v48 }
 0x12a   : > { %v1113_v55 = vmax.f32 %v1112_v52, 0.0 }
 0x12c   : > { %1115 = vrot.lane.b32.xlu0 %v1113_v55, %s9709_s23  ;;  %8668 = vmatpush3.bf16.msra.mxu0 %v9363_v53 }
 0x12d   : > { %8669 = vmatprep.subr.bf16.mxu0 %v9364_v54 }
 0x130   : > { %8670 = vmatpush3.bf16.msra.mxu0 %v9365_v56 }
 0x131   : > { %8671 = vmatprep.subr.bf16.mxu0 %v9367_v57 }
 0x132   : > { %v1223_v60 = vpop.f32.mrb[12].mxu0 }
 0x133   : > { %v1225_v61 = vpop.f32.mrb[13].mxu0 }
 0x134   : > { %v1232_v62 = vcombine.low %v1223_v60, %v1225_v61  ;;  %v1227_v63 = vpop.f32.mrb[14].mxu0  ;;  %v1348_v0 = vpop.f32.mrb[12].mxu1  ;;  %8672 = vmatpush3.bf16.msra.mxu0 %v9368_v58 }
 0x135   : > { %v1228_v3 = vpop.f32.mrb[15].mxu0  ;;  %v1350_v4 = vpop.f32.mrb[13].mxu1  ;;  %8673 = vmatprep.subr.bf16.mxu0 %v9370_v59 }
 0x136   : > { %v1239_v6 = vrot.slane %v1232_v62, %v10417_v17  ;;  %v1357_v7 = vcombine.low %v1348_v0, %v1350_v4  ;;  %v1352_v10 = vpop.f32.mrb[14].mxu1 }
 0x137   : > { %v1353_v11 = vpop.f32.mrb[15].mxu1 }
 0x138   : > { %v1246_v16 = vrot.slane %v1239_v6, %v10417_v17  ;;  %v1364_v20 = vrot.slane %v1357_v7, %v10417_v17  ;;  %8674 = vmatpush3.bf16.msra.mxu0 %v9371_v1  ;;  %v1895_v6 = vld [vmem:[%s11923_s2] sm:$0x3] }
 0x139   : > { %8675 = vmatprep.subr.bf16.mxu0 %v9373_v5 }
 0x13a   : > { %v1371_v12 = vrot.slane %v1364_v20, %v10417_v17  ;;  %v1248_v23 = vadd.f32 %v1246_v16, %v1123_v14 }
 0x13c   : > { %v1373_v25 = vadd.f32 %v1371_v12, %v1248_v23  ;;  %8676 = vmatpush3.bf16.msra.mxu0 %v9374_v21 }
 0x13d   : > { %8688 = vmatprep.subr.bf16.mxu0 %v9376_v22 }
 0x146   : > { %v1473_v26 = vpop.f32.mrb[16].mxu0 }
 0x147   : > { %v1475_v27 = vpop.f32.mrb[17].mxu0 }
 0x148   : > { %v1482_v28 = vcombine.low %v1473_v26, %v1475_v27  ;;  %v1477_v15 = vpop.f32.mrb[18].mxu0  ;;  %v1609_v18 = vpop.f32.mrb[16].mxu1 }
 0x149   : > { %v1478_v29 = vpop.f32.mrb[19].mxu0  ;;  %v1611_v24 = vpop.f32.mrb[17].mxu1 }
 0x14a   : > { %v1489_v30 = vrot.slane %v1482_v28, %v10417_v17  ;;  %v1618_v31 = vcombine.low %v1609_v18, %v1611_v24  ;;  %v1613_v32 = vpop.f32.mrb[18].mxu1 }
 0x14b   : > { %v1614_v33 = vpop.f32.mrb[19].mxu1 }
 0x14c   : > { %v1496_v36 = vrot.slane %v1489_v30, %v10417_v17  ;;  %v1625_v38 = vrot.slane %v1618_v31, %v10417_v17  ;;  %v11625_v31 = vld [vmem:[%s11926_s5 + $0xc8] sm:$0xff]  }
 0x14e   : > { %v1498_v37 = vadd.f32 %v1496_v36, %v1373_v25  ;;  %v1632_v43 = vrot.slane %v1625_v38, %v10417_v17 }
 0x150   : > { %v1499_v34 = vmax.f32 %v1498_v37, 0.0  ;;  %v1634_v52 = vadd.f32 %v1632_v43, %v1509_v35  ;;  %v9380_v43 = vld [vmem:[%s11924_s3 + $0x1c0] sm:$0xff]  }
 0x151   : > { %v9377_v35 = vld [vmem:[%s11924_s3 + $0x140] sm:$0xff]  }
 0x152   : > { %1501 = vrot.lane.b32.xlu1 %v1499_v34, %s9709_s23 }
 0x15a   : > { %v1734_v41 = vpop.f32.mrb[20].mxu0 }
 0x15b   : > { %v1736_v42 = vpop.f32.mrb[21].mxu0 }
 0x15c   : > { %v1743_v44 = vcombine.low %v1734_v41, %v1736_v42  ;;  %v1859_v39 = vpop.f32.mrb[20].mxu1  ;;  %v1738_v45 = vpop.f32.mrb[22].mxu0 }
 0x15d   : > { %v1861_v40 = vpop.f32.mrb[21].mxu1  ;;  %v1739_v46 = vpop.f32.mrb[23].mxu0 }
 0x15e   : > { %v1750_v47 = vrot.slane %v1743_v44, %v10417_v17  ;;  %v1868_v48 = vcombine.low %v1859_v39, %v1861_v40  ;;  %v1863_v50 = vpop.f32.mrb[22].mxu1 }
 0x15f   : > { %v1864_v51 = vpop.f32.mrb[23].mxu1 }
 0x160   : > { %v1757_v53 = vrot.slane %v1750_v47, %v10417_v17  ;;  %v1875_v54 = vrot.slane %v1868_v48, %v10417_v17  ;;  %v9378_v47 = vld [vmem:[%s11924_s3 + $0x188] sm:$0xff]   ;;  %v2281_v48 = vld [vmem:[%s11923_s2] sm:$0x3] }
 0x162   : > { %v1882_v55 = vrot.slane %v1875_v54, %v10417_v17  ;;  %v1759_v56 = vadd.f32 %v1757_v53, %v1634_v52  ;;  %v9383_v54 = vld [vmem:[%s11924_s3 + $0x1c8] sm:$0xff]  }
 0x164   : > { %v1884_v57 = vadd.f32 %v1882_v55, %v1759_v56 }
 0x166   : > { %v1885_v58 = vmax.f32 %v1884_v57, 0.0  ;;  %v9379_v57 = vld [vmem:[%s11924_s3 + $0x148] sm:$0xff]  }
 0x168   : > { %1887 = vrot.lane.b32.xlu1 %v1885_v58, %s9709_s23 }
 0x16e   : > { %v1995_v59 = vpop.f32.mrb[24].mxu0 }
 0x16f   : > { %v1997_v60 = vpop.f32.mrb[25].mxu0 }
 0x170   : > { %v2004_v61 = vcombine.low %v1995_v59, %v1997_v60  ;;  %v1999_v62 = vpop.f32.mrb[26].mxu0  ;;  %v2120_v63 = vpop.f32.mrb[24].mxu1 }
 0x171   : > { %v2000_v0 = vpop.f32.mrb[27].mxu0  ;;  %v2122_v1 = vpop.f32.mrb[25].mxu1  ;;  %v9381_v62 = vld [vmem:[%s11924_s3 + $0x190] sm:$0xff]  }
 0x172   : > { %v2011_v3 = vrot.slane %v2004_v61, %v10417_v17  ;;  %v2129_v4 = vcombine.low %v2120_v63, %v2122_v1  ;;  %v2124_v5 = vpop.f32.mrb[26].mxu1 }
 0x173   : > { %v2125_v7 = vpop.f32.mrb[27].mxu1  ;;  %v9382_v5 = vld [vmem:[%s11924_s3 + $0x150] sm:$0xff]  }
 0x174   : > { %v2018_v10 = vrot.slane %v2011_v3, %v10417_v17  ;;  %v2136_v11 = vrot.slane %v2129_v4, %v10417_v17  ;;  %v9386_v3 = vld [vmem:[%s11924_s3 + $0x1d0] sm:$0xff]  }
 0x176   : > { %v2020_v14 = vadd.f32 %v2018_v10, %v1895_v6  ;;  %v2143_v16 = vrot.slane %v2136_v11, %v10417_v17  ;;  %v9384_v11 = vld [vmem:[%s11924_s3 + $0x198] sm:$0xff]  }
 0x178   : > { %v2145_v20 = vadd.f32 %v2143_v16, %v2020_v14 }
 0x182   : > { %v2245_v21 = vpop.f32.mrb[28].mxu0 }
 0x183   : > { %v2247_v22 = vpop.f32.mrb[29].mxu0 }
 0x184   : > { %v2254_v12 = vcombine.low %v2245_v21, %v2247_v22  ;;  %v2249_v23 = vpop.f32.mrb[30].mxu0  ;;  %v2381_v25 = vpop.f32.mrb[28].mxu1  ;;  %v9385_v21 = vld [vmem:[%s11924_s3 + $0x158] sm:$0xff]  }
 0x185   : > { %v2250_v26 = vpop.f32.mrb[31].mxu0  ;;  %v2383_v27 = vpop.f32.mrb[29].mxu1  ;;  %v9388_v23 = vld [vmem:[%s11924_s3 + $0x160] sm:$0xff]  }
 0x186   : > { %v2261_v28 = vrot.slane %v2254_v12, %v10417_v17  ;;  %v2390_v15 = vcombine.low %v2381_v25, %v2383_v27  ;;  %v2385_v18 = vpop.f32.mrb[30].mxu1  ;;  %v9387_v12 = vld [vmem:[%s11924_s3 + $0x1a0] sm:$0xff]   ;;  %v9390_v25 = vld [vmem:[%s11924_s3 + $0x1a8] sm:$0xff]  }
 0x187   : > { %v2386_v29 = vpop.f32.mrb[31].mxu1  ;;  %v9391_v27 = vld [vmem:[%s11924_s3 + $0x168] sm:$0xff]  }
 0x188   : > { %v725_v24 = vpop.permute.xlu0 %724  ;;  %v2268_v30 = vrot.slane %v2261_v28, %v10417_v17  ;;  %v2397_v37 = vrot.slane %v2390_v15, %v10417_v17  ;;  %v9393_v29 = vld [vmem:[%s11924_s3 + $0x1b0] sm:$0xff]  }
 0x189   : > { %v726_v32 = vrot.slane %v725_v24, 7 }
 0x18a   : > { %v2270_v33 = vadd.f32 %v2268_v30, %v2145_v20  ;;  %v2404_v40 = vrot.slane %v2397_v37, %v10417_v17  ;;  %v9389_v20 = vld [vmem:[%s11924_s3 + $0x1d8] sm:$0xff]  }
 0x18b   : > { %v728_v36 = vsel %vm727_vm6, %v726_v32, %v725_v24 }
 0x18c   : > { %735 = vst.msk [vmem:[#allocation2 + $0x1] ss:$8 sm:$0x7] %vm10631_vm7, %v728_v36  ;;  %v2271_v9 = vmax.f32 %v2270_v33, 0.0  ;;  %v2406_v58 = vadd.f32 %v2404_v40, %v2281_v48  ;;  %v9392_v33 = vld [vmem:[%s11924_s3 + $0x80] sm:$0xff]  }
 0x18d   : > { %v2667_v40 = vld [vmem:[%s11923_s2] sm:$0x3] }
 0x18e   : > { %2273 = vrot.lane.b32.xlu0 %v2271_v9, %s9709_s23 }
 0x193   : > { %v3704_v34 = vld [vmem:[#allocation2 + $0x1] ss:$8 sm:$0x7] }
 0x194   : > { %v3713_v38 = vrot.slane %v3704_v34, %v10409_v13  ;;  %v3717_v41 = vrot.slane %v3704_v34, %v10472_v49  ;;  %v3709_v42 = vrot.slane %v3704_v34, %v10515_v19 }
 0x196   : > { %v3722_v44 = vpack.c.bf16 %v3713_v38, %v3713_v38  ;;  %v3723_v39 = vpack.c.bf16 %v3717_v41, %v3717_v41  ;;  %v3721_v45 = vpack.c.bf16 %v3709_v42, %v3709_v42  ;;  %v2506_v46 = vpop.f32.mrb[32].mxu0  ;;  %v9394_v41 = vld [vmem:[%s11924_s3 + $0x170] sm:$0xff]  }
 0x197   : > { %v2508_v50 = vpop.f32.mrb[33].mxu0 }
 0x198   : > { %3920 = vmatprep.mubr.bf16.mxu0 %v3722_v44  ;;  %8989 = vmatmul.mubr.msk.bf16.vlgmr.msra.gmra.mrb[48].mxu1 %vm333_vm2, %v3723_v39  ;;  %v2515_v51 = vcombine.low %v2506_v46, %v2508_v50  ;;  %v2631_v52 = vpop.f32.mrb[32].mxu1  ;;  %v2510_v53 = vpop.f32.mrb[34].mxu0  ;;  %v9396_v44 = vld [vmem:[%s11924_s3 + $0x1b8] sm:$0xff]  }
 0x199   : > { %3921 = vmatmul.mubr.bf16.vlgmr.msra.gmra.mrb[52].mxu0 %v3721_v45  ;;  %8993 = vmatpush3.bf16.msra.mxu1 %v9380_v43  ;;  %v2633_v55 = vpop.f32.mrb[33].mxu1  ;;  %v2511_v56 = vpop.f32.mrb[35].mxu0  ;;  %v9397_v50 = vld [vmem:[%s11924_s3 + $0x178] sm:$0xff]   ;;  %v9399_v53 = vld [vmem:[%s11924_s3 + $0x40] sm:$0xff]  }
 0x19a   : > { %8689 = vmatpush3.bf16.msra.mxu0 %v9377_v35  ;;  %8994 = vmatprep.subr.bf16.mxu1 %v9706_v8  ;;  %v2522_v59 = vrot.slane %v2515_v51, %v10417_v17  ;;  %v2640_v60 = vcombine.low %v2631_v52, %v2633_v55  ;;  %v2635_v61 = vpop.f32.mrb[34].mxu1  ;;  %v9395_v35 = vld [vmem:[%s11924_s3 + $0x88] sm:$0xff]   ;;  %v9398_v55 = vld [vmem:[%s11924_s3 + $0x90] sm:$0xff]  }
 0x19b   : > { %8690 = vmatprep.subr.bf16.mxu0 %v9378_v47  ;;  %9000 = vmatprep.mubr.msk.bf16.mxu1 %vm9708_vm3, %v9706_v8  ;;  %v2636_v63 = vpop.f32.mrb[35].mxu1 }
 0x19c   : > { %v2529_v0 = vrot.slane %v2522_v59, %v10417_v17  ;;  %v2647_v1 = vrot.slane %v2640_v60, %v10417_v17  ;;  %v9402_v60 = vld [vmem:[%s11924_s3 + $0x48] sm:$0xff]  }
 0x19d   : > { %8995 = vmatpush3.bf16.msra.mxu1 %v9383_v54 }
 0x19e   : > { %8691 = vmatpush3.bf16.msra.mxu0 %v9379_v57  ;;  %v1116_v4 = vpop.permute.xlu0 %1115  ;;  %8996 = vmatprep.subr.bf16.mxu1 %v9706_v8  ;;  %v2654_v6 = vrot.slane %v2647_v1, %v10417_v17  ;;  %v2531_v7 = vadd.f32 %v2529_v0, %v2406_v58  ;;  %v9400_v58 = vld [vmem:[%s11924_s3] sm:$0xff]   ;;  %v9403_v0 = vld [vmem:[%s11924_s3 + $0x8] sm:$0xff]   ;;  %v9404_v1 = vld [vmem:[%s11924_s3 + $0x50] sm:$0xff]  }
 0x19f   : > { %v1117_v10 = vrot.slane %v1116_v4, 7  ;;  %8692 = vmatprep.subr.bf16.mxu0 %v9381_v62  ;;  %v9401_v62 = vld [vmem:[%s11924_s3 + $0x98] sm:$0xff]  }
 0x1a0   : > { %v2656_v14 = vadd.f32 %v2654_v6, %v2531_v7  ;;  %v9406_v7 = vld [vmem:[%s11924_s3 + $0x58] sm:$0xff]  }
 0x1a1   : > { %v1118_v16 = vsel %vm727_vm6, %v1117_v10, %v1116_v4  ;;  %8997 = vmatpush3.bf16.msra.mxu1 %v9386_v3  ;;  %v9407_v3 = vld [vmem:[%s11924_s3 + $0x120] sm:$0xff]  }
 0x1a2   : > { %1121 = vst.msk [vmem:[#allocation2 + $0x2] ss:$8 sm:$0x7] %vm10631_vm7, %v1118_v16  ;;  %8693 = vmatpush3.bf16.msra.mxu0 %v9382_v5  ;;  %8998 = vmatprep.subr.bf16.mxu1 %v9706_v8  ;;  %v2657_v22 = vmax.f32 %v2656_v14, 0.0  ;;  %v9405_v5 = vld [vmem:[%s11924_s3 + $0x10] sm:$0xff]  }
 0x1a3   : > { %8694 = vmatprep.subr.bf16.mxu0 %v9384_v11  ;;  %v9410_v11 = vld [vmem:[%s11924_s3 + $0x128] sm:$0xff]  }
 0x1a4   : > { %2659 = vrot.lane.b32.xlu1 %v2657_v22, %s9709_s23 }
 0x1a5   : > { %8999 = vmatpush3.bf16.msra.mxu1 %v9389_v20 }
 0x1a6   : > { %8695 = vmatpush3.bf16.msra.mxu0 %v9385_v21  ;;  %9004 = vmatprep.subr.bf16.mxu1 %v9706_v8 }
 0x1a7   : > { %8696 = vmatprep.subr.bf16.mxu0 %v9387_v12  ;;  %v9408_v12 = vld [vmem:[%s11924_s3 + $0x18] sm:$0xff]  }
 0x1a9   : > { %v3969_v26 = vld [vmem:[#allocation2 + $0x2] ss:$8 sm:$0x7] }
 0x1aa   : > { %8697 = vmatpush3.bf16.msra.mxu0 %v9388_v23  ;;  %v3978_v28 = vrot.slane %v3969_v26, %v10409_v13  ;;  %v3982_v15 = vrot.slane %v3969_v26, %v10472_v49  ;;  %v2767_v18 = vpop.f32.mrb[36].mxu0  ;;  %v10733_v47 = vld [vmem:[#allocation2 + $0x2] ss:$8 sm:$0x7]  ;;  %v3974_v52 = vrot.slane %v3969_v26, %v10515_v19 }
 0x1ab   : > { %8698 = vmatprep.subr.bf16.mxu0 %v9390_v25  ;;  %v2769_v24 = vpop.f32.mrb[37].mxu0  ;;  %v4257_v56 = vrot.slane %v10733_v47, %v10409_v13  ;;  %v4261_v63 = vrot.slane %v10733_v47, %v10472_v49 }
 0x1ac   : > { %v3987_v30 = vpack.c.bf16 %v3978_v28, %v3978_v28  ;;  %v3988_v32 = vpack.c.bf16 %v3982_v15, %v3982_v15  ;;  %v2771_v36 = vpop.f32.mrb[38].mxu0  ;;  %v2892_v9 = vpop.f32.mrb[36].mxu1  ;;  %v2776_v37 = vcombine.low %v2767_v18, %v2769_v24  ;;  %v3986_v59 = vpack.c.bf16 %v3974_v52, %v3974_v52  ;;  %v9413_v18 = vld [vmem:[%s11924_s3 + $0x130] sm:$0xff]  }
 0x1ad   : > { %v2772_v34 = vpop.f32.mrb[39].mxu0  ;;  %v2894_v38 = vpop.f32.mrb[37].mxu1  ;;  %v4266_v61 = vpack.c.bf16 %v4257_v56, %v4257_v56  ;;  %v4267_v4 = vpack.c.bf16 %v4261_v63, %v4261_v63  ;;  %v9412_v36 = vld [vmem:[%s11924_s3 + $0x68] sm:$0xff]   ;;  %v4253_v52 = vrot.slane %v10733_v47, %v10515_v19 }
 0x1ae   : > { %8699 = vmatpush3.bf16.msra.mxu0 %v9391_v27  ;;  %4185 = vmatprep.mubr.bf16.mxu0 %v3987_v30  ;;  %v2901_v42 = vcombine.low %v2892_v9, %v2894_v38  ;;  %v2896_v43 = vpop.f32.mrb[38].mxu1  ;;  %v2783_v39 = vrot.slane %v2776_v37, %v10417_v17  ;;  %v9409_v27 = vld [vmem:[%s11924_s3 + $0x60] sm:$0xff]   ;;  %v9416_v9 = vld [vmem:[%s11924_s3 + $0x138] sm:$0xff]   ;;  %v9414_v38 = vld [vmem:[%s11924_s3 + $0x28] sm:$0xff]  }
 0x1af   : > { %9001 = vmatmul.mubr.msk.bf16.vlgmr.msra.gmra.mrb[48].mxu1 %vm333_vm2, %v3988_v32  ;;  %8700 = vmatprep.subr.bf16.mxu0 %v9393_v29  ;;  %v2897_v45 = vpop.f32.mrb[39].mxu1  ;;  %v9411_v30 = vld [vmem:[%s11924_s3 + $0x20] sm:$0xff]   ;;  %v9424_v47 = vld [vmem:[%s11924_s3 + $0x148] sm:$0xff]  }
 0x1b0   : > { %9005 = vmatpush3.bf16.msra.mxu1 %v9392_v33  ;;  %9012 = vmatprep.mubr.msk.bf16.mxu1 %vm9708_vm3, %v9706_v8  ;;  %v2908_v46 = vrot.slane %v2901_v42, %v10417_v17  ;;  %v2790_v48 = vrot.slane %v2783_v39, %v10417_v17  ;;  %v9418_v34 = vld [vmem:[%s11924_s3 + $0x180] sm:$0xff]   ;;  %v9417_v42 = vld [vmem:[%s11924_s3 + $0x30] sm:$0xff]  }
 0x1b1   : > { %9006 = vmatprep.subr.bf16.mxu1 %v9706_v8 }
 0x1b2   : > { %8701 = vmatpush3.bf16.msra.mxu0 %v9394_v41  ;;  %v2915_v51 = vrot.slane %v2908_v46, %v10417_v17  ;;  %v2792_v54 = vadd.f32 %v2790_v48, %v2667_v40  ;;  %v9415_v41 = vld [vmem:[%s11924_s3 + $0x70] sm:$0xff]   ;;  %v9421_v46 = vld [vmem:[%s11924_s3 + $0x38] sm:$0xff]   ;;  %v9422_v48 = vld [vmem:[%s11924_s3 + $0x188] sm:$0xff]  }
 0x1b3   : > { %8702 = vmatprep.subr.bf16.mxu0 %v9396_v44  ;;  %v9419_v44 = vld [vmem:[%s11924_s3 + $0x78] sm:$0xff]  }
 0x1b4   : > { %9007 = vmatpush3.bf16.msra.mxu1 %v9395_v35  ;;  %v2917_v57 = vadd.f32 %v2915_v51, %v2792_v54  ;;  %v9420_v35 = vld [vmem:[%s11924_s3 + $0x140] sm:$0xff]  }
 0x1b5   : > { %9008 = vmatprep.subr.bf16.mxu1 %v9706_v8  ;;  %v3053_v54 = vld [vmem:[%s11923_s2] sm:$0x3] }
 0x1b6   : > { %8703 = vmatpush3.bf16.msra.mxu0 %v9397_v50 }
 0x1b7   : > { %8715 = vmatprep.subr.bf16.mxu0 %v9399_v53  ;;  %v9423_v53 = vld [vmem:[%s11924_s3 + $0xe0] sm:$0xff]  }
 0x1b8   : > { %9009 = vmatpush3.bf16.msra.mxu1 %v9398_v55 }
 0x1b9   : > { %4186 = vmatmul.mubr.bf16.vlgmr.msra.gmra.mrb[56].mxu0 %v3986_v59  ;;  %9010 = vmatprep.subr.bf16.mxu1 %v9706_v8 }
 0x1ba   : > { %8716 = vmatpush3.bf16.msra.mxu0 %v9400_v58  ;;  %4463 = vmatprep.mubr.bf16.mxu0 %v4266_v61 }
 0x1bb   : > { %8717 = vmatprep.subr.bf16.mxu0 %v9402_v60 }
 0x1bc   : > { %9011 = vmatpush3.bf16.msra.mxu1 %v9401_v62  ;;  %v9425_v62 = vld [vmem:[%s11924_s3 + $0xa0] sm:$0xff]  }
 0x1bd   : > { %9016 = vmatprep.subr.bf16.mxu1 %v9706_v8 }
 0x1be   : > { %8718 = vmatpush3.bf16.msra.mxu0 %v9403_v0  ;;  %v3017_v6 = vpop.f32.mrb[40].mxu0 }
 0x1bf   : > { %9013 = vmatmul.mubr.msk.bf16.vlgmr.msra.gmra.mrb[52].mxu1 %vm333_vm2, %v4267_v4  ;;  %8719 = vmatprep.subr.bf16.mxu0 %v9404_v1  ;;  %v3019_v10 = vpop.f32.mrb[41].mxu0  ;;  %v4265_v4 = vpack.c.bf16 %v4253_v52, %v4253_v52 }
 0x1c0   : > { %9017 = vmatpush3.bf16.msra.mxu1 %v9407_v3  ;;  %9024 = vmatprep.mubr.msk.bf16.mxu1 %vm9708_vm3, %v9706_v8  ;;  %v3026_v14 = vcombine.low %v3017_v6, %v3019_v10  ;;  %v3021_v16 = vpop.f32.mrb[42].mxu0  ;;  %v3153_v20 = vpop.f32.mrb[40].mxu1  ;;  %v9427_v6 = vld [vmem:[%s11924_s3 + $0xe8] sm:$0xff]  }
 0x1c1   : > { %9018 = vmatprep.subr.bf16.mxu1 %v9706_v8  ;;  %v3022_v21 = vpop.f32.mrb[43].mxu0  ;;  %v3155_v22 = vpop.f32.mrb[41].mxu1  ;;  %v9428_v16 = vld [vmem:[%s11924_s3 + $0x150] sm:$0xff]  }
 0x1c2   : > { %8720 = vmatpush3.bf16.msra.mxu0 %v9405_v5  ;;  %v3033_v23 = vrot.slane %v3026_v14, %v10417_v17  ;;  %v3162_v25 = vcombine.low %v3153_v20, %v3155_v22  ;;  %v3157_v26 = vpop.f32.mrb[42].mxu1  ;;  %v9426_v5 = vld [vmem:[%s11924_s3 + $0x190] sm:$0xff]   ;;  %v9429_v21 = vld [vmem:[%s11924_s3 + $0xa8] sm:$0xff]   ;;  %v9430_v22 = vld [vmem:[%s11924_s3 + $0x198] sm:$0xff]  }
 0x1c3   : > { %8721 = vmatprep.subr.bf16.mxu0 %v9406_v7  ;;  %v3158_v28 = vpop.f32.mrb[43].mxu1  ;;  %v9431_v26 = vld [vmem:[%s11924_s3 + $0xf0] sm:$0xff]  }
 0x1c4   : > { %v1502_v15 = vpop.permute.xlu1 %1501  ;;  %9019 = vmatpush3.bf16.msra.mxu1 %v9410_v11  ;;  %v3040_v29 = vrot.slane %v3033_v23, %v10417_v17  ;;  %v3169_v43 = vrot.slane %v3162_v25, %v10417_v17 }
 0x1c5   : > { %v1503_v24 = vrot.slane %v1502_v15, 7  ;;  %9020 = vmatprep.subr.bf16.mxu1 %v9706_v8 }
 0x1c6   : > { %8722 = vmatpush3.bf16.msra.mxu0 %v9408_v12  ;;  %v3042_v32 = vadd.f32 %v3040_v29, %v2917_v57  ;;  %v3176_v51 = vrot.slane %v3169_v43, %v10417_v17  ;;  %v9435_v29 = vld [vmem:[%s11924_s3 + $0xf8] sm:$0xff]   ;;  %v9444_v43 = vld [vmem:[%s11924_s3 + $0x170] sm:$0xff]  }
 0x1c7   : > { %v1504_v33 = vsel %vm727_vm6, %v1503_v24, %v1502_v15  ;;  %8723 = vmatprep.subr.bf16.mxu0 %v9409_v27  ;;  %v9432_v15 = vld [vmem:[%s11924_s3 + $0x158] sm:$0xff]   ;;  %v9436_v24 = vld [vmem:[%s11924_s3 + $0x160] sm:$0xff]  }
 0x1c8   : > { %1507 = vst.msk [vmem:[#allocation2 + $0x3] ss:$8 sm:$0x7] %vm10631_vm7, %v1504_v33  ;;  %9021 = vmatpush3.bf16.msra.mxu1 %v9413_v18  ;;  %v3043_v37 = vmax.f32 %v3042_v32, 0.0  ;;  %v3178_v63 = vadd.f32 %v3176_v51, %v3053_v54  ;;  %v9434_v18 = vld [vmem:[%s11924_s3 + $0x1a0] sm:$0xff]   ;;  %v9438_v32 = vld [vmem:[%s11924_s3 + $0x1a8] sm:$0xff]  }
 0x1c9   : > { %9022 = vmatprep.subr.bf16.mxu1 %v9706_v8  ;;  %v9439_v33 = vld [vmem:[%s11924_s3 + $0x100] sm:$0xff]   ;;  %v9452_v54 = vld [vmem:[%s11924_s3 + $0xd8] sm:$0xff]  }
 0x1ca   : > { %8724 = vmatpush3.bf16.msra.mxu0 %v9411_v30  ;;  %3045 = vrot.lane.b32.xlu0 %v3043_v37, %s9709_s23  ;;  %v9437_v30 = vld [vmem:[%s11924_s3 + $0xb8] sm:$0xff]   ;;  %v9441_v37 = vld [vmem:[%s11924_s3 + $0xc0] sm:$0xff]  }
 0x1cb   : > { %8725 = vmatprep.subr.bf16.mxu0 %v9412_v36  ;;  %v9440_v36 = vld [vmem:[%s11924_s3 + $0x168] sm:$0xff]   ;;  %v9451_v51 = vld [vmem:[%s11924_s3 + $0x1c0] sm:$0xff]  }
 0x1cc   : > { %9023 = vmatpush3.bf16.msra.mxu1 %v9416_v9 }
 0x1cd   : > { %8769 = vmatprep.subr.bf16.mxu1 %v9418_v34 }
 0x1ce   : > { %8726 = vmatpush3.bf16.msra.mxu0 %v9414_v38  ;;  %v9442_v38 = vld [vmem:[%s11924_s3 + $0x1b0] sm:$0xff]  }
 0x1cf   : > { %8727 = vmatprep.subr.bf16.mxu0 %v9415_v41  ;;  %v10827_v39 = vld [vmem:[#allocation2 + $0x3] ss:$8 sm:$0x7] }
 0x1d0   : > { %v4525_v45 = vrot.slane %v10827_v39, %v10472_v49  ;;  %v4521_v56 = vrot.slane %v10827_v39, %v10409_v13  ;;  %v9443_v41 = vld [vmem:[%s11924_s3 + $0x108] sm:$0xff]  }
 0x1d2   : > { %8728 = vmatpush3.bf16.msra.mxu0 %v9417_v42  ;;  %v4531_v40 = vpack.c.bf16 %v4525_v45, %v4525_v45  ;;  %v3278_v50 = vpop.f32.mrb[44].mxu0  ;;  %v4530_v10 = vpack.c.bf16 %v4521_v56, %v4521_v56  ;;  %v9446_v45 = vld [vmem:[%s11924_s3 + $0x1b8] sm:$0xff]   ;;  %v4517_v56 = vrot.slane %v10827_v39, %v10515_v19 }
 0x1d3   : > { %8729 = vmatprep.subr.bf16.mxu0 %v9419_v44  ;;  %v3280_v55 = vpop.f32.mrb[45].mxu0  ;;  %v9445_v44 = vld [vmem:[%s11924_s3 + $0xc8] sm:$0xff]  }
 0x1d4   : > { %9025 = vmatmul.mubr.msk.bf16.vlgmr.msra.gmra.mrb[52].mxu1 %vm333_vm2, %v4531_v40  ;;  %v3287_v57 = vcombine.low %v3278_v50, %v3280_v55  ;;  %v3282_v58 = vpop.f32.mrb[46].mxu0  ;;  %v3403_v59 = vpop.f32.mrb[44].mxu1  ;;  %v9448_v40 = vld [vmem:[%s11924_s3 + $0x178] sm:$0xff]  }
 0x1d5   : > { %8770 = vmatpush3.bf16.msra.mxu1 %v9420_v35  ;;  %v3283_v60 = vpop.f32.mrb[47].mxu0  ;;  %v3405_v61 = vpop.f32.mrb[45].mxu1  ;;  %v9447_v35 = vld [vmem:[%s11924_s3 + $0x110] sm:$0xff]   ;;  %v9450_v50 = vld [vmem:[%s11924_s3 + $0x118] sm:$0xff]  }
 0x1d6   : > { %8730 = vmatpush3.bf16.msra.mxu0 %v9421_v46  ;;  %8771 = vmatprep.subr.bf16.mxu1 %v9422_v48  ;;  %v3294_v0 = vrot.slane %v3287_v57, %v10417_v17  ;;  %v3412_v1 = vcombine.low %v3403_v59, %v3405_v61  ;;  %v3407_v3 = vpop.f32.mrb[46].mxu1  ;;  %v9449_v46 = vld [vmem:[%s11924_s3 + $0xd0] sm:$0xff]   ;;  %v9454_v57 = vld [vmem:[%s11924_s3 + $0x40] sm:$0xff]   ;;  %v9453_v61 = vld [vmem:[%s11924_s3 + $0x1c8] sm:$0xff]  }
 0x1d7   : > { %8742 = vmatprep.subr.bf16.mxu0 %v9423_v53  ;;  %v3408_v7 = vpop.f32.mrb[47].mxu1  ;;  %v9456_v3 = vld [vmem:[%s11924_s3 + $0x1d0] sm:$0xff]  }
 0x1d8   : > { %v3301_v11 = vrot.slane %v3294_v0, %v10417_v17  ;;  %v3419_v14 = vrot.slane %v3412_v1, %v10417_v17  ;;  %v9457_v0 = vld [vmem:[%s11924_s3 + $0x48] sm:$0xff]  }
 0x1d9   : > { %4464 = vmatmul.mubr.bf16.vlgmr.msra.gmra.mrb[60].mxu0 %v4265_v4  ;;  %8772 = vmatpush3.bf16.msra.mxu1 %v9424_v47  ;;  %v9458_v4 = vld [vmem:[%s11924_s3 + $0x8] sm:$0xff]  }
 0x1da   : > { %8743 = vmatpush3.bf16.msra.mxu0 %v9425_v62  ;;  %4727 = vmatprep.mubr.bf16.mxu0 %v4530_v10  ;;  %v1888_v20 = vpop.permute.xlu1 %1887  ;;  %v3426_v12 = vrot.slane %v3419_v14, %v10417_v17  ;;  %v3303_v23 = vadd.f32 %v3301_v11, %v3178_v63  ;;  %v9433_v17 = vld [vmem:[%s11924_s3 + $0xb0] sm:$0xff]   ;;  %v9455_v62 = vld [vmem:[%s11924_s3] sm:$0xff]   ;;  %v4529_v63 = vpack.c.bf16 %v4517_v56, %v4517_v56  ;;  %v9463_v14 = vld [vmem:[%s11924_s3 + $0x58] sm:$0xff]  }
 0x1db   : > { %v1889_v25 = vrot.slane %v1888_v20, 7  ;;  %8773 = vmatprep.subr.bf16.mxu1 %v9426_v5  ;;  %8744 = vmatprep.subr.bf16.mxu0 %v9427_v6  ;;  %v9460_v5 = vld [vmem:[%s11924_s3 + $0x50] sm:$0xff]   ;;  %v9459_v6 = vld [vmem:[%s11924_s3 + $0x1d8] sm:$0xff]   ;;  %v9462_v11 = vld [vmem:[%s11924_s3 + $0xe0] sm:$0xff]  }
 0x1dc   : > { %v10880_v27 = vadd.f32 %v3426_v12, %v3303_v23  ;;  %v9461_v10 = vld [vmem:[%s11924_s3 + $0x10] sm:$0xff]   ;;  %v9465_v12 = vld [vmem:[%s11924_s3 + $0x18] sm:$0xff]   ;;  %v9466_v23 = vld [vmem:[%s11924_s3 + $0xe8] sm:$0xff]  }
 0x1dd   : > { %v1890_v28 = vsel %vm727_vm6, %v1889_v25, %v1888_v20  ;;  %8774 = vmatpush3.bf16.msra.mxu1 %v9428_v16  ;;  %v9464_v20 = vld [vmem:[%s11924_s3 + $0xa0] sm:$0xff]   ;;  %v9488_v56 = vld [vmem:[%s11924_s3 + $0x118] sm:$0xff]  }
 0x1de   : > { %1893 = vst.msk [vmem:[#allocation2 + $0x4] ss:$8 sm:$0x7] %vm10631_vm7, %v1890_v28  ;;  %8745 = vmatpush3.bf16.msra.mxu0 %v9429_v21  ;;  %8775 = vmatprep.subr.bf16.mxu1 %v9430_v22  ;;  %v9467_v25 = vld [vmem:[%s11924_s3 + $0x60] sm:$0xff]   ;;  %v9468_v28 = vld [vmem:[%s11924_s3 + $0xa8] sm:$0xff]  }
 0x1df   : > { %8746 = vmatprep.subr.bf16.mxu0 %v9431_v26 }
 0x1e1   : > { %8776 = vmatpush3.bf16.msra.mxu1 %v9432_v15  ;;  %v9469_v15 = vld [vmem:[%s11924_s3 + $0x20] sm:$0xff]  }
 0x1e2   : > { %8747 = vmatpush3.bf16.msra.mxu0 %v9433_v17  ;;  %8777 = vmatprep.subr.bf16.mxu1 %v9434_v18  ;;  %v9470_v17 = vld [vmem:[%s11924_s3 + $0xf0] sm:$0xff]   ;;  %v9471_v18 = vld [vmem:[%s11924_s3 + $0x68] sm:$0xff]  }
 0x1e3   : > { %8748 = vmatprep.subr.bf16.mxu0 %v9435_v29  ;;  %v9472_v29 = vld [vmem:[%s11924_s3 + $0xb0] sm:$0xff]  }
 0x1e5   : > { %8778 = vmatpush3.bf16.msra.mxu1 %v9436_v24  ;;  %v10912_v9 = vld [vmem:[#allocation2 + $0x4] ss:$8 sm:$0x7] }
 0x1e6   : > { %8749 = vmatpush3.bf16.msra.mxu0 %v9437_v30  ;;  %8779 = vmatprep.subr.bf16.mxu1 %v9438_v32  ;;  %v4785_v34 = vrot.slane %v10912_v9, %v10409_v13  ;;  %v4781_v48 = vrot.slane %v10912_v9, %v10515_v19  ;;  %v10951_v52 = vld [vmem:[#allocation2 + $0x4] ss:$8 sm:$0x7]  ;;  %v4789_v7 = vrot.slane %v10912_v9, %v10472_v49  ;;  %v9474_v30 = vld [vmem:[%s11924_s3 + $0xf8] sm:$0xff]  }
 0x1e7   : > { %8750 = vmatprep.subr.bf16.mxu0 %v9439_v33  ;;  %v5061_v59 = vrot.slane %v10951_v52, %v10409_v13  ;;  %v9473_v24 = vld [vmem:[%s11924_s3 + $0x28] sm:$0xff]   ;;  %v9475_v32 = vld [vmem:[%s11924_s3 + $0x70] sm:$0xff]   ;;  %v9476_v9 = vld [vmem:[%s11924_s3 + $0xb8] sm:$0xff]  }
 0x1e8   : > { %v4794_v42 = vpack.c.bf16 %v4785_v34, %v4785_v34  ;;  %v4793_v53 = vpack.c.bf16 %v4781_v48, %v4781_v48  ;;  %v4795_v22 = vpack.c.bf16 %v4789_v7, %v4789_v7  ;;  %v9478_v34 = vld [vmem:[%s11924_s3 + $0x100] sm:$0xff]  }
 0x1e9   : > { %8780 = vmatpush3.bf16.msra.mxu1 %v9440_v36  ;;  %v5070_v1 = vpack.c.bf16 %v5061_v59, %v5061_v59  ;;  %v9490_v59 = vld [vmem:[%s11924_s3 + $0x90] sm:$0xff]  }
 0x1ea   : > { %8751 = vmatpush3.bf16.msra.mxu0 %v9441_v37  ;;  %4991 = vmatprep.mubr.bf16.mxu1 %v4794_v42  ;;  %v9477_v37 = vld [vmem:[%s11924_s3 + $0x30] sm:$0xff]   ;;  %v9480_v42 = vld [vmem:[%s11924_s3 + $0xc0] sm:$0xff]  }
 0x1eb   : > { %8781 = vmatprep.subr.bf16.mxu1 %v9442_v38  ;;  %8752 = vmatprep.subr.bf16.mxu0 %v9443_v41  ;;  %v9479_v41 = vld [vmem:[%s11924_s3 + $0x78] sm:$0xff]  }
 0x1ed   : > { %8782 = vmatpush3.bf16.msra.mxu1 %v9444_v43  ;;  %v9481_v43 = vld [vmem:[%s11924_s3 + $0x38] sm:$0xff]  }
 0x1ee   : > { %8753 = vmatpush3.bf16.msra.mxu0 %v9445_v44  ;;  %8783 = vmatprep.subr.bf16.mxu1 %v9446_v45  ;;  %v9482_v44 = vld [vmem:[%s11924_s3 + $0x108] sm:$0xff]   ;;  %v5057_v45 = vrot.slane %v10951_v52, %v10515_v19 }
 0x1ef   : > { %8754 = vmatprep.subr.bf16.mxu0 %v9447_v35  ;;  %v9483_v35 = vld [vmem:[%s11924_s3 + $0xc8] sm:$0xff]  }
 0x1f1   : > { %8784 = vmatpush3.bf16.msra.mxu1 %v9448_v40  ;;  %v9484_v40 = vld [vmem:[%s11924_s3 + $0x80] sm:$0xff]  }
 0x1f2   : > { %8755 = vmatpush3.bf16.msra.mxu0 %v9449_v46  ;;  %9028 = vmatprep.subr.bf16.mxu1 %v9706_v8  ;;  %v8650_v55 = vpop.f32.mrb[48].mxu0  ;;  %v9485_v46 = vld [vmem:[%s11924_s3 + $0x110] sm:$0xff]  }
 0x1f3   : > { %8756 = vmatprep.subr.bf16.mxu0 %v9450_v50  ;;  %v8651_v58 = vpop.f32.mrb[49].mxu0  ;;  %v5069_v50 = vpack.c.bf16 %v5057_v45, %v5057_v45 }
 0x1f4   : > { %4992 = vmatmul.mubr.bf16.vlgmr.msra.gmra.mrb[56].mxu1 %v4793_v53  ;;  %v10964_v47 = vadd.f32 %v8651_v58, %v8650_v55  ;;  %v8653_v60 = vpop.f32.mrb[50].mxu0  ;;  %v9486_v53 = vld [vmem:[%s11924_s3 + $0xd0] sm:$0xff]   ;;  %v9487_v55 = vld [vmem:[%s11924_s3 + $0x88] sm:$0xff]   ;;  %v9489_v58 = vld [vmem:[%s11924_s3 + $0xd8] sm:$0xff]  }
 0x1f5   : > { %9029 = vmatpush3.bf16.msra.mxu1 %v9451_v51  ;;  %9036 = vmatprep.mubr.msk.bf16.mxu1 %vm9708_vm3, %v9706_v8  ;;  %v8654_v39 = vpop.f32.mrb[51].mxu0  ;;  %v9510_v60 = vld [vmem:[%s11924_s3 + $0x40] sm:$0xff]  }
 0x1f6   : > { %8757 = vmatpush3.bf16.msra.mxu0 %v9452_v54  ;;  %9030 = vmatprep.subr.bf16.mxu1 %v9706_v8  ;;  %v9511_v39 = vld [vmem:[%s11924_s3] sm:$0xff]  }
 0x1f7   : > { %8796 = vmatprep.subr.bf16.mxu0 %v9454_v57 }
 0x1f9   : > { %4728 = vmatmul.mubr.bf16.vlgmr.msra.gmra.mrb[64].mxu0 %v4529_v63  ;;  %9031 = vmatpush3.bf16.msra.mxu1 %v9453_v61  ;;  %v9491_v63 = vld [vmem:[%s11924_s3 + $0x98] sm:$0xff]  }
 0x1fa   : > { %8797 = vmatpush3.bf16.msra.mxu0 %v9455_v62  ;;  %5267 = vmatprep.mubr.bf16.mxu0 %v5070_v1  ;;  %v5065_v1 = vrot.slane %v10951_v52, %v10472_v49  ;;  %v9517_v52 = vld [vmem:[%s11924_s3 + $0x50] sm:$0xff]  }
 0x1fb   : > { %9032 = vmatprep.subr.bf16.mxu1 %v9706_v8  ;;  %8798 = vmatprep.subr.bf16.mxu0 %v9457_v0  ;;  %v9514_v0 = vld [vmem:[%s11924_s3 + $0x48] sm:$0xff]  }
 0x1fc   : > { %v5071_v7 = vpack.c.bf16 %v5065_v1, %v5065_v1  ;;  %v9553_v1 = vld [vmem:[%s11924_s3 + $0x128] sm:$0xff]  }
 0x1fd   : > { %9033 = vmatpush3.bf16.msra.mxu1 %v9456_v3 }
 0x1fe   : > { %8799 = vmatpush3.bf16.msra.mxu0 %v9458_v4  ;;  %9034 = vmatprep.subr.bf16.mxu1 %v9706_v8  ;;  %v9515_v4 = vld [vmem:[%s11924_s3 + $0x8] sm:$0xff]  }
 0x1ff   : > { %8800 = vmatprep.subr.bf16.mxu0 %v9460_v5 }
 0x200   : > { %v2274_v16 = vpop.permute.xlu0 %2273 }
 0x201   : > { %9035 = vmatpush3.bf16.msra.mxu1 %v9459_v6  ;;  %v2275_v21 = vrot.slane %v2274_v16, 7  ;;  %v9492_v6 = vld [vmem:[%s11924_s3 + $0x120] sm:$0xff]  }
 0x202   : > { %8801 = vmatpush3.bf16.msra.mxu0 %v9461_v10  ;;  %8823 = vmatprep.subr.bf16.mxu1 %v9462_v11  ;;  %v9518_v10 = vld [vmem:[%s11924_s3 + $0x10] sm:$0xff]   ;;  %v9493_v11 = vld [vmem:[%s11924_s3 + $0x128] sm:$0xff]  }
 0x203   : > { %8802 = vmatprep.subr.bf16.mxu0 %v9463_v14  ;;  %v2276_v26 = vsel %vm727_vm6, %v2275_v21, %v2274_v16  ;;  %v9520_v14 = vld [vmem:[%s11924_s3 + $0x58] sm:$0xff]   ;;  %v9523_v21 = vld [vmem:[%s11924_s3 + $0x60] sm:$0xff]  }
 0x204   : > { %9037 = vmatmul.mubr.msk.bf16.vlgmr.msra.gmra.mrb[52].mxu1 %vm333_vm2, %v4795_v22  ;;  %2279 = vst.msk [vmem:[#allocation2 + $0x5] ss:$8 sm:$0x7] %vm10631_vm7, %v2276_v26  ;;  %v9521_v16 = vld [vmem:[%s11924_s3 + $0x18] sm:$0xff]  }
 0x205   : > { %8824 = vmatpush3.bf16.msra.mxu1 %v9464_v20  ;;  %v9494_v20 = vld [vmem:[%s11924_s3 + $0x130] sm:$0xff]  }
 0x206   : > { %8803 = vmatpush3.bf16.msra.mxu0 %v9465_v12  ;;  %8825 = vmatprep.subr.bf16.mxu1 %v9466_v23  ;;  %v9524_v23 = vld [vmem:[%s11924_s3 + $0x20] sm:$0xff]  }
 0x207   : > { %8804 = vmatprep.subr.bf16.mxu0 %v9467_v25  ;;  %v9495_v25 = vld [vmem:[%s11924_s3 + $0x138] sm:$0xff]  }
 0x209   : > { %8826 = vmatpush3.bf16.msra.mxu1 %v9468_v28  ;;  %v9526_v28 = vld [vmem:[%s11924_s3 + $0x68] sm:$0xff]  }
 0x20a   : > { %8805 = vmatpush3.bf16.msra.mxu0 %v9469_v15  ;;  %8827 = vmatprep.subr.bf16.mxu1 %v9470_v17  ;;  %v9496_v15 = vld [vmem:[%s11924_s3 + $0x180] sm:$0xff]  }
 0x20b   : > { %8806 = vmatprep.subr.bf16.mxu0 %v9471_v18  ;;  %v11043_v33 = vld [vmem:[#allocation2 + $0x5] ss:$8 sm:$0x7] }
 0x20c   : > { %v5325_v36 = vrot.slane %v11043_v33, %v10409_v13  ;;  %v5321_v57 = vrot.slane %v11043_v33, %v10515_v19  ;;  %v5329_v12 = vrot.slane %v11043_v33, %v10472_v49  ;;  %v9527_v18 = vld [vmem:[%s11924_s3 + $0x28] sm:$0xff]   ;;  %v9531_v33 = vld [vmem:[%s11924_s3 + $0x30] sm:$0xff]  }
 0x20d   : > { %8828 = vmatpush3.bf16.msra.mxu1 %v9472_v29  ;;  %v9497_v29 = vld [vmem:[%s11924_s3 + $0x140] sm:$0xff]  }
 0x20e   : > { %8807 = vmatpush3.bf16.msra.mxu0 %v9473_v24  ;;  %8829 = vmatprep.subr.bf16.mxu1 %v9474_v30  ;;  %v5334_v38 = vpack.c.bf16 %v5325_v36, %v5325_v36  ;;  %v5333_v61 = vpack.c.bf16 %v5321_v57, %v5321_v57  ;;  %v5335_v17 = vpack.c.bf16 %v5329_v12, %v5329_v12  ;;  %v9498_v30 = vld [vmem:[%s11924_s3 + $0x188] sm:$0xff]  }
 0x20f   : > { %8808 = vmatprep.subr.bf16.mxu0 %v9475_v32  ;;  %v9529_v32 = vld [vmem:[%s11924_s3 + $0x70] sm:$0xff]   ;;  %v9499_v36 = vld [vmem:[%s11924_s3 + $0x148] sm:$0xff]  }
 0x210   : > { %5531 = vmatprep.mubr.bf16.mxu1 %v5334_v38 }
 0x211   : > { %8830 = vmatpush3.bf16.msra.mxu1 %v9476_v9  ;;  %v9533_v9 = vld [vmem:[%s11924_s3 + $0x78] sm:$0xff]  }
 0x212   : > { %8809 = vmatpush3.bf16.msra.mxu0 %v9477_v37  ;;  %8831 = vmatprep.subr.bf16.mxu1 %v9478_v34  ;;  %v9500_v37 = vld [vmem:[%s11924_s3 + $0x190] sm:$0xff]  }
 0x213   : > { %8810 = vmatprep.subr.bf16.mxu0 %v9479_v41  ;;  %v9535_v41 = vld [vmem:[%s11924_s3 + $0x38] sm:$0xff]  }
 0x215   : > { %8832 = vmatpush3.bf16.msra.mxu1 %v9480_v42 }
 0x216   : > { %8811 = vmatpush3.bf16.msra.mxu0 %v9481_v43  ;;  %8833 = vmatprep.subr.bf16.mxu1 %v9482_v44  ;;  %v2660_v48 = vpop.permute.xlu1 %2659  ;;  %v9501_v43 = vld [vmem:[%s11924_s3 + $0x150] sm:$0xff]   ;;  %v9502_v44 = vld [vmem:[%s11924_s3 + $0x198] sm:$0xff]  }
 0x217   : > { %9040 = vmatprep.subr.bf16.mxu0 %v9706_v8  ;;  %v2661_v51 = vrot.slane %v2660_v48, 7 }
 0x219   : > { %5268 = vmatmul.mubr.bf16.vlgmr.msra.gmra.mrb[68].mxu0 %v5069_v50  ;;  %8834 = vmatpush3.bf16.msra.mxu1 %v9483_v35  ;;  %v2662_v54 = vsel %vm727_vm6, %v2661_v51, %v2660_v48  ;;  %v9504_v48 = vld [vmem:[%s11924_s3 + $0x1a0] sm:$0xff]   ;;  %v9541_v50 = vld [vmem:[%s11924_s3 + $0x88] sm:$0xff]  }
 0x21a   : > { %9041 = vmatpush3.bf16.msra.mxu0 %v9484_v40  ;;  %8835 = vmatprep.subr.bf16.mxu1 %v9485_v46  ;;  %2665 = vst.msk [vmem:[#allocation2 + $0x6] ss:$8 sm:$0x7] %vm10631_vm7, %v2662_v54  ;;  %v9538_v40 = vld [vmem:[%s11924_s3 + $0x80] sm:$0xff]   ;;  %v9503_v46 = vld [vmem:[%s11924_s3 + $0x158] sm:$0xff]   ;;  %v9544_v54 = vld [vmem:[%s11924_s3 + $0x90] sm:$0xff]  }
 0x21b   : > { %9042 = vmatprep.subr.bf16.mxu0 %v9706_v8  ;;  %9048 = vmatprep.mubr.msk.bf16.mxu0 %vm9708_vm3, %v9706_v8  ;;  %v9505_v51 = vld [vmem:[%s11924_s3 + $0x160] sm:$0xff]  }
 0x21d   : > { %8836 = vmatpush3.bf16.msra.mxu1 %v9486_v53  ;;  %v9506_v53 = vld [vmem:[%s11924_s3 + $0x1a8] sm:$0xff]  }
 0x21e   : > { %9043 = vmatpush3.bf16.msra.mxu0 %v9487_v55  ;;  %8837 = vmatprep.subr.bf16.mxu1 %v9488_v56  ;;  %v9507_v55 = vld [vmem:[%s11924_s3 + $0x168] sm:$0xff]   ;;  %v9508_v56 = vld [vmem:[%s11924_s3 + $0x1b0] sm:$0xff]  }
 0x21f   : > { %9044 = vmatprep.subr.bf16.mxu0 %v9706_v8 }
 0x221   : > { %8838 = vmatpush3.bf16.msra.mxu1 %v9489_v58  ;;  %v11110_v62 = vld [vmem:[#allocation2 + $0x6] ss:$8 sm:$0x7]  ;;  %v9547_v58 = vld [vmem:[%s11924_s3 + $0x98] sm:$0xff]  }
 0x222   : > { %9045 = vmatpush3.bf16.msra.mxu0 %v9490_v59  ;;  %8877 = vmatprep.subr.bf16.mxu1 %v9510_v60  ;;  %v5865_v3 = vrot.slane %v11110_v62, %v10409_v13  ;;  %v11156_v22 = vld [vmem:[#allocation2 + $0x6] ss:$8 sm:$0x7]  ;;  %v5861_v34 = vrot.slane %v11110_v62, %v10515_v19  ;;  %v5869_v57 = vrot.slane %v11110_v62, %v10472_v49  ;;  %v9512_v60 = vld [vmem:[%s11924_s3 + $0x1b8] sm:$0xff]  }
 0x223   : > { %9046 = vmatprep.subr.bf16.mxu0 %v9706_v8  ;;  %v5589_v26 = vrot.slane %v11156_v22, %v10409_v13  ;;  %v9509_v59 = vld [vmem:[%s11924_s3 + $0x170] sm:$0xff]   ;;  %v9552_v62 = vld [vmem:[%s11924_s3 + $0x120] sm:$0xff]  }
 0x224   : > { %5532 = vmatmul.mubr.bf16.vlgmr.msra.gmra.mrb[60].mxu1 %v5333_v61  ;;  %v5874_v5 = vpack.c.bf16 %v5865_v3, %v5865_v3  ;;  %v5873_v35 = vpack.c.bf16 %v5861_v34, %v5861_v34  ;;  %v5875_v61 = vpack.c.bf16 %v5869_v57, %v5869_v57  ;;  %v9516_v3 = vld [vmem:[%s11924_s3 + $0x1c0] sm:$0xff]  }
 0x225   : > { %8878 = vmatpush3.bf16.msra.mxu1 %v9511_v39  ;;  %v5598_v24 = vpack.c.bf16 %v5589_v26, %v5589_v26  ;;  %v5585_v39 = vrot.slane %v11156_v22, %v10515_v19  ;;  %v9534_v26 = vld [vmem:[%s11924_s3 + $0xa8] sm:$0xff]   ;;  %v9543_v34 = vld [vmem:[%s11924_s3 + $0xc0] sm:$0xff]  }
 0x226   : > { %9047 = vmatpush3.bf16.msra.mxu0 %v9491_v63  ;;  %8879 = vmatprep.subr.bf16.mxu1 %v9514_v0  ;;  %v9513_v63 = vld [vmem:[%s11924_s3 + $0x178] sm:$0xff]  }
 0x227   : > { %9052 = vmatprep.subr.bf16.mxu0 %v9706_v8  ;;  %6071 = vmatprep.mubr.bf16.mxu1 %v5874_v5  ;;  %v5597_v0 = vpack.c.bf16 %v5585_v39, %v5585_v39  ;;  %v9519_v5 = vld [vmem:[%s11924_s3 + $0x1c8] sm:$0xff]   ;;  %v11395_v39 = vld [vmem:[%s11926_s5] sm:$0xff]  }
 0x229   : > { %9049 = vmatmul.mubr.msk.bf16.vlgmr.msra.gmra.mrb[72].mxu0 %vm333_vm2, %v5071_v7  ;;  %8880 = vmatpush3.bf16.msra.mxu1 %v9515_v4  ;;  %v9554_v4 = vld [vmem:[%s11924_s3 + $0x130] sm:$0xff]  }
 0x22a   : > { %9053 = vmatpush3.bf16.msra.mxu0 %v9492_v6  ;;  %9060 = vmatprep.mubr.msk.bf16.mxu0 %vm9708_vm3, %v9706_v8 }
 0x22b   : > { %9054 = vmatprep.subr.bf16.mxu0 %v9706_v8  ;;  %8881 = vmatprep.subr.bf16.mxu1 %v9517_v52  ;;  %v9555_v52 = vld [vmem:[%s11924_s3 + $0x138] sm:$0xff]  }
 0x22d   : > { %8882 = vmatpush3.bf16.msra.mxu1 %v9518_v10  ;;  %v9522_v10 = vld [vmem:[%s11924_s3 + $0x1d0] sm:$0xff]  }
 0x22e   : > { %9055 = vmatpush3.bf16.msra.mxu0 %v9493_v11  ;;  %8883 = vmatprep.subr.bf16.mxu1 %v9520_v14  ;;  %v5593_v14 = vrot.slane %v11156_v22, %v10472_v49  ;;  %v9530_v22 = vld [vmem:[%s11924_s3 + $0xa0] sm:$0xff]  }
 0x22f   : > { %9056 = vmatprep.subr.bf16.mxu0 %v9706_v8 }
 0x230   : > { %v5599_v12 = vpack.c.bf16 %v5593_v14, %v5593_v14  ;;  %v9589_v14 = vld [vmem:[%s11924_s3 + $0x1a8] sm:$0xff]  }
 0x231   : > { %8884 = vmatpush3.bf16.msra.mxu1 %v9521_v16  ;;  %v9525_v16 = vld [vmem:[%s11924_s3 + $0x1d8] sm:$0xff]  }
 0x232   : > { %9057 = vmatpush3.bf16.msra.mxu0 %v9494_v20  ;;  %8885 = vmatprep.subr.bf16.mxu1 %v9523_v21  ;;  %v9528_v21 = vld [vmem:[%s11924_s3 + $0xe0] sm:$0xff]  }
 0x233   : > { %9058 = vmatprep.subr.bf16.mxu0 %v9706_v8 }
 0x235   : > { %8886 = vmatpush3.bf16.msra.mxu1 %v9524_v23 }
 0x236   : > { %9059 = vmatpush3.bf16.msra.mxu0 %v9495_v25  ;;  %8887 = vmatprep.subr.bf16.mxu1 %v9526_v28  ;;  %v9532_v25 = vld [vmem:[%s11924_s3 + $0xe8] sm:$0xff]   ;;  %v3439_v28 = vld [vmem:[%s11925_s4] sm:$0x1] }
 0x237   : > { %8850 = vmatprep.subr.bf16.mxu0 %v9496_v15  ;;  %v9536_v15 = vld [vmem:[%s11924_s3 + $0xf0] sm:$0xff]  }
 0x239   : > { %9061 = vmatmul.mubr.msk.bf16.vlgmr.msra.gmra.mrb[72].mxu0 %vm333_vm2, %v5335_v17  ;;  %8888 = vmatpush3.bf16.msra.mxu1 %v9527_v18 }
 0x23a   : > { %8851 = vmatpush3.bf16.msra.mxu0 %v9497_v29  ;;  %5795 = vmatprep.mubr.bf16.mxu0 %v5598_v24  ;;  %v9136_v29 = vadd.f32 %v10964_v47, %v3439_v28  ;;  %v9540_v47 = vld [vmem:[%s11924_s3 + $0xb8] sm:$0xff]  }
 0x23b   : > { %8852 = vmatprep.subr.bf16.mxu0 %v9498_v30  ;;  %8889 = vmatprep.subr.bf16.mxu1 %v9529_v32  ;;  %v9537_v32 = vld [vmem:[%s11924_s3 + $0xb0] sm:$0xff]   ;;  %v9594_v28 = vld [vmem:[%s11924_s3 + $0x1b8] sm:$0xff]  }
 0x23c   : > { %v3046_v38 = vpop.permute.xlu0 %3045 }
 0x23d   : > { %8890 = vmatpush3.bf16.msra.mxu1 %v9531_v33  ;;  %v3047_v42 = vrot.slane %v3046_v38, 7 }
 0x23e   : > { %8853 = vmatpush3.bf16.msra.mxu0 %v9499_v36  ;;  %8891 = vmatprep.subr.bf16.mxu1 %v9533_v9  ;;  %v9539_v36 = vld [vmem:[%s11924_s3 + $0xf8] sm:$0xff]  }
 0x23f   : > { %8854 = vmatprep.subr.bf16.mxu0 %v9500_v37  ;;  %v3048_v45 = vsel %vm727_vm6, %v3047_v42, %v3046_v38  ;;  %v9542_v37 = vld [vmem:[%s11924_s3 + $0x100] sm:$0xff]   ;;  %v9545_v38 = vld [vmem:[%s11924_s3 + $0x108] sm:$0xff]   ;;  %v9548_v42 = vld [vmem:[%s11924_s3 + $0x110] sm:$0xff]  }
 0x240   : > { %3051 = vst.msk [vmem:[#allocation2 + $0x7] ss:$8 sm:$0x7] %vm10631_vm7, %v3048_v45  ;;  %v9577_v45 = vld [vmem:[%s11924_s3 + $0x188] sm:$0xff]  }
 0x241   : > { %8892 = vmatpush3.bf16.msra.mxu1 %v9535_v41  ;;  %v9546_v41 = vld [vmem:[%s11924_s3 + $0xc8] sm:$0xff]  }
 0x242   : > { %8855 = vmatpush3.bf16.msra.mxu0 %v9501_v43  ;;  %9076 = vmatprep.subr.bf16.mxu1 %v9706_v8  ;;  %v9574_v43 = vld [vmem:[%s11924_s3 + $0x180] sm:$0xff]  }
 0x243   : > { %8856 = vmatprep.subr.bf16.mxu0 %v9502_v44  ;;  %v9575_v44 = vld [vmem:[%s11924_s3 + $0x140] sm:$0xff]  }
 0x244   : > { %6072 = vmatmul.mubr.bf16.vlgmr.msra.gmra.mrb[64].mxu1 %v5873_v35  ;;  %v9549_v35 = vld [vmem:[%s11924_s3 + $0xd0] sm:$0xff]  }
 0x245   : > { %9077 = vmatpush3.bf16.msra.mxu1 %v9538_v40  ;;  %9084 = vmatprep.mubr.msk.bf16.mxu1 %vm9708_vm3, %v9706_v8  ;;  %v9578_v40 = vld [vmem:[%s11924_s3 + $0x148] sm:$0xff]  }
 0x246   : > { %8857 = vmatpush3.bf16.msra.mxu0 %v9503_v46  ;;  %9078 = vmatprep.subr.bf16.mxu1 %v9706_v8  ;;  %v9550_v46 = vld [vmem:[%s11924_s3 + $0x118] sm:$0xff]  }
 0x247   : > { %8858 = vmatprep.subr.bf16.mxu0 %v9504_v48  ;;  %v11287_v6 = vld [vmem:[#allocation2 + $0x7] ss:$8 sm:$0x7]  ;;  %v11374_v48 = vld [vmem:[#allocation3] ss:$8 sm:$0x3] }
 0x248   : > { %v6133_v7 = vrot.slane %v11287_v6, %v10472_v49  ;;  %v6129_v20 = vrot.slane %v11287_v6, %v10409_v13 }
 0x249   : > { %9079 = vmatpush3.bf16.msra.mxu1 %v9541_v50  ;;  %v9580_v50 = vld [vmem:[%s11924_s3 + $0x190] sm:$0xff]  }
 0x24a   : > { %8859 = vmatpush3.bf16.msra.mxu0 %v9505_v51  ;;  %9080 = vmatprep.subr.bf16.mxu1 %v9706_v8  ;;  %v6139_v11 = vpack.c.bf16 %v6133_v7, %v6133_v7  ;;  %v6138_v23 = vpack.c.bf16 %v6129_v20, %v6129_v20  ;;  %v6125_v51 = vrot.slane %v11287_v6, %v10515_v19  ;;  %v11417_v7 = vld [vmem:[%s11926_s5 + $0x10] sm:$0xff]   ;;  %v11431_v20 = vld [vmem:[%s11926_s5 + $0x18] sm:$0xff]  }
 0x24b   : > { %8860 = vmatprep.subr.bf16.mxu0 %v9506_v53 }
 0x24d   : > { %9081 = vmatpush3.bf16.msra.mxu1 %v9544_v54  ;;  %v9551_v54 = vld [vmem:[%s11924_s3 + $0xd8] sm:$0xff]  }
 0x24e   : > { %8861 = vmatpush3.bf16.msra.mxu0 %v9507_v55  ;;  %9082 = vmatprep.subr.bf16.mxu1 %v9706_v8  ;;  %v6670_v55 = vrot.slane %v11374_v48, %v10409_v13 }
 0x24f   : > { %8862 = vmatprep.subr.bf16.mxu0 %v9508_v56  ;;  %v9581_v56 = vld [vmem:[%s11924_s3 + $0x150] sm:$0xff]  }
 0x251   : > { %9083 = vmatpush3.bf16.msra.mxu1 %v9547_v58  ;;  %v9583_v58 = vld [vmem:[%s11924_s3 + $0x198] sm:$0xff]  }
 0x252   : > { %8863 = vmatpush3.bf16.msra.mxu0 %v9509_v59  ;;  %9088 = vmatprep.subr.bf16.mxu1 %v9706_v8 }
 0x253   : > { %8864 = vmatprep.subr.bf16.mxu0 %v9512_v60 }
 0x254   : > { %9085 = vmatmul.mubr.msk.bf16.vlgmr.msra.gmra.mrb[68].mxu1 %vm333_vm2, %v5875_v61  ;;  %v6137_v61 = vpack.c.bf16 %v6125_v51, %v6125_v51 }
 0x255   : > { %9089 = vmatpush3.bf16.msra.mxu1 %v9552_v62  ;;  %9096 = vmatprep.mubr.msk.bf16.mxu1 %vm9708_vm3, %v9706_v8  ;;  %v6674_v62 = vpack.c.bf16 %v6670_v55, %v6670_v55 }
 0x256   : > { %8865 = vmatpush3.bf16.msra.mxu0 %v9513_v63  ;;  %9090 = vmatprep.subr.bf16.mxu1 %v9706_v8  ;;  %v11402_v63 = vld [vmem:[%s11926_s5 + $0x8] sm:$0xff]  }
 0x257   : > { %9064 = vmatprep.subr.bf16.mxu0 %v9706_v8 }
 0x259   : > { %5796 = vmatmul.mubr.bf16.vlgmr.msra.gmra.mrb[76].mxu0 %v5597_v0  ;;  %9091 = vmatpush3.bf16.msra.mxu1 %v9553_v1  ;;  %v9584_v0 = vld [vmem:[%s11924_s3 + $0x158] sm:$0xff]   ;;  %v9586_v1 = vld [vmem:[%s11924_s3 + $0x1a0] sm:$0xff]  }
 0x25a   : > { %9065 = vmatpush3.bf16.msra.mxu0 %v9516_v3  ;;  %9072 = vmatprep.mubr.msk.bf16.mxu0 %vm9708_vm3, %v9706_v8 }
 0x25b   : > { %9066 = vmatprep.subr.bf16.mxu0 %v9706_v8  ;;  %9092 = vmatprep.subr.bf16.mxu1 %v9706_v8 }
 0x25d   : > { %9093 = vmatpush3.bf16.msra.mxu1 %v9554_v4 }
 0x25e   : > { %9067 = vmatpush3.bf16.msra.mxu0 %v9519_v5  ;;  %9094 = vmatprep.subr.bf16.mxu1 %v9706_v8 }
 0x25f   : > { %9068 = vmatprep.subr.bf16.mxu0 %v9706_v8 }
 0x261   : > { %9095 = vmatpush3.bf16.msra.mxu1 %v9555_v52  ;;  %v9587_v52 = vld [vmem:[%s11924_s3 + $0x160] sm:$0xff]  }
 0x262   : > { %9069 = vmatpush3.bf16.msra.mxu0 %v9522_v10  ;;  %8931 = vmatprep.subr.bf16.mxu1 %v9574_v43  ;;  %v11523_v43 = vld [vmem:[%s11926_s5 + $0x68] sm:$0xff]  }
 0x263   : > { %9070 = vmatprep.subr.bf16.mxu0 %v9706_v8 }
 0x264   : > { %9097 = vmatmul.mubr.msk.bf16.vlgmr.msra.gmra.mrb[68].mxu1 %vm333_vm2, %v6139_v11 }
 0x265   : > { %8932 = vmatpush3.bf16.msra.mxu1 %v9575_v44  ;;  %v11530_v44 = vld [vmem:[%s11926_s5 + $0x70] sm:$0xff]  }
 0x266   : > { %9071 = vmatpush3.bf16.msra.mxu0 %v9525_v16  ;;  %8933 = vmatprep.subr.bf16.mxu1 %v9577_v45  ;;  %v11537_v45 = vld [vmem:[%s11926_s5 + $0x78] sm:$0xff]  }
 0x267   : > { %8904 = vmatprep.subr.bf16.mxu0 %v9528_v21  ;;  %v9590_v21 = vld [vmem:[%s11924_s3 + $0x168] sm:$0xff]  }
 0x269   : > { %9073 = vmatmul.mubr.msk.bf16.vlgmr.msra.gmra.mrb[72].mxu0 %vm333_vm2, %v5599_v12  ;;  %8934 = vmatpush3.bf16.msra.mxu1 %v9578_v40  ;;  %v9592_v12 = vld [vmem:[%s11924_s3 + $0x1b0] sm:$0xff]  }
 0x26a   : > { %8905 = vmatpush3.bf16.msra.mxu0 %v9530_v22  ;;  %6335 = vmatprep.mubr.bf16.mxu0 %v6138_v23  ;;  %v9593_v23 = vld [vmem:[%s11924_s3 + $0x170] sm:$0xff]  }
 0x26b   : > { %8906 = vmatprep.subr.bf16.mxu0 %v9532_v25  ;;  %8935 = vmatprep.subr.bf16.mxu1 %v9580_v50 }
 0x26c   : > { %v8677_v17 = vpop.f32.mrb[52].mxu0 }
 0x26d   : > { %v8678_v18 = vpop.f32.mrb[53].mxu0  ;;  %8936 = vmatpush3.bf16.msra.mxu1 %v9581_v56 }
 0x26e   : > { %v8679_v24 = vadd.f32 %v8678_v18, %v8677_v17  ;;  %8907 = vmatpush3.bf16.msra.mxu0 %v9534_v26  ;;  %v8680_v30 = vpop.f32.mrb[54].mxu0  ;;  %8937 = vmatprep.subr.bf16.mxu1 %v9583_v58  ;;  %v11448_v26 = vld [vmem:[%s11926_s5 + $0x20] sm:$0xff]   ;;  %v3429_v17 = vmax.f32 %v10880_v27, 0.0  ;;  %v11463_v18 = vld [vmem:[%s11926_s5 + $0x28] sm:$0xff]   ;;  %v11472_v27 = vld [vmem:[%s11926_s5 + $0x30] sm:$0xff]  }
 0x26f   : > { %v8681_v33 = vpop.f32.mrb[55].mxu0  ;;  %8908 = vmatprep.subr.bf16.mxu0 %v9536_v15  ;;  %v9595_v15 = vld [vmem:[%s11924_s3 + $0x178] sm:$0xff]   ;;  %v11493_v30 = vld [vmem:[%s11926_s5 + $0x48] sm:$0xff]  }
 0x270   : > { %v11336_v9 = vadd.f32 %v9136_v29, %v8679_v24  ;;  %v11479_v29 = vld [vmem:[%s11926_s5 + $0x38] sm:$0xff]   ;;  %v11486_v24 = vld [vmem:[%s11926_s5 + $0x40] sm:$0xff]  }
 0x271   : > { %8938 = vmatpush3.bf16.msra.mxu1 %v9584_v0 }
 0x272   : > { %8909 = vmatpush3.bf16.msra.mxu0 %v9537_v32  ;;  %8939 = vmatprep.subr.bf16.mxu1 %v9586_v1  ;;  %v11568_v1 = vld [vmem:[%s11926_s5 + $0x98] sm:$0xff]  }
 0x273   : > { %8910 = vmatprep.subr.bf16.mxu0 %v9539_v36 }
 0x275   : > { %8940 = vmatpush3.bf16.msra.mxu1 %v9587_v52 }
 0x276   : > { %8911 = vmatpush3.bf16.msra.mxu0 %v9540_v47  ;;  %8941 = vmatprep.subr.bf16.mxu1 %v9589_v14  ;;  %v11500_v47 = vld [vmem:[%s11926_s5 + $0x50] sm:$0xff]   ;;  %v11582_v14 = vld [vmem:[%s11926_s5 + $0xa8] sm:$0xff]  }
 0x277   : > { %8912 = vmatprep.subr.bf16.mxu0 %v9542_v37 }
 0x279   : > { %8942 = vmatpush3.bf16.msra.mxu1 %v9590_v21  ;;  %v11591_v21 = vld [vmem:[%s11926_s5 + $0xb0] sm:$0xff]  }
 0x27a   : > { %8913 = vmatpush3.bf16.msra.mxu0 %v9543_v34  ;;  %8943 = vmatprep.subr.bf16.mxu1 %v9592_v12  ;;  %v6666_v34 = vrot.slane %v11374_v48, %v10515_v19  ;;  %v11598_v12 = vld [vmem:[%s11926_s5 + $0xb8] sm:$0xff]  }
 0x27b   : > { %8914 = vmatprep.subr.bf16.mxu0 %v9545_v38  ;;  %v11509_v38 = vld [vmem:[%s11926_s5 + $0x58] sm:$0xff]  }
 0x27d   : > { %8944 = vmatpush3.bf16.msra.mxu1 %v9593_v23 }
 0x27e   : > { %8915 = vmatpush3.bf16.msra.mxu0 %v9546_v41  ;;  %8945 = vmatprep.subr.bf16.mxu1 %v9594_v28  ;;  %v6673_v41 = vpack.c.bf16 %v6666_v34, %v6666_v34 }
 0x27f   : > { %8916 = vmatprep.subr.bf16.mxu0 %v9548_v42  ;;  %v11516_v42 = vld [vmem:[%s11926_s5 + $0x60] sm:$0xff]  }
 0x281   : > { %8946 = vmatpush3.bf16.msra.mxu1 %v9595_v15 }
 0x282   : > { %v4227_v53 = vpop.f32.mrb[48].mxu1  ;;  %8917 = vmatpush3.bf16.msra.mxu0 %v9549_v35  ;;  %9100 = vmatprep.subr.bf16.mxu1 %v9706_v8  ;;  %v11544_v35 = vld [vmem:[%s11926_s5 + $0x80] sm:$0xff]  }
 0x283   : > { %v9002_v57 = vpop.f32.mrb[49].mxu1  ;;  %8918 = vmatprep.subr.bf16.mxu0 %v9550_v46 }
 0x284   : > { %v4230_v59 = vpop.f32.mrb[50].mxu1 }
 0x285   : > { %v9003_v60 = vpop.f32.mrb[51].mxu1 }
 0x286   : > { %8919 = vmatpush3.bf16.msra.mxu0 %v9551_v54  ;;  %v4247_v54 = vld [vmem:[%s11925_s4] sm:$0x1]  ;;  %v11561_v60 = vld [vmem:[%s11926_s5 + $0x90] sm:$0xff]  }
 0x287   : > { %6774 = vmatprep.subr.bf16.mxu0 %v9705_v2 }
 0x289   : > { %6336 = vmatmul.mubr.bf16.vlgmr.msra.gmra.mrb[80].mxu0 %v6137_v61 }
 0x28a   : > { %6775 = vmatpush1.bf16.msra.mxu0 %v11395_v39  ;;  %8543 = vmatprep.mubr.msk.bf16.mxu0 %vm333_vm2, %v6674_v62 }
 0x28b   : > { %6776 = vmatprep.subr.bf16.mxu0 %v9705_v2 }
 0x28c   : > { %v8704_v3 = vpop.f32.mrb[56].mxu0 }
 0x28d   : > { %v8705_v4 = vpop.f32.mrb[57].mxu0 }
 0x28e   : > { %v8706_v5 = vadd.f32 %v8705_v4, %v8704_v3  ;;  %v8707_v6 = vpop.f32.mrb[58].mxu0  ;;  %6777 = vmatpush1.bf16.msra.mxu0 %v11402_v63  ;;  %v11575_v3 = vld [vmem:[%s11926_s5 + $0xa0] sm:$0xff]  }
 0x28f   : > { %v8708_v10 = vpop.f32.mrb[59].mxu0  ;;  %6778 = vmatprep.subr.bf16.mxu0 %v9705_v2 }
 0x290   : > { %v9138_v11 = vadd.f32 %v11336_v9, %v8706_v5 }
 0x292   : > { %v9139_v16 = vadd.f32 %v9138_v11, %v4227_v53  ;;  %6779 = vmatpush1.bf16.msra.mxu0 %v11417_v7  ;;  %v11551_v53 = vld [vmem:[%s11926_s5 + $0x88] sm:$0xff]  }
 0x293   : > { %6780 = vmatprep.subr.bf16.mxu0 %v9705_v2 }
 0x294   : > { %v4234_v22 = vmax.f32 %v9139_v16, 0.0 }
 0x296   : > { %v4239_v25 = vrot.slane %v4234_v22, %v10515_v19  ;;  %6781 = vmatpush1.bf16.msra.mxu0 %v11431_v20 }
 0x297   : > { %6782 = vmatprep.subr.bf16.mxu0 %v9705_v2 }
 0x298   : > { %4240 = vrot.lane.b32.xlu1 %v4239_v25, %s9709_s23 }
 0x29a   : > { %6783 = vmatpush1.bf16.msra.mxu0 %v11448_v26 }
 0x29b   : > { %6784 = vmatprep.subr.bf16.mxu0 %v9705_v2 }
 0x29c   : > { %3431 = vrot.lane.b32.xlu1 %v3429_v17, %s9709_s23  ;;  %v5051_v17 = vld [vmem:[%s11925_s4] sm:$0x1] }
 0x29e   : > { %6785 = vmatpush1.bf16.msra.mxu0 %v11463_v18 }
 0x29f   : > { %6786 = vmatprep.subr.bf16.mxu0 %v9705_v2 }
 0x2a2   : > { %6787 = vmatpush1.bf16.msra.mxu0 %v11472_v27 }
 0x2a3   : > { %6788 = vmatprep.subr.bf16.mxu0 %v9705_v2 }
 0x2a6   : > { %6789 = vmatpush1.bf16.msra.mxu0 %v11479_v29 }
 0x2a7   : > { %6790 = vmatprep.subr.bf16.mxu0 %v9705_v2 }
 0x2aa   : > { %6791 = vmatpush1.bf16.msra.mxu0 %v11486_v24 }
 0x2ab   : > { %6792 = vmatprep.subr.bf16.mxu0 %v9705_v2 }
 0x2ac   : > { %v8731_v32 = vpop.f32.mrb[60].mxu0 }
 0x2ad   : > { %v8732_v33 = vpop.f32.mrb[61].mxu0 }
 0x2ae   : > { %v8733_v36 = vadd.f32 %v8732_v33, %v8731_v32  ;;  %v8734_v9 = vpop.f32.mrb[62].mxu0  ;;  %6793 = vmatpush1.bf16.msra.mxu0 %v11493_v30 }
 0x2af   : > { %v8735_v37 = vpop.f32.mrb[63].mxu0  ;;  %6794 = vmatprep.subr.bf16.mxu0 %v9705_v2 }
 0x2b0   : > { %v9140_v57 = vadd.f32 %v8733_v36, %v4247_v54 }
 0x2b2   : > { %6795 = vmatpush1.bf16.msra.mxu0 %v11500_v47 }
 0x2b3   : > { %6796 = vmatprep.subr.bf16.mxu0 %v9705_v2 }
 0x2b6   : > { %6797 = vmatpush1.bf16.msra.mxu0 %v11509_v38 }
 0x2b7   : > { %6930 = vmatprep.subr.bf16.mxu0 %v9705_v2 }
 0x2b9   : > { %6807 = vmatmul.mubr.bf16.vlgmr.msra.gmra.mrb[84].mxu0 %v6673_v41 }
 0x2ba   : > { %6931 = vmatpush1.bf16.msra.mxu0 %v11516_v42 }
 0x2bb   : > { %6932 = vmatprep.subr.bf16.mxu0 %v9705_v2 }
 0x2be   : > { %6933 = vmatpush1.bf16.msra.mxu0 %v11523_v43 }
 0x2bf   : > { %6934 = vmatprep.subr.bf16.mxu0 %v9705_v2 }
 0x2c2   : > { %6935 = vmatpush1.bf16.msra.mxu0 %v11530_v44 }
 0x2c3   : > { %6936 = vmatprep.subr.bf16.mxu0 %v9705_v2 }
 0x2c6   : > { %6937 = vmatpush1.bf16.msra.mxu0 %v11537_v45 }
 0x2c7   : > { %v8785_v40 = vpop.f32.mrb[56].mxu1  ;;  %6938 = vmatprep.subr.bf16.mxu0 %v9705_v2 }
 0x2c8   : > { %v8786_v46 = vpop.f32.mrb[57].mxu1 }
 0x2c9   : > { %v8787_v48 = vadd.f32 %v8786_v46, %v8785_v40  ;;  %v8788_v50 = vpop.f32.mrb[58].mxu1 }
 0x2ca   : > { %v8789_v51 = vpop.f32.mrb[59].mxu1  ;;  %6939 = vmatpush1.bf16.msra.mxu0 %v11544_v35 }
 0x2cb   : > { %6940 = vmatprep.subr.bf16.mxu0 %v9705_v2 }
 0x2cc   : > { %v8758_v55 = vpop.f32.mrb[64].mxu0 }
 0x2cd   : > { %v8759_v56 = vpop.f32.mrb[65].mxu0 }
 0x2ce   : > { %v8760_v58 = vadd.f32 %v8759_v56, %v8758_v55  ;;  %v8761_v59 = vpop.f32.mrb[66].mxu0  ;;  %6941 = vmatpush1.bf16.msra.mxu0 %v11551_v53 }
 0x2cf   : > { %v8762_v61 = vpop.f32.mrb[67].mxu0  ;;  %6942 = vmatprep.subr.bf16.mxu0 %v9705_v2 }
 0x2d0   : > { %v9141_v62 = vadd.f32 %v9140_v57, %v8760_v58  ;;  %v11618_v58 = vld [vmem:[%s11926_s5 + $0xc0] sm:$0xff]  }
 0x2d2   : > { %v9142_v0 = vadd.f32 %v9141_v62, %v8787_v48  ;;  %6943 = vmatpush1.bf16.msra.mxu0 %v11561_v60 }
 0x2d3   : > { %6944 = vmatprep.subr.bf16.mxu0 %v9705_v2 }
 0x2d6   : > { %6945 = vmatpush1.bf16.msra.mxu0 %v11568_v1 }
 0x2d7   : > { %v5033_v4 = vpop.f32.mrb[52].mxu1  ;;  %6946 = vmatprep.subr.bf16.mxu0 %v9705_v2 }
 0x2d8   : > { %v9143_v5 = vadd.f32 %v9142_v0, %v5033_v4  ;;  %v9038_v6 = vpop.f32.mrb[53].mxu1 }
 0x2d9   : > { %v5036_v52 = vpop.f32.mrb[54].mxu1 }
 0x2da   : > { %v5040_v10 = vmax.f32 %v9143_v5, 0.0  ;;  %v9039_v11 = vpop.f32.mrb[55].mxu1  ;;  %6947 = vmatpush1.bf16.msra.mxu0 %v11575_v3 }
 0x2db   : > { %6948 = vmatprep.subr.bf16.mxu0 %v9705_v2 }
 0x2dc   : > { %v5045_v16 = vrot.slane %v5040_v10, %v10515_v19 }
 0x2de   : > { %5046 = vrot.lane.b32.xlu0 %v5045_v16, %s9709_s23  ;;  %6949 = vmatpush1.bf16.msra.mxu0 %v11582_v14  ;;  %v9596_v16 = vld [vmem:[%s11924_s3 + $0x1c0] sm:$0xff]  }
 0x2df   : > { %6950 = vmatprep.subr.bf16.mxu0 %v9705_v2 }
 0x2e2   : > { %6951 = vmatpush1.bf16.msra.mxu0 %v11591_v21 }
 0x2e3   : > { %6952 = vmatprep.subr.bf16.mxu0 %v9705_v2 }
 0x2e6   : > { %6953 = vmatpush1.bf16.msra.mxu0 %v11598_v12 }
 0x2e7   : > { %7086 = vmatprep.subr.bf16.mxu0 %v9705_v2 }
 0x2ec   : > { %v8812_v22 = vpop.f32.mrb[68].mxu0 }
 0x2ed   : > { %v8813_v23 = vpop.f32.mrb[69].mxu0 }
 0x2ee   : > { %v8814_v25 = vadd.f32 %v8813_v23, %v8812_v22  ;;  %v8815_v28 = vpop.f32.mrb[70].mxu0  ;;  %v11639_v22 = vld [vmem:[%s11926_s5 + $0xd0] sm:$0xff]   ;;  %v9597_v23 = vld [vmem:[%s11924_s3 + $0x1c8] sm:$0xff]  }
 0x2ef   : > { %v8816_v15 = vpop.f32.mrb[71].mxu0  ;;  %v9598_v28 = vld [vmem:[%s11924_s3 + $0x1d0] sm:$0xff]  }
 0x2f0   : > { %v9144_v36 = vadd.f32 %v8814_v25, %v5051_v17  ;;  %v11652_v25 = vld [vmem:[%s11926_s5 + $0xd8] sm:$0xff]   ;;  %v11663_v15 = vld [vmem:[%s11926_s5 + $0xe0] sm:$0xff]  }
 0x2f1   : > { %v9599_v17 = vld [vmem:[%s11924_s3 + $0x1d8] sm:$0xff]  }
 0x2f7   : > { %v8839_v32 = vpop.f32.mrb[60].mxu1 }
 0x2f8   : > { %v8840_v33 = vpop.f32.mrb[61].mxu1 }
 0x2f9   : > { %v8841_v9 = vadd.f32 %v8840_v33, %v8839_v32  ;;  %v8842_v37 = vpop.f32.mrb[62].mxu1  ;;  %v11675_v33 = vld [vmem:[%s11926_s5 + $0xe8] sm:$0xff]  }
 0x2fa   : > { %v8843_v34 = vpop.f32.mrb[63].mxu1 }
 0x2fb   : > { %v11606_v41 = vadd.f32 %v9144_v36, %v8841_v9 }
 0x30a   : > { %v4241_v40 = vpop.permute.xlu1 %4240 }
 0x30b   : > { %4244 = vst.msk [vmem:[#allocation3 + $0x1] sm:$0x1] %vm4243_vm10, %v4241_v40 }
 0x30c   : > { %4246 = vst.msk [vmem:[#allocation3 + $0x9] sm:$0x1] %vm4245_vm11, %v4241_v40 }
 0x30e   : > { %v3432_v46 = vpop.permute.xlu1 %3431 }
 0x30f   : > { %v3433_v48 = vrot.slane %v3432_v46, 7 }
 0x311   : > { %v3434_v50 = vsel %vm727_vm6, %v3433_v48, %v3432_v46 }
 0x312   : > { %3437 = vst.msk [vmem:[#allocation2 + $0x18] ss:$8 sm:$0x7] %vm10631_vm7, %v3434_v50  ;;  %v11694_v50 = vld [vmem:[%s11926_s5 + $0xf8] sm:$0xff]  }
 0x313   : > { %v6816_v51 = vld [vmem:[#allocation3 + $0x1] ss:$8 sm:$0x3] }
 0x314   : > { %v6825_v54 = vrot.slane %v6816_v51, %v10409_v13  ;;  %v6821_v55 = vrot.slane %v6816_v51, %v10515_v19  ;;  %v11701_v51 = vld [vmem:[%s11926_s5 + $0x100] sm:$0xff]  }
 0x316   : > { %v6829_v56 = vpack.c.bf16 %v6825_v54, %v6825_v54  ;;  %v6828_v57 = vpack.c.bf16 %v6821_v55, %v6821_v55 }
 0x317   : > { %v8893_v59 = vpop.f32.mrb[64].mxu1 }
 0x318   : > { %8580 = vmatprep.mubr.msk.bf16.mxu0 %vm333_vm2, %v6829_v56  ;;  %v8894_v61 = vpop.f32.mrb[65].mxu1 }
 0x319   : > { %6963 = vmatmul.mubr.bf16.vlgmr.msra.gmra.mrb[84].mxu0 %v6828_v57  ;;  %v6384_v62 = vld [vmem:[#allocation2 + $0x18] ss:$8 sm:$0x7]  ;;  %v11627_v0 = vadd.f32 %v8894_v61, %v8893_v59  ;;  %v8896_v4 = vpop.f32.mrb[66].mxu1  ;;  %v11715_v57 = vld [vmem:[%s11926_s5 + $0x110] sm:$0xff]  }
 0x31a   : > { %7087 = vmatpush1.bf16.msra.mxu0 %v11618_v58  ;;  %v6393_v5 = vrot.slane %v6384_v62, %v10409_v13  ;;  %v6389_v6 = vrot.slane %v6384_v62, %v10515_v19  ;;  %v8897_v52 = vpop.f32.mrb[67].mxu1  ;;  %v6397_v32 = vrot.slane %v6384_v62, %v10472_v49  ;;  %v11682_v49 = vld [vmem:[%s11926_s5 + $0xf0] sm:$0xff]  }
 0x31b   : > { %7088 = vmatprep.subr.bf16.mxu0 %v9705_v2 }
 0x31c   : > { %v6402_v10 = vpack.c.bf16 %v6393_v5, %v6393_v5  ;;  %v6401_v11 = vpack.c.bf16 %v6389_v6, %v6389_v6  ;;  %v6403_v9 = vpack.c.bf16 %v6397_v32, %v6397_v32  ;;  %v11723_v5 = vld [vmem:[%s11926_s5 + $0x118] sm:$0xff]  }
 0x31e   : > { %7089 = vmatpush1.bf16.msra.mxu0 %v11625_v31  ;;  %6599 = vmatprep.mubr.bf16.mxu1 %v6402_v10 }
 0x31f   : > { %7090 = vmatprep.subr.bf16.mxu0 %v9705_v2  ;;  %6600 = vmatmul.mubr.bf16.vlgmr.msra.gmra.mrb[72].mxu1 %v6401_v11 }
 0x320   : > { %9101 = vmatpush3.bf16.msra.mxu1 %v9596_v16  ;;  %9108 = vmatprep.mubr.msk.bf16.mxu1 %vm9708_vm3, %v9706_v8  ;;  %v5855_v16 = vld [vmem:[%s11925_s4] sm:$0x1] }
 0x321   : > { %9102 = vmatprep.subr.bf16.mxu1 %v9706_v8 }
 0x322   : > { %7091 = vmatpush1.bf16.msra.mxu0 %v11639_v22 }
 0x323   : > { %7092 = vmatprep.subr.bf16.mxu0 %v9705_v2 }
 0x324   : > { %9103 = vmatpush3.bf16.msra.mxu1 %v9597_v23 }
 0x325   : > { %9104 = vmatprep.subr.bf16.mxu1 %v9706_v8 }
 0x326   : > { %7093 = vmatpush1.bf16.msra.mxu0 %v11652_v25 }
 0x327   : > { %7094 = vmatprep.subr.bf16.mxu0 %v9705_v2 }
 0x328   : > { %9105 = vmatpush3.bf16.msra.mxu1 %v9598_v28 }
 0x329   : > { %9106 = vmatprep.subr.bf16.mxu1 %v9706_v8 }
 0x32a   : > { %7095 = vmatpush1.bf16.msra.mxu0 %v11663_v15 }
 0x32b   : > { %7096 = vmatprep.subr.bf16.mxu0 %v9705_v2 }
 0x32c   : > { %9107 = vmatpush3.bf16.msra.mxu1 %v9599_v17  ;;  %v8866_v36 = vpop.f32.mrb[76].mxu0 }
 0x32d   : > { %v8867_v37 = vpop.f32.mrb[77].mxu0  ;;  %9112 = vmatprep.subr.bf16.mxu1 %v9706_v8 }
 0x32e   : > { %7097 = vmatpush1.bf16.msra.mxu0 %v11675_v33  ;;  %v8868_v34 = vadd.f32 %v8867_v37, %v8866_v36  ;;  %v8869_v40 = vpop.f32.mrb[78].mxu0  ;;  %v9148_v36 = vadd.f32 %v11627_v0, %v5855_v16  ;;  %v9614_v0 = vld [vmem:[%s11928_s7 + $0x10] sm:$0xff]  }
 0x32f   : > { %7098 = vmatprep.subr.bf16.mxu0 %v9705_v2  ;;  %9109 = vmatmul.mubr.msk.bf16.vlgmr.msra.gmra.mrb[68].mxu1 %vm333_vm2, %v6403_v9  ;;  %v8870_v46 = vpop.f32.mrb[79].mxu0 }
 0x330   : > { %v9146_v48 = vadd.f32 %v11606_v41, %v8868_v34  ;;  %9120 = vmatprep.mubr.msk.bf16.mxu1 %vm9708_vm3, %v9706_v8  ;;  %v11708_v41 = vld [vmem:[%s11926_s5 + $0x108] sm:$0xff]   ;;  %v9612_v46 = vld [vmem:[%s11928_s7] sm:$0xff]  }
 0x331   : > { %9113 = vmatpush3.bf16.msra.mxu1 %v9612_v46 }
 0x332   : > { %7099 = vmatpush1.bf16.msra.mxu0 %v11682_v49  ;;  %9114 = vmatprep.subr.bf16.mxu1 %v9706_v8 }
 0x333   : > { %7100 = vmatprep.subr.bf16.mxu0 %v9705_v2 }
 0x336   : > { %7101 = vmatpush1.bf16.msra.mxu0 %v11694_v50 }
 0x337   : > { %7102 = vmatprep.subr.bf16.mxu0 %v9705_v2 }
 0x33a   : > { %7103 = vmatpush1.bf16.msra.mxu0 %v11701_v51 }
 0x33b   : > { %7104 = vmatprep.subr.bf16.mxu0 %v9705_v2 }
 0x33c   : > { %v5837_v54 = vpop.f32.mrb[72].mxu0 }
 0x33d   : > { %v9147_v55 = vadd.f32 %v9146_v48, %v5837_v54  ;;  %v9074_v56 = vpop.f32.mrb[73].mxu0  ;;  %v9613_v48 = vld [vmem:[%s11928_s7 + $0x8] sm:$0xff]   ;;  %v9615_v54 = vld [vmem:[%s11928_s7 + $0x18] sm:$0xff]  }
 0x33e   : > { %7105 = vmatpush1.bf16.msra.mxu0 %v11708_v41  ;;  %v5840_v59 = vpop.f32.mrb[74].mxu0  ;;  %9115 = vmatpush3.bf16.msra.mxu1 %v9613_v48 }
 0x33f   : > { %7106 = vmatprep.subr.bf16.mxu0 %v9705_v2  ;;  %v5844_v61 = vmax.f32 %v9147_v55, 0.0  ;;  %v9075_v62 = vpop.f32.mrb[75].mxu0  ;;  %9116 = vmatprep.subr.bf16.mxu1 %v9706_v8 }
 0x341   : > { %v5849_v4 = vrot.slane %v5844_v61, %v10515_v19 }
 0x342   : > { %7107 = vmatpush1.bf16.msra.mxu0 %v11715_v57  ;;  %9117 = vmatpush3.bf16.msra.mxu1 %v9614_v0 }
 0x343   : > { %7108 = vmatprep.subr.bf16.mxu0 %v9705_v2  ;;  %5850 = vrot.lane.b32.xlu0 %v5849_v4, %s9709_s23 }
 0x344   : > { %9118 = vmatprep.subr.bf16.mxu1 %v9706_v8 }
 0x346   : > { %7109 = vmatpush1.bf16.msra.mxu0 %v11723_v5  ;;  %9119 = vmatpush3.bf16.msra.mxu1 %v9615_v54 }
 0x347   : > { %7205 = vmatprep.subr.bf16.mxu1 %v9705_v2 }
 0x350   : > { %v5047_v6 = vpop.permute.xlu0 %5046 }
 0x351   : > { %5049 = vst.msk [vmem:[#allocation3 + $0x2] sm:$0x1] %vm4243_vm10, %v5047_v6 }
 0x352   : > { %5050 = vst.msk [vmem:[#allocation3 + $0xa] sm:$0x1] %vm4245_vm11, %v5047_v6 }
 0x359   : > { %v6972_v52 = vld [vmem:[#allocation3 + $0x2] ss:$8 sm:$0x3] }
 0x35a   : > { %v6981_v10 = vrot.slane %v6972_v52, %v10409_v13  ;;  %v6977_v11 = vrot.slane %v6972_v52, %v10515_v19 }
 0x35c   : > { %v6985_v23 = vpack.c.bf16 %v6981_v10, %v6981_v10  ;;  %v11735_v28 = vpack.c.bf16 %v6977_v11, %v6977_v11  ;;  %v8920_v17 = vpop.f32.mrb[80].mxu0 }
 0x35d   : > { %v8921_v32 = vpop.f32.mrb[81].mxu0 }
 0x35e   : > { %8617 = vmatprep.mubr.msk.bf16.mxu0 %vm333_vm2, %v6985_v23  ;;  %v8922_v9 = vadd.f32 %v8921_v32, %v8920_v17  ;;  %v8923_v37 = vpop.f32.mrb[82].mxu0 }
 0x35f   : > { %7119 = vmatmul.mubr.bf16.vlgmr.msra.gmra.mrb[84].mxu0 %v11735_v28  ;;  %v8924_v34 = vpop.f32.mrb[83].mxu0 }
 0x360   : > { %v9149_v40 = vadd.f32 %v9148_v36, %v8922_v9  ;;  %v11763_v9 = vld [vmem:[%s11927_s6] sm:$0x1] }
 0x3b5   : > { %v5851_v55 = vpop.permute.xlu0 %5850 }
 0x3b6   : > { %5853 = vst.msk [vmem:[#allocation3 + $0x3] sm:$0x1] %vm4243_vm10, %v5851_v55 }
 0x3b7   : > { %5854 = vst.msk [vmem:[#allocation3 + $0xb] sm:$0x1] %vm4245_vm11, %v5851_v55 }
 0x3f2   : > { %v8947_v56 = vpop.f32.mrb[72].mxu1 }
 0x3f3   : > { %v8948_v59 = vpop.f32.mrb[73].mxu1 }
 0x3f4   : > { %v8949_v61 = vadd.f32 %v8948_v59, %v8947_v56  ;;  %v8950_v62 = vpop.f32.mrb[74].mxu1 }
 0x3f5   : > { %v8951_v4 = vpop.f32.mrb[75].mxu1 }
 0x3f6   : > { %v9150_v6 = vadd.f32 %v9149_v40, %v8949_v61 }
 0x402   : > { %v6641_v52 = vpop.f32.mrb[68].mxu1 }
 0x403   : > { %v9151_v10 = vadd.f32 %v9150_v6, %v6641_v52  ;;  %v9110_v11 = vpop.f32.mrb[69].mxu1 }
 0x404   : > { %v6644_v16 = vpop.f32.mrb[70].mxu1 }
 0x405   : > { %v6648_v17 = vmax.f32 %v9151_v10, 0.0  ;;  %v9111_v32 = vpop.f32.mrb[71].mxu1 }
 0x407   : > { %v6653_v36 = vrot.slane %v6648_v17, %v10515_v19 }
 0x409   : > { %6654 = vrot.lane.b32.xlu1 %v6653_v36, %s9709_s23  ;;  %s324_s23 = scalar_lea.vmem [#allocation4], %s323_s16 }
 0x40a   : > { %s7467_s21 = sshll.u32 %s324_s23, 4  ;;  %s11880_s21 = int_to_ptr.vmem [resolvable:$true] %s7467_s21 }
 0x40b   : > { %s9641_s25 = scalar_lea.vmem %s11880_s21, 16  ;;  %p9648_p0 = scmp.lt.s32.totalorder %s11880_s21, %s9646_s28 }
 0x40c   : > { %p9642_p11 = scmp.ne.s32.totalorder %s11880_s21, %s9641_s25  ;;  %p9649_p1 = scmp.lt.s32.totalorder %s9647_s29, %s9641_s25 }
 0x40e   : > { %p9643_p12 = pnand %p9642_p11, %p9799_p5  ;;  %p9650_p2 = por %p9649_p1, %p9648_p0 }
 0x410   : > { %p9644_p13 = pneg %p9643_p12 }
 0x412   : > { %p9651_p3 = pnand %p9650_p2, %p9644_p13 }
 0x432   : > { %v7120_v37 = vpop.f32.mrb[84].mxu0 }
 0x433   : > { %v9152_v34 = vadd.f32 %v7120_v37, %v11763_v9  ;;  %v7122_v46 = vpop.f32.mrb[85].mxu0 }
 0x434   : > { %v7123_v40 = vpop.f32.mrb[86].mxu0 }
 0x435   : > { %v7127_v48 = vmax.f32 %v9152_v34, 0.0  ;;  %v7124_v0 = vpop.f32.mrb[87].mxu0 }
 0x437   : > { %v7128_v54 = vpack.c.bf16 %v7127_v48, %v7127_v48 }
 0x439   : > { %9121 = vmatmul.mubr.msk.bf16.vlgmr.msra.gmra.mrb[76].mxu1 %vm333_vm2, %v7128_v54 }
 0x43a   : > { %7206 = vmatpush1.bf16.msra.mxu1 %v11395_v39  ;;  %8623 = vmatprep.mubr.msk.bf16.mxu1 %vm333_vm2, %v6985_v23  ;;  %v7247_v39 = vld [vmem:[#allocation3 + $0x3] ss:$8 sm:$0x3] }
 0x43b   : > { %7207 = vmatprep.subr.bf16.mxu1 %v9705_v2 }
 0x43e   : > { %7208 = vmatpush1.bf16.msra.mxu1 %v11402_v63  ;;  %v7256_v63 = vrot.slane %v7247_v39, %v10409_v13 }
 0x43f   : > { %7209 = vmatprep.subr.bf16.mxu1 %v9705_v2 }
 0x442   : > { %7210 = vmatpush1.bf16.msra.mxu1 %v11417_v7  ;;  %v7260_v7 = vpack.c.bf16 %v7256_v63, %v7256_v63 }
 0x443   : > { %7211 = vmatprep.subr.bf16.mxu1 %v9705_v2 }
 0x446   : > { %7212 = vmatpush1.bf16.msra.mxu1 %v11431_v20 }
 0x447   : > { %7213 = vmatprep.subr.bf16.mxu1 %v9705_v2 }
 0x44a   : > { %7214 = vmatpush1.bf16.msra.mxu1 %v11448_v26 }
 0x44b   : > { %7215 = vmatprep.subr.bf16.mxu1 %v9705_v2 }
 0x44e   : > { %7216 = vmatpush1.bf16.msra.mxu1 %v11463_v18  ;;  %v7252_v18 = vrot.slane %v7247_v39, %v10515_v19 }
 0x44f   : > { %7217 = vmatprep.subr.bf16.mxu1 %v9705_v2 }
 0x452   : > { %7218 = vmatpush1.bf16.msra.mxu1 %v11472_v27 }
 0x453   : > { %7219 = vmatprep.subr.bf16.mxu1 %v9705_v2 }
 0x456   : > { %7220 = vmatpush1.bf16.msra.mxu1 %v11479_v29  ;;  %v7259_v29 = vpack.c.bf16 %v7252_v18, %v7252_v18 }
 0x457   : > { %7221 = vmatprep.subr.bf16.mxu1 %v9705_v2 }
 0x45a   : > { %7222 = vmatpush1.bf16.msra.mxu1 %v11486_v24 }
 0x45b   : > { %7223 = vmatprep.subr.bf16.mxu1 %v9705_v2 }
 0x45e   : > { %7224 = vmatpush1.bf16.msra.mxu1 %v11493_v30  ;;  %v9616_v30 = vld [vmem:[%s11928_s7 + $0x20] sm:$0xff]  }
 0x45f   : > { %7225 = vmatprep.subr.bf16.mxu1 %v9705_v2 }
 0x462   : > { %7226 = vmatpush1.bf16.msra.mxu1 %v11500_v47 }
 0x463   : > { %7227 = vmatprep.subr.bf16.mxu1 %v9705_v2 }
 0x466   : > { %7228 = vmatpush1.bf16.msra.mxu1 %v11509_v38  ;;  %v9617_v38 = vld [vmem:[%s11928_s7 + $0x28] sm:$0xff]  }
 0x467   : > { %7264 = vmatprep.subr.bf16.mxu1 %v9705_v2 }
 0x469   : > { %7238 = vmatmul.mubr.bf16.vlgmr.msra.gmra.mrb[80].mxu1 %v11735_v28 }
 0x46a   : > { %7265 = vmatpush1.bf16.msra.mxu1 %v11516_v42  ;;  %8624 = vmatprep.mubr.msk.bf16.mxu1 %vm333_vm2, %v7260_v7 }
 0x46b   : > { %7266 = vmatprep.subr.bf16.mxu1 %v9705_v2 }
 0x46e   : > { %7267 = vmatpush1.bf16.msra.mxu1 %v11523_v43 }
 0x46f   : > { %7268 = vmatprep.subr.bf16.mxu1 %v9705_v2 }
 0x472   : > { %7269 = vmatpush1.bf16.msra.mxu1 %v11530_v44 }
 0x473   : > { %7270 = vmatprep.subr.bf16.mxu1 %v9705_v2 }
 0x476   : > { %7271 = vmatpush1.bf16.msra.mxu1 %v11537_v45 }
 0x477   : > { %7272 = vmatprep.subr.bf16.mxu1 %v9705_v2 }
 0x47a   : > { %7273 = vmatpush1.bf16.msra.mxu1 %v11544_v35 }
 0x47b   : > { %7274 = vmatprep.subr.bf16.mxu1 %v9705_v2  ;;  %v6655_v20 = vpop.permute.xlu1 %6654 }
 0x47c   : > { %6657 = vst.msk [vmem:[#allocation3 + $0x4] sm:$0x1] %vm4243_vm10, %v6655_v20 }
 0x47d   : > { %6658 = vst.msk [vmem:[#allocation3 + $0xc] sm:$0x1] %vm4245_vm11, %v6655_v20 }
 0x47e   : > { %7275 = vmatpush1.bf16.msra.mxu1 %v11551_v53 }
 0x47f   : > { %7276 = vmatprep.subr.bf16.mxu1 %v9705_v2 }
 0x482   : > { %7277 = vmatpush1.bf16.msra.mxu1 %v11561_v60 }
 0x483   : > { %7278 = vmatprep.subr.bf16.mxu1 %v9705_v2 }
 0x484   : > { %v7306_v26 = vld [vmem:[#allocation3 + $0x4] ss:$8 sm:$0x3] }
 0x485   : > { %v7315_v27 = vrot.slane %v7306_v26, %v10409_v13  ;;  %v7311_v13 = vrot.slane %v7306_v26, %v10515_v19  ;;  %v9619_v19 = vld [vmem:[%s11928_s7 + $0x38] sm:$0xff]  }
 0x486   : > { %7279 = vmatpush1.bf16.msra.mxu1 %v11568_v1  ;;  %v6659_v1 = vld [vmem:[%s11929_s8] sm:$0x1] }
 0x487   : > { %7280 = vmatprep.subr.bf16.mxu1 %v9705_v2  ;;  %v7319_v24 = vpack.c.bf16 %v7315_v27, %v7315_v27  ;;  %v7318_v47 = vpack.c.bf16 %v7311_v13, %v7311_v13 }
 0x48a   : > { %7281 = vmatpush1.bf16.msra.mxu1 %v11575_v3 }
 0x48b   : > { %7282 = vmatprep.subr.bf16.mxu1 %v9705_v2 }
 0x48e   : > { %7283 = vmatpush1.bf16.msra.mxu1 %v11582_v14 }
 0x48f   : > { %7284 = vmatprep.subr.bf16.mxu1 %v9705_v2 }
 0x492   : > { %7285 = vmatpush1.bf16.msra.mxu1 %v11591_v21 }
 0x493   : > { %7286 = vmatprep.subr.bf16.mxu1 %v9705_v2 }
 0x496   : > { %7287 = vmatpush1.bf16.msra.mxu1 %v11598_v12 }
 0x497   : > { %7323 = vmatprep.subr.bf16.mxu1 %v9705_v2 }
 0x499   : > { %7297 = vmatmul.mubr.bf16.vlgmr.msra.gmra.mrb[80].mxu1 %v7259_v29 }
 0x49a   : > { %7324 = vmatpush1.bf16.msra.mxu1 %v11618_v58  ;;  %8625 = vmatprep.mubr.msk.bf16.mxu1 %vm333_vm2, %v7319_v24 }
 0x49b   : > { %7325 = vmatprep.subr.bf16.mxu1 %v9705_v2 }
 0x49e   : > { %7326 = vmatpush1.bf16.msra.mxu1 %v11625_v31 }
 0x49f   : > { %7327 = vmatprep.subr.bf16.mxu1 %v9705_v2 }
 0x4a2   : > { %7328 = vmatpush1.bf16.msra.mxu1 %v11639_v22 }
 0x4a3   : > { %7329 = vmatprep.subr.bf16.mxu1 %v9705_v2 }
 0x4a6   : > { %7330 = vmatpush1.bf16.msra.mxu1 %v11652_v25 }
 0x4a7   : > { %7331 = vmatprep.subr.bf16.mxu1 %v9705_v2 }
 0x4aa   : > { %7332 = vmatpush1.bf16.msra.mxu1 %v11663_v15 }
 0x4ab   : > { %7333 = vmatprep.subr.bf16.mxu1 %v9705_v2 }
 0x4ae   : > { %7334 = vmatpush1.bf16.msra.mxu1 %v11675_v33 }
 0x4af   : > { %7335 = vmatprep.subr.bf16.mxu1 %v9705_v2 }
 0x4b2   : > { %7336 = vmatpush1.bf16.msra.mxu1 %v11682_v49 }
 0x4b3   : > { %7337 = vmatprep.subr.bf16.mxu1 %v9705_v2 }
 0x4b6   : > { %7338 = vmatpush1.bf16.msra.mxu1 %v11694_v50 }
 0x4b7   : > { %7339 = vmatprep.subr.bf16.mxu1 %v9705_v2 }
 0x4ba   : > { %7340 = vmatpush1.bf16.msra.mxu1 %v11701_v51 }
 0x4bb   : > { %7341 = vmatprep.subr.bf16.mxu1 %v9705_v2 }
 0x4be   : > { %7342 = vmatpush1.bf16.msra.mxu1 %v11708_v41 }
 0x4bf   : > { %7343 = vmatprep.subr.bf16.mxu1 %v9705_v2 }
 0x4c2   : > { %7344 = vmatpush1.bf16.msra.mxu1 %v11715_v57 }
 0x4c3   : > { %7345 = vmatprep.subr.bf16.mxu1 %v9705_v2  ;;  %v9618_v2 = vld [vmem:[%s11928_s7 + $0x30] sm:$0xff]  }
 0x4c6   : > { %7346 = vmatpush1.bf16.msra.mxu1 %v11723_v5 }
 0x4c7   : > { %9124 = vmatprep.subr.bf16.mxu1 %v9706_v8 }
 0x4c9   : > { %7356 = vmatmul.mubr.bf16.vlgmr.msra.gmra.mrb[80].mxu1 %v7318_v47 }
 0x4ca   : > { %9125 = vmatpush3.bf16.msra.mxu1 %v9616_v30  ;;  %9132 = vmatprep.mubr.msk.bf16.mxu1 %vm9708_vm3, %v9706_v8 }
 0x4cb   : > { %9126 = vmatprep.subr.bf16.mxu1 %v9706_v8 }
 0x4ce   : > { %9127 = vmatpush3.bf16.msra.mxu1 %v9617_v38 }
 0x4cf   : > { %9128 = vmatprep.subr.bf16.mxu1 %v9706_v8 }
 0x4d2   : > { %9129 = vmatpush3.bf16.msra.mxu1 %v9618_v2 }
 0x4d3   : > { %9130 = vmatprep.subr.bf16.mxu1 %v9706_v8 }
 0x4d6   : > { %9131 = vmatpush3.bf16.msra.mxu1 %v9619_v19 }
 0x59c   : > { %v7357_v42 = vpop.f32.mrb[80].mxu1 }
 0x59d   : > { %v9154_v43 = vadd.f32 %v7357_v42, %v11763_v9  ;;  %v7359_v44 = vpop.f32.mrb[81].mxu1 }
 0x59e   : > { %v7360_v45 = vpop.f32.mrb[82].mxu1 }
 0x59f   : > { %v7364_v35 = vmax.f32 %v9154_v43, 0.0  ;;  %v7361_v53 = vpop.f32.mrb[83].mxu1 }
 0x5a1   : > { %v7365_v60 = vpack.c.bf16 %v7364_v35, %v7364_v35 }
 0x5a3   : > { %9133 = vmatmul.mubr.msk.bf16.vlgmr.msra.gmra.mrb[76].mxu1 %vm333_vm2, %v7365_v60 }
 0x676   : > { %v7435_v8 = vpop.f32.mrb[76].mxu1 }
 0x677   : > { %v9153_v3 = vadd.f32 %v7435_v8, %v6659_v1  ;;  %v9134_v14 = vpop.f32.mrb[77].mxu1 }
 0x678   : > { %v7438_v21 = vpop.f32.mrb[78].mxu1 }
 0x679   : > { %v9135_v12 = vpop.f32.mrb[79].mxu1  ;;  %v7442_v58 = vsel %vm4245_vm11, %v9153_v3, -inf }
 0x67a   : > { %7443 = vmax.xlane.f32.xlu0 %v7442_v58 }
 0x707   : > { %v7444_v31 = vpop.xlane.xlu0 %7443 }
 0x708   : > { %v7445_v22 = vsub.f32 %v9153_v3, %v7444_v31 }
 0x70a   : > { %v7446_v25 = vmul.f32 1.442695, %v7445_v22 }
 0x70c   : > { %9620 = vpow2.f32 %v7446_v25 }
 0x716   : > { %v9621_v15 = vpop.eup %9620 }
 0x717   : > { %v7448_v33 = vsel %vm4245_vm11, %v9621_v15, 0.0 }
 0x718   : > { %7449 = vadd.xlane.f32.xlu1 %v7448_v33 }
 0x7a5   : > { %v7450_v49 = vpop.xlane.xlu1 %7449 }
 0x7a6   : > { %9622 = vrcp.f32 %v7450_v49 }
 0x7b0   : > { %v9623_v50 = vpop.eup %9622 }
 0x7b1   : > { %v7452_v51 = vmul.f32 %v9623_v50, %v9621_v15 }
 0x7b3   : > { %7453 = vst.msk [vmem:[%s324_s23] sm:$0x1] %vm4245_vm11, %v7452_v51 }
 0x7b4   : > { %9654 = shalt.err (!%p9651_p3)
}
 0x7b5   : > { %s9655_s14 = scalar_lea.hbm %s11878_s27, 16  ;;  %s9659_s23 = scalar_lea.hbm %s11930_s9, 32 }
 0x7b6   : > { %p9656_p4 = scmp.ne.s32.totalorder %s11878_s27, %s9655_s14  ;;  %p9660_p9 = scmp.lt.u32.totalorder %s11878_s27, %s11930_s9 }
 0x7b7   : > { %p9661_p10 = scmp.lt.u32.totalorder %s9659_s23, %s9655_s14  ;;  %p9663_p12 = scmp.lt.u32.totalorder %s9655_s14, %s11878_s27 }
 0x7b8   : > { %p9657_p7 = pnand %p9656_p4, %p9799_p5 }
 0x7b9   : > { %p9662_p11 = por %p9661_p10, %p9660_p9 }
 0x7ba   : > { %p9658_p8 = pneg %p9657_p7 }
 0x7bb   : > { %p9664_p13 = por %p9663_p12, %p9662_p11 }
 0x7bd   : > { %p9665_p0 = pnand %p9664_p13, %p9658_p8 }
 0x7bf   : > { %9668 = shalt.err (!%p9665_p0)
}
 0x7c0   : > { %9208 = dma.vmem_to_hbm [thread:$0]  (%p9799_p5), %s11880_s21, 16, %s11878_s27, %s7455_s22  }
 0x7c1 PF: > { %p9214_p1 = scmp.ge.s32.totalorder %s9703_s12, 2  ;;  %s7479_s25 = sand.u32 1, %s9691_s30  }
 0x7c2   : > { %s7480_s13 = scalar_lea.sflag [#allocation5], %s7479_s25 }
 0x7c3   : > { %p9211_p2 = pnand %p9214_p1, %p9803_p6 }
 0x7c5   : > { %9686 = dma.done.wait (!%p9211_p2), %s7480_s13, 16  }
 0x7c6   : > { %9688 = vsyncadd (!%p9211_p2), %s7480_s13, 4294967280  ;;  %p19_p3 = scmp.ge.s32.totalorder %s9786_s15, 4   ;;  %s11935_s30 = smov %s9695_s10 }
 0x7c7   : > { %s11936_s10 = smov %s9699_s11  ;;  %s11937_s11 = smov %s9797_s18 }
 0x7c8   : > { %s11938_s12 = smov %s9786_s15  ;;  %21 = sbr.rel (!%p19_p3) target bundleno = 3 (0x3), region = 109 }
 0x7cf   :  { %7484 = vsyncpa [#allocation5], 1 }
 0x7d0   :  { %7486 = vsyncpa [#allocation5 + $0x1], 1 }

</bundles_post_ra>
